<compile_context>
chip_gen: v7x
topology: tpu7x:2x2x1
jax: 0.10.0
libtpu: 0.0.40
codegen_flags: <defaults>
</compile_context>

<pallas_src>
import math
import functools

import jax
import jax.numpy as jnp
from jax.experimental import pallas as pl
from jax.experimental.pallas import tpu as pltpu


def path_attention_kernel(
    x1_ref, x2_ref, a1_ref, a2_ref, a1u_ref, a2u_ref,
    vmask_ref, qmask_ref,
    wq_ref, bq_ref, cw_ref, cb_ref, wr_ref, br_ref,
    emb1_ref, emb2_ref, satt1_ref, satt2_ref,
    *, h_num, H):
    """One grid step == one batch element; heads are batched inside."""
    f32 = jnp.float32
    neg = -1e9
    inv_sqrt_h = 1.0 / math.sqrt(float(H))

    x1 = x1_ref[0]            # (N1, d1)
    x2 = x2_ref[0]            # (N2, d2)
    a1 = a1_ref[0]            # (h, N2, N1)
    a2 = a2_ref[0]            # (h, N1, N2)
    a1u = a1u_ref[0]          # (h, N2, N1)   == a1_
    a2u = a2u_ref[0]          # (h, N1, N2)   == a2_
    vm = vmask_ref[0]         # (1, 1, N2)    1.0 where masked
    qm = qmask_ref[0]         # (1, N1, 1)

    # ---- Q projection (one MXU matmul == concat of per-head FCNet projections) ----
    Q = jnp.dot(x1, wq_ref[...], preferred_element_type=f32) + bq_ref[...]
    # AvgPool1d over the token axis -> per-feature gates; hoisted to full width.
    gate1 = jnp.mean(Q, axis=0, keepdims=True)      # (1, d2)  (from Q)
    gate2 = jnp.mean(x2, axis=0, keepdims=True)     # (1, d2)  (from x2)
    Ds = x2 * gate1          # (N2, d2) == per-head D * gate1, full lane width
    Qs = Q * gate2           # (N1, d2) == per-head Q * gate2

    # ---- head-batched affinity ----
    a1sum = jnp.sum(a1, axis=1, keepdims=True)      # (h, 1, N1)
    a2sum = jnp.sum(a2, axis=1, keepdims=True)      # (h, 1, N2)
    a1usum = jnp.sum(a1u, axis=2, keepdims=True)    # (h, N2, 1)
    a2usum = jnp.sum(a2u, axis=2, keepdims=True)    # (h, N1, 1)

    L1 = jnp.tanh(a2usum * a1sum)                   # (h, N1, N1)
    L2 = jnp.tanh(a1usum * a2sum)                   # (h, N2, N2)

    t1 = jnp.einsum('hij,hjk->hik', a1u, L1, preferred_element_type=f32)  # (h, N2, N1)
    t2 = jnp.einsum('hij,hjk->hik', a2u, L2, preferred_element_type=f32)  # (h, N1, N2)
    Lg = jnp.transpose(t1, (0, 2, 1)) * t2          # (h, N1, N2)

    # grouped 1x1 conv (weight_norm folded) == per-head scale + bias, batched.
    aff = (cw_ref[...] * Lg + cb_ref[...]) * inv_sqrt_h          # (h, N1, N2)

    # ---- batched masked softmaxes ----
    # satt1: mask over N2 columns with v_mask, softmax over N1 (torch dim=2)
    lm1 = jnp.where(vm > 0.5, neg, aff)
    mx1 = jnp.max(lm1, axis=1, keepdims=True)
    e1 = jnp.exp(lm1 - mx1)
    satt1 = e1 / jnp.sum(e1, axis=1, keepdims=True)              # (h, N1, N2)

    # satt2: mask over N1 rows with q_mask, softmax over N2 (torch dim=3), transpose
    lm2 = jnp.where(qm > 0.5, neg, aff)
    mx2 = jnp.max(lm2, axis=2, keepdims=True)
    e2 = jnp.exp(lm2 - mx2)
    satt2 = jnp.transpose(e2 / jnp.sum(e2, axis=2, keepdims=True), (0, 2, 1))  # (h, N2, N1)

    # whole-block stores (one store per output instead of 8 per-head stores)
    satt1_ref[0] = satt1
    satt2_ref[0] = satt2

    # ---- per-head MXU matmuls, assembled into lane-dense full-width tiles ----
    m1_parts = []
    m2_parts = []
    for g in range(h_num):                    # static unroll, MXU-only work
        sl = slice(g * H, (g + 1) * H)
        m1_parts.append(jnp.dot(satt1[g], Ds[:, sl], preferred_element_type=f32))  # (N1, H)
        m2_parts.append(jnp.dot(satt2[g], Qs[:, sl], preferred_element_type=f32))  # (N2, H)
    m1 = jnp.concatenate(m1_parts, axis=-1)   # (N1, d2)  == C_Q before v_reform
    m2 = jnp.concatenate(m2_parts, axis=-1)   # (N2, d2)  == C_D

    # v_reform as a single (N1, d2) @ (d2, d1) contraction
    cq = jnp.dot(m1, wr_ref[...], preferred_element_type=f32) + br_ref[...]
    emb1_ref[0] = x1 * cq                     # (N1, d1) lane-dense store
    emb2_ref[0] = x2 * m2                     # (N2, d2) lane-dense store


def path_attention(x1, x2, a1, a2, a1_, a2_, v_mask, q_mask, params, h_num=8):
    B, N1, d1 = x1.shape
    _, N2, d2 = x2.shape
    H = d2 // h_num
    wq, bq, conv_w, conv_b, wr, br = params

    vmask_f = v_mask.astype(jnp.float32).reshape(B, 1, 1, N2)
    qmask_f = q_mask.astype(jnp.float32).reshape(B, 1, N1, 1)
    bq2 = bq.reshape(1, d2)
    br2 = br.reshape(1, d1)
    cw3 = conv_w.reshape(h_num, 1, 1)
    cb3 = conv_b.reshape(h_num, 1, 1)

    kernel = functools.partial(path_attention_kernel, h_num=h_num, H=H)

    b3 = lambda b: (b, 0, 0)
    b4 = lambda b: (b, 0, 0, 0)
    c2 = lambda b: (0, 0)
    c3 = lambda b: (0, 0, 0)

    in_specs = [
        pl.BlockSpec((1, N1, d1), b3),             # x1
        pl.BlockSpec((1, N2, d2), b3),             # x2
        pl.BlockSpec((1, h_num, N2, N1), b4),      # a1
        pl.BlockSpec((1, h_num, N1, N2), b4),      # a2
        pl.BlockSpec((1, h_num, N2, N1), b4),      # a1_
        pl.BlockSpec((1, h_num, N1, N2), b4),      # a2_
        pl.BlockSpec((1, 1, 1, N2), b4),           # v_mask (float)
        pl.BlockSpec((1, 1, N1, 1), b4),           # q_mask (float)
        pl.BlockSpec((d1, d2), c2),                # Wq (concat of head projections)
        pl.BlockSpec((1, d2), c2),                 # bq
        pl.BlockSpec((h_num, 1, 1), c3),           # conv weight (per-head scale)
        pl.BlockSpec((h_num, 1, 1), c3),           # conv bias
        pl.BlockSpec((d2, d1), c2),                # Wr (v_reform)
        pl.BlockSpec((1, d1), c2),                 # br
    ]
    out_specs = (
        pl.BlockSpec((1, N1, d1), b3),             # emb1
        pl.BlockSpec((1, N2, d2), b3),             # emb2
        pl.BlockSpec((1, h_num, N1, N2), b4),      # satt1
        pl.BlockSpec((1, h_num, N2, N1), b4),      # satt2
    )
    out_shapes = (
        jax.ShapeDtypeStruct((B, N1, d1), jnp.float32),
        jax.ShapeDtypeStruct((B, N2, d2), jnp.float32),
        jax.ShapeDtypeStruct((B, h_num, N1, N2), jnp.float32),
        jax.ShapeDtypeStruct((B, h_num, N2, N1), jnp.float32),
    )

    # Explicit VMEM sizing + advisory cost estimate (review items).
    block_elems = (2 * (N1 * d1 + N2 * d2) + 6 * h_num * N1 * N2 + N1 + N2
                   + 2 * d1 * d2 + d1 + d2 + 2 * h_num)
    block_bytes = 4 * block_elems
    vmem_limit = int(min(64 * 1024 * 1024,
                         max(32 * 1024 * 1024, 4 * block_bytes + (8 << 20))))
    flops = B * (2 * N1 * d1 * d2 + 2 * N1 * d2 * d1
                 + 2 * h_num * (N2 * N1 * N1 + N1 * N2 * N2)
                 + 4 * h_num * N1 * N2 * H)
    transcendentals = B * h_num * (N1 * N1 + N2 * N2 + 2 * N1 * N2)
    cost = pl.CostEstimate(flops=int(flops),
                           transcendentals=int(transcendentals),
                           bytes_accessed=int(B * block_bytes))

    return pl.pallas_call(
        kernel,
        out_shape=out_shapes,
        grid_spec=pltpu.PrefetchScalarGridSpec(
            num_scalar_prefetch=0,
            grid=(B,),
            in_specs=in_specs,
            out_specs=out_specs,
        ),
        compiler_params=pltpu.CompilerParams(
            dimension_semantics=("parallel",),
            vmem_limit_bytes=vmem_limit),
        cost_estimate=cost,
    )(x1, x2, a1, a2, a1_, a2_, vmask_f, qmask_f,
      wq, bq2, cw3, cb3, wr, br2)


def path_attention_ref(x1, x2, a1, a2, a1_, a2_, v_mask, q_mask, params, h_num=8):
    """Pure-JAX reference mirroring the PyTorch forward (for the self-check)."""
    wq, bq, conv_w, conv_b, wr, br = params
    B, N1, d1 = x1.shape
    _, N2, d2 = x2.shape
    H = d2 // h_num
    Q = x1 @ wq + bq
    gate1 = jnp.mean(Q, axis=1, keepdims=True)
    gate2 = jnp.mean(x2, axis=1, keepdims=True)
    Qh = jnp.transpose(Q.reshape(B, N1, h_num, H), (0, 2, 1, 3))
    Dh = jnp.transpose(x2.reshape(B, N2, h_num, H), (0, 2, 1, 3))
    g1 = jnp.transpose(gate1.reshape(B, 1, h_num, H), (0, 2, 1, 3))
    g2 = jnp.transpose(gate2.reshape(B, 1, h_num, H), (0, 2, 1, 3))
    a1sum = jnp.sum(a1, axis=2)[:, :, None, :]
    a2sum = jnp.sum(a2, axis=2)[:, :, None, :]
    a1_sum = jnp.sum(a1_, axis=3)[:, :, :, None]
    a2_sum = jnp.sum(a2_, axis=3)[:, :, :, None]
    L1 = jnp.tanh(a2_sum @ a1sum)
    L2 = jnp.tanh(a1_sum @ a2sum)
    L_ = jnp.swapaxes(a1_ @ L1, 2, 3) * (a2_ @ L2)
    aff = (conv_w[None, :, None, None] * L_ + conv_b[None, :, None, None]) / math.sqrt(H)
    vm = v_mask.reshape(B, 1, 1, N2)
    qm = q_mask.reshape(B, 1, N1, 1)
    satt1 = jax.nn.softmax(jnp.where(vm, -1e9, aff), axis=2)
    m1 = satt1 @ (Dh * g1)
    satt2 = jnp.swapaxes(jax.nn.softmax(jnp.where(qm, -1e9, aff), axis=3), 2, 3)
    m2 = satt2 @ (Qh * g2)
    C_Q = jnp.swapaxes(m1, 1, 2).reshape(B, N1, d2) @ wr + br
    C_D = jnp.swapaxes(m2, 1, 2).reshape(B, N2, d2)
    return x1 * C_Q, x2 * C_D, satt1, satt2


if __name__ == "__main__":
    key = jax.random.PRNGKey(0)
    B, N1, N2 = 2, 16, 24
    d_model1, d_model2 = 32, 64
    h_num = 8
    H = d_model2 // h_num

    ks = jax.random.split(key, 12)
    x1 = jax.random.normal(ks[0], (B, N1, d_model1), jnp.float32)
    x2 = jax.random.normal(ks[1], (B, N2, d_model2), jnp.float32)
    a1 = jax.random.normal(ks[2], (B, h_num, N2, N1), jnp.float32) * 0.2
    a2 = jax.random.normal(ks[3], (B, h_num, N1, N2), jnp.float32) * 0.2
    a1_ = jax.random.normal(ks[4], (B, h_num, N2, N1), jnp.float32) * 0.2
    a2_ = jax.random.normal(ks[5], (B, h_num, N1, N2), jnp.float32) * 0.2

    # boolean masks (True == masked), matching torch masked_fill semantics
    v_mask = jnp.zeros((B, 1, N2, 1), jnp.bool_).at[:, :, N2 - 4:, :].set(True)
    q_mask = jnp.zeros((B, 1, N1, 1), jnp.bool_).at[:, :, N1 - 3:, :].set(True)

    # deterministic synthetic parameters (effective weights after weight_norm)
    wq = 0.05 * jax.random.normal(ks[6], (d_model1, d_model2), jnp.float32)
    bq = 0.05 * jax.random.normal(ks[7], (d_model2,), jnp.float32)
    conv_w = 1.0 + 0.1 * jax.random.normal(ks[8], (h_num,), jnp.float32)
    conv_b = 0.05 * jax.random.normal(ks[9], (h_num,), jnp.float32)
    wr = 0.05 * jax.random.normal(ks[10], (d_model2, d_model1), jnp.float32)
    br = 0.05 * jax.random.normal(ks[11], (d_model1,), jnp.float32)
    params = (wq, bq, conv_w, conv_b, wr, br)

    outs = path_attention(x1, x2, a1, a2, a1_, a2_, v_mask, q_mask, params, h_num=h_num)
    jax.block_until_ready(outs)
    emb1, emb2, satt1, satt2 = outs

    assert emb1.shape == (B, N1, d_model1)
    assert emb2.shape == (B, N2, d_model2)
    assert satt1.shape == (B, h_num, N1, N2)
    assert satt2.shape == (B, h_num, N2, N1)

    refs = path_attention_ref(x1, x2, a1, a2, a1_, a2_, v_mask, q_mask, params,
                              h_num=h_num)
    for name, got, want in zip(("emb1", "emb2", "satt1", "satt2"), outs, refs):
        err = float(jnp.max(jnp.abs(got - want)))
        scale = float(jnp.max(jnp.abs(want)))
        assert err <= 2e-2 * max(1.0, scale), (
            f"{name}: max abs err {err} (ref scale {scale})")

    print("KERNEL_OK")
</pallas_src>

<mosaic_0001>
module attributes {stable_mosaic.version = 11 : i64} {
  func.func @path_attention_kernel(%arg0: i32, %arg1: memref<1x16x32xf32, #tpu.memory_space<vmem>>, %arg2: memref<1x24x64xf32, #tpu.memory_space<vmem>>, %arg3: memref<1x8x24x16xf32, #tpu.memory_space<vmem>>, %arg4: memref<1x8x16x24xf32, #tpu.memory_space<vmem>>, %arg5: memref<1x8x24x16xf32, #tpu.memory_space<vmem>>, %arg6: memref<1x8x16x24xf32, #tpu.memory_space<vmem>>, %arg7: memref<1x1x1x24xf32, #tpu.memory_space<vmem>>, %arg8: memref<1x1x16x1xf32, #tpu.memory_space<vmem>>, %arg9: memref<32x64xf32, #tpu.memory_space<vmem>>, %arg10: memref<1x64xf32, #tpu.memory_space<vmem>>, %arg11: memref<8x1x1xf32, #tpu.memory_space<vmem>>, %arg12: memref<8x1x1xf32, #tpu.memory_space<vmem>>, %arg13: memref<64x32xf32, #tpu.memory_space<vmem>>, %arg14: memref<1x32xf32, #tpu.memory_space<vmem>>, %arg15: memref<1x16x32xf32, #tpu.memory_space<vmem>>, %arg16: memref<1x24x64xf32, #tpu.memory_space<vmem>>, %arg17: memref<1x8x16x24xf32, #tpu.memory_space<vmem>>, %arg18: memref<1x8x24x16xf32, #tpu.memory_space<vmem>>) attributes {dimension_semantics = [#tpu.dimension_semantics<parallel>], iteration_bounds = array<i64: 2>, scalar_prefetch = 0 : i64, scratch_operands = 0 : i64, tpu.core_type = #tpu.core_type<tc>, window_params = [{transform_indices = @transform_0, window_bounds = array<i64: 1, 16, 32>}, {transform_indices = @transform_1, window_bounds = array<i64: 1, 24, 64>}, {transform_indices = @transform_2, window_bounds = array<i64: 1, 8, 24, 16>}, {transform_indices = @transform_3, window_bounds = array<i64: 1, 8, 16, 24>}, {transform_indices = @transform_4, window_bounds = array<i64: 1, 8, 24, 16>}, {transform_indices = @transform_5, window_bounds = array<i64: 1, 8, 16, 24>}, {transform_indices = @transform_6, window_bounds = array<i64: 1, 1, 1, 24>}, {transform_indices = @transform_7, window_bounds = array<i64: 1, 1, 16, 1>}, {pipeline_mode = #tpu.pipeline_mode<synchronous>, transform_indices = @transform_8, window_bounds = array<i64: 32, 64>}, {pipeline_mode = #tpu.pipeline_mode<synchronous>, transform_indices = @transform_9, window_bounds = array<i64: 1, 64>}, {pipeline_mode = #tpu.pipeline_mode<synchronous>, transform_indices = @transform_10, window_bounds = array<i64: 8, 1, 1>}, {pipeline_mode = #tpu.pipeline_mode<synchronous>, transform_indices = @transform_11, window_bounds = array<i64: 8, 1, 1>}, {pipeline_mode = #tpu.pipeline_mode<synchronous>, transform_indices = @transform_12, window_bounds = array<i64: 64, 32>}, {pipeline_mode = #tpu.pipeline_mode<synchronous>, transform_indices = @transform_13, window_bounds = array<i64: 1, 32>}, {transform_indices = @transform_14, window_bounds = array<i64: 1, 16, 32>}, {transform_indices = @transform_15, window_bounds = array<i64: 1, 24, 64>}, {transform_indices = @transform_16, window_bounds = array<i64: 1, 8, 16, 24>}, {transform_indices = @transform_17, window_bounds = array<i64: 1, 8, 24, 16>}]} {
    %c0 = arith.constant 0 : index
    %c0_0 = arith.constant 0 : index
    %c0_1 = arith.constant 0 : index
    %0 = vector.load %arg1[%c0, %c0_0, %c0_1] : memref<1x16x32xf32, #tpu.memory_space<vmem>>, vector<1x16x32xf32>
    %1 = vector.shape_cast %0 : vector<1x16x32xf32> to vector<16x32xf32>
    %c0_2 = arith.constant 0 : index
    %c0_3 = arith.constant 0 : index
    %c0_4 = arith.constant 0 : index
    %2 = vector.load %arg2[%c0_2, %c0_3, %c0_4] : memref<1x24x64xf32, #tpu.memory_space<vmem>>, vector<1x24x64xf32>
    %3 = vector.shape_cast %2 : vector<1x24x64xf32> to vector<24x64xf32>
    %c0_5 = arith.constant 0 : index
    %c0_6 = arith.constant 0 : index
    %c0_7 = arith.constant 0 : index
    %c0_8 = arith.constant 0 : index
    %4 = vector.load %arg3[%c0_5, %c0_6, %c0_7, %c0_8] : memref<1x8x24x16xf32, #tpu.memory_space<vmem>>, vector<1x8x24x16xf32>
    %5 = vector.shape_cast %4 : vector<1x8x24x16xf32> to vector<8x24x16xf32>
    %c0_9 = arith.constant 0 : index
    %c0_10 = arith.constant 0 : index
    %c0_11 = arith.constant 0 : index
    %c0_12 = arith.constant 0 : index
    %6 = vector.load %arg4[%c0_9, %c0_10, %c0_11, %c0_12] : memref<1x8x16x24xf32, #tpu.memory_space<vmem>>, vector<1x8x16x24xf32>
    %7 = vector.shape_cast %6 : vector<1x8x16x24xf32> to vector<8x16x24xf32>
    %c0_13 = arith.constant 0 : index
    %c0_14 = arith.constant 0 : index
    %c0_15 = arith.constant 0 : index
    %c0_16 = arith.constant 0 : index
    %8 = vector.load %arg5[%c0_13, %c0_14, %c0_15, %c0_16] : memref<1x8x24x16xf32, #tpu.memory_space<vmem>>, vector<1x8x24x16xf32>
    %9 = vector.shape_cast %8 : vector<1x8x24x16xf32> to vector<8x24x16xf32>
    %c0_17 = arith.constant 0 : index
    %c0_18 = arith.constant 0 : index
    %c0_19 = arith.constant 0 : index
    %c0_20 = arith.constant 0 : index
    %10 = vector.load %arg6[%c0_17, %c0_18, %c0_19, %c0_20] : memref<1x8x16x24xf32, #tpu.memory_space<vmem>>, vector<1x8x16x24xf32>
    %11 = vector.shape_cast %10 : vector<1x8x16x24xf32> to vector<8x16x24xf32>
    %c0_21 = arith.constant 0 : index
    %c0_22 = arith.constant 0 : index
    %c0_23 = arith.constant 0 : index
    %c0_24 = arith.constant 0 : index
    %12 = vector.load %arg7[%c0_21, %c0_22, %c0_23, %c0_24] : memref<1x1x1x24xf32, #tpu.memory_space<vmem>>, vector<1x1x1x24xf32>
    %13 = vector.shape_cast %12 : vector<1x1x1x24xf32> to vector<1x1x24xf32>
    %c0_25 = arith.constant 0 : index
    %c0_26 = arith.constant 0 : index
    %c0_27 = arith.constant 0 : index
    %c0_28 = arith.constant 0 : index
    %14 = vector.load %arg8[%c0_25, %c0_26, %c0_27, %c0_28] : memref<1x1x16x1xf32, #tpu.memory_space<vmem>>, vector<1x1x16x1xf32>
    %15 = vector.shape_cast %14 : vector<1x1x16x1xf32> to vector<1x16x1xf32>
    %c0_29 = arith.constant 0 : index
    %c0_30 = arith.constant 0 : index
    %16 = vector.load %arg9[%c0_29, %c0_30] : memref<32x64xf32, #tpu.memory_space<vmem>>, vector<32x64xf32>
    %cst = arith.constant dense<0.000000e+00> : vector<16x64xf32>
    %17 = tpu.matmul %1, %16, %cst {dimension_numbers = #tpu.dot_dimension_numbers<[1], [0], [0], [1], [0, 0, 1, 1], [], []>} : vector<16x32xf32>, vector<32x64xf32>, vector<16x64xf32> -> vector<16x64xf32>
    %c0_31 = arith.constant 0 : index
    %c0_32 = arith.constant 0 : index
    %18 = vector.load %arg10[%c0_31, %c0_32] : memref<1x64xf32, #tpu.memory_space<vmem>>, vector<1x64xf32>
    %19 = vector.broadcast %18 : vector<1x64xf32> to vector<16x64xf32>
    %20 = arith.addf %17, %19 : vector<16x64xf32>
    %cst_33 = arith.constant dense<0.000000e+00> : vector<64xf32>
    %21 = vector.multi_reduction <add>, %20, %cst_33 [0] : vector<16x64xf32> to vector<64xf32>
    %22 = vector.shape_cast %21 : vector<64xf32> to vector<1x64xf32>
    %cst_34 = arith.constant 1.600000e+01 : f32
    %23 = vector.broadcast %cst_34 : f32 to vector<1x64xf32>
    %24 = arith.divf %22, %23 : vector<1x64xf32>
    %cst_35 = arith.constant dense<0.000000e+00> : vector<64xf32>
    %25 = vector.multi_reduction <add>, %3, %cst_35 [0] : vector<24x64xf32> to vector<64xf32>
    %26 = vector.shape_cast %25 : vector<64xf32> to vector<1x64xf32>
    %cst_36 = arith.constant 2.400000e+01 : f32
    %27 = vector.broadcast %cst_36 : f32 to vector<1x64xf32>
    %28 = arith.divf %26, %27 : vector<1x64xf32>
    %29 = vector.broadcast %24 : vector<1x64xf32> to vector<24x64xf32>
    %30 = arith.mulf %3, %29 : vector<24x64xf32>
    %31 = vector.broadcast %28 : vector<1x64xf32> to vector<16x64xf32>
    %32 = arith.mulf %20, %31 : vector<16x64xf32>
    %cst_37 = arith.constant dense<0.000000e+00> : vector<8x16xf32>
    %33 = vector.multi_reduction <add>, %5, %cst_37 [1] : vector<8x24x16xf32> to vector<8x16xf32>
    %34 = vector.shape_cast %33 : vector<8x16xf32> to vector<8x1x16xf32>
    %cst_38 = arith.constant dense<0.000000e+00> : vector<8x24xf32>
    %35 = vector.multi_reduction <add>, %7, %cst_38 [1] : vector<8x16x24xf32> to vector<8x24xf32>
    %36 = vector.shape_cast %35 : vector<8x24xf32> to vector<8x1x24xf32>
    %cst_39 = arith.constant dense<0.000000e+00> : vector<8x24xf32>
    %37 = vector.multi_reduction <add>, %9, %cst_39 [2] : vector<8x24x16xf32> to vector<8x24xf32>
    %38 = vector.shape_cast %37 : vector<8x24xf32> to vector<8x24x1xf32>
    %cst_40 = arith.constant dense<0.000000e+00> : vector<8x16xf32>
    %39 = vector.multi_reduction <add>, %11, %cst_40 [2] : vector<8x16x24xf32> to vector<8x16xf32>
    %40 = vector.shape_cast %39 : vector<8x16xf32> to vector<8x16x1xf32>
    %41 = vector.broadcast %40 : vector<8x16x1xf32> to vector<8x16x16xf32>
    %42 = vector.broadcast %34 : vector<8x1x16xf32> to vector<8x16x16xf32>
    %43 = arith.mulf %41, %42 : vector<8x16x16xf32>
    %44 = math.tanh %43 : vector<8x16x16xf32>
    %45 = vector.broadcast %38 : vector<8x24x1xf32> to vector<8x24x24xf32>
    %46 = vector.broadcast %36 : vector<8x1x24xf32> to vector<8x24x24xf32>
    %47 = arith.mulf %45, %46 : vector<8x24x24xf32>
    %48 = math.tanh %47 : vector<8x24x24xf32>
    "tpu.trace_start"() <{level = 10 : i32, message = "hij,hjk->hik"}> : () -> ()
    %cst_41 = arith.constant dense<0.000000e+00> : vector<8x24x16xf32>
    %49 = tpu.matmul %9, %44, %cst_41 {dimension_numbers = #tpu.dot_dimension_numbers<[2], [1], [1], [2], [0, 0, 0, 1, 1, 2], [0], [0]>} : vector<8x24x16xf32>, vector<8x16x16xf32>, vector<8x24x16xf32> -> vector<8x24x16xf32>
    %cst_42 = arith.constant dense<0.000000e+00> : vector<8x16x24xf32>
    %50 = tpu.matmul %11, %48, %cst_42 {dimension_numbers = #tpu.dot_dimension_numbers<[2], [1], [1], [2], [0, 0, 0, 1, 1, 2], [0], [0]>} : vector<8x16x24xf32>, vector<8x24x24xf32>, vector<8x16x24xf32> -> vector<8x16x24xf32>
    "tpu.trace_stop"() : () -> ()
    %51 = tpu.transpose %49, [0, 2, 1] : vector<8x24x16xf32> -> vector<8x16x24xf32>
    %52 = arith.mulf %51, %50 : vector<8x16x24xf32>
    %c0_43 = arith.constant 0 : index
    %c0_44 = arith.constant 0 : index
    %c0_45 = arith.constant 0 : index
    %53 = vector.load %arg11[%c0_43, %c0_44, %c0_45] : memref<8x1x1xf32, #tpu.memory_space<vmem>>, vector<8x1x1xf32>
    %54 = vector.broadcast %53 : vector<8x1x1xf32> to vector<8x16x24xf32>
    %55 = arith.mulf %54, %52 : vector<8x16x24xf32>
    %c0_46 = arith.constant 0 : index
    %c0_47 = arith.constant 0 : index
    %c0_48 = arith.constant 0 : index
    %56 = vector.load %arg12[%c0_46, %c0_47, %c0_48] : memref<8x1x1xf32, #tpu.memory_space<vmem>>, vector<8x1x1xf32>
    %57 = vector.broadcast %56 : vector<8x1x1xf32> to vector<8x16x24xf32>
    %58 = arith.addf %55, %57 : vector<8x16x24xf32>
    %cst_49 = arith.constant 0.353553385 : f32
    %59 = vector.broadcast %cst_49 : f32 to vector<8x16x24xf32>
    %60 = arith.mulf %58, %59 : vector<8x16x24xf32>
    %cst_50 = arith.constant 5.000000e-01 : f32
    %61 = vector.broadcast %cst_50 : f32 to vector<1x1x24xf32>
    %62 = arith.cmpf ogt, %13, %61 : vector<1x1x24xf32>
    %cst_51 = arith.constant -1.000000e+09 : f32
    %63 = vector.shape_cast %62 : vector<1x1x24xi1> to vector<1x1x24xi1>
    %64 = vector.broadcast %63 : vector<1x1x24xi1> to vector<8x16x24xi1>
    %65 = vector.broadcast %cst_51 : f32 to vector<8x16x24xf32>
    %66 = arith.select %64, %65, %60 : vector<8x16x24xi1>, vector<8x16x24xf32>
    %cst_52 = arith.constant dense<0xFF800000> : vector<8x24xf32>
    %67 = vector.multi_reduction <maximumf>, %66, %cst_52 [1] : vector<8x16x24xf32> to vector<8x24xf32>
    %68 = vector.shape_cast %67 : vector<8x24xf32> to vector<8x1x24xf32>
    %69 = vector.broadcast %68 : vector<8x1x24xf32> to vector<8x16x24xf32>
    %70 = arith.subf %66, %69 : vector<8x16x24xf32>
    %71 = math.exp %70 : vector<8x16x24xf32>
    %cst_53 = arith.constant dense<0.000000e+00> : vector<8x24xf32>
    %72 = vector.multi_reduction <add>, %71, %cst_53 [1] : vector<8x16x24xf32> to vector<8x24xf32>
    %73 = vector.shape_cast %72 : vector<8x24xf32> to vector<8x1x24xf32>
    %74 = vector.broadcast %73 : vector<8x1x24xf32> to vector<8x16x24xf32>
    %75 = arith.divf %71, %74 : vector<8x16x24xf32>
    %cst_54 = arith.constant 5.000000e-01 : f32
    %76 = vector.broadcast %cst_54 : f32 to vector<1x16x1xf32>
    %77 = arith.cmpf ogt, %15, %76 : vector<1x16x1xf32>
    %cst_55 = arith.constant -1.000000e+09 : f32
    %78 = vector.shape_cast %77 : vector<1x16x1xi1> to vector<1x16x1xi1>
    %79 = vector.broadcast %78 : vector<1x16x1xi1> to vector<8x16x24xi1>
    %80 = vector.broadcast %cst_55 : f32 to vector<8x16x24xf32>
    %81 = arith.select %79, %80, %60 : vector<8x16x24xi1>, vector<8x16x24xf32>
    %cst_56 = arith.constant dense<0xFF800000> : vector<8x16xf32>
    %82 = vector.multi_reduction <maximumf>, %81, %cst_56 [2] : vector<8x16x24xf32> to vector<8x16xf32>
    %83 = vector.shape_cast %82 : vector<8x16xf32> to vector<8x16x1xf32>
    %84 = vector.broadcast %83 : vector<8x16x1xf32> to vector<8x16x24xf32>
    %85 = arith.subf %81, %84 : vector<8x16x24xf32>
    %86 = math.exp %85 : vector<8x16x24xf32>
    %cst_57 = arith.constant dense<0.000000e+00> : vector<8x16xf32>
    %87 = vector.multi_reduction <add>, %86, %cst_57 [2] : vector<8x16x24xf32> to vector<8x16xf32>
    %88 = vector.shape_cast %87 : vector<8x16xf32> to vector<8x16x1xf32>
    %89 = vector.broadcast %88 : vector<8x16x1xf32> to vector<8x16x24xf32>
    %90 = arith.divf %86, %89 : vector<8x16x24xf32>
    %91 = tpu.transpose %90, [0, 2, 1] : vector<8x16x24xf32> -> vector<8x24x16xf32>
    %c0_58 = arith.constant 0 : index
    %c0_59 = arith.constant 0 : index
    %c0_60 = arith.constant 0 : index
    %c0_61 = arith.constant 0 : index
    %92 = vector.load %arg17[%c0_58, %c0_59, %c0_60, %c0_61] : memref<1x8x16x24xf32, #tpu.memory_space<vmem>>, vector<1x8x16x24xf32>
    %93 = vector.shape_cast %92 : vector<1x8x16x24xf32> to vector<8x16x24xf32>
    %94 = vector.shape_cast %75 : vector<8x16x24xf32> to vector<1x8x16x24xf32>
    tpu.vector_store %arg17[%c0_58, %c0_59, %c0_60, %c0_61], %94 {strides = array<i32>} : memref<1x8x16x24xf32, #tpu.memory_space<vmem>>, vector<1x8x16x24xf32>,
    %c0_62 = arith.constant 0 : index
    %c0_63 = arith.constant 0 : index
    %c0_64 = arith.constant 0 : index
    %c0_65 = arith.constant 0 : index
    %95 = vector.load %arg18[%c0_62, %c0_63, %c0_64, %c0_65] : memref<1x8x24x16xf32, #tpu.memory_space<vmem>>, vector<1x8x24x16xf32>
    %96 = vector.shape_cast %95 : vector<1x8x24x16xf32> to vector<8x24x16xf32>
    %97 = vector.shape_cast %91 : vector<8x24x16xf32> to vector<1x8x24x16xf32>
    tpu.vector_store %arg18[%c0_62, %c0_63, %c0_64, %c0_65], %97 {strides = array<i32>} : memref<1x8x24x16xf32, #tpu.memory_space<vmem>>, vector<1x8x24x16xf32>,
    %98 = vector.extract_strided_slice %75 {offsets = [0, 0, 0], sizes = [1, 16, 24], strides = [1, 1, 1]} : vector<8x16x24xf32> to vector<1x16x24xf32>
    %99 = vector.shape_cast %98 : vector<1x16x24xf32> to vector<16x24xf32>
    %100 = vector.extract_strided_slice %30 {offsets = [0, 0], sizes = [24, 8], strides = [1, 1]} : vector<24x64xf32> to vector<24x8xf32>
    %cst_66 = arith.constant dense<0.000000e+00> : vector<16x8xf32>
    %101 = tpu.matmul %99, %100, %cst_66 {dimension_numbers = #tpu.dot_dimension_numbers<[1], [0], [0], [1], [0, 0, 1, 1], [], []>} : vector<16x24xf32>, vector<24x8xf32>, vector<16x8xf32> -> vector<16x8xf32>
    %102 = vector.extract_strided_slice %91 {offsets = [0, 0, 0], sizes = [1, 24, 16], strides = [1, 1, 1]} : vector<8x24x16xf32> to vector<1x24x16xf32>
    %103 = vector.shape_cast %102 : vector<1x24x16xf32> to vector<24x16xf32>
    %104 = vector.extract_strided_slice %32 {offsets = [0, 0], sizes = [16, 8], strides = [1, 1]} : vector<16x64xf32> to vector<16x8xf32>
    %cst_67 = arith.constant dense<0.000000e+00> : vector<24x8xf32>
    %105 = tpu.matmul %103, %104, %cst_67 {dimension_numbers = #tpu.dot_dimension_numbers<[1], [0], [0], [1], [0, 0, 1, 1], [], []>} : vector<24x16xf32>, vector<16x8xf32>, vector<24x8xf32> -> vector<24x8xf32>
    %106 = vector.extract_strided_slice %75 {offsets = [1, 0, 0], sizes = [1, 16, 24], strides = [1, 1, 1]} : vector<8x16x24xf32> to vector<1x16x24xf32>
    %107 = vector.shape_cast %106 : vector<1x16x24xf32> to vector<16x24xf32>
    %108 = vector.extract_strided_slice %30 {offsets = [0, 8], sizes = [24, 8], strides = [1, 1]} : vector<24x64xf32> to vector<24x8xf32>
    %cst_68 = arith.constant dense<0.000000e+00> : vector<16x8xf32>
    %109 = tpu.matmul %107, %108, %cst_68 {dimension_numbers = #tpu.dot_dimension_numbers<[1], [0], [0], [1], [0, 0, 1, 1], [], []>} : vector<16x24xf32>, vector<24x8xf32>, vector<16x8xf32> -> vector<16x8xf32>
    %110 = vector.extract_strided_slice %91 {offsets = [1, 0, 0], sizes = [1, 24, 16], strides = [1, 1, 1]} : vector<8x24x16xf32> to vector<1x24x16xf32>
    %111 = vector.shape_cast %110 : vector<1x24x16xf32> to vector<24x16xf32>
    %112 = vector.extract_strided_slice %32 {offsets = [0, 8], sizes = [16, 8], strides = [1, 1]} : vector<16x64xf32> to vector<16x8xf32>
    %cst_69 = arith.constant dense<0.000000e+00> : vector<24x8xf32>
    %113 = tpu.matmul %111, %112, %cst_69 {dimension_numbers = #tpu.dot_dimension_numbers<[1], [0], [0], [1], [0, 0, 1, 1], [], []>} : vector<24x16xf32>, vector<16x8xf32>, vector<24x8xf32> -> vector<24x8xf32>
    %114 = vector.extract_strided_slice %75 {offsets = [2, 0, 0], sizes = [1, 16, 24], strides = [1, 1, 1]} : vector<8x16x24xf32> to vector<1x16x24xf32>
    %115 = vector.shape_cast %114 : vector<1x16x24xf32> to vector<16x24xf32>
    %116 = vector.extract_strided_slice %30 {offsets = [0, 16], sizes = [24, 8], strides = [1, 1]} : vector<24x64xf32> to vector<24x8xf32>
    %cst_70 = arith.constant dense<0.000000e+00> : vector<16x8xf32>
    %117 = tpu.matmul %115, %116, %cst_70 {dimension_numbers = #tpu.dot_dimension_numbers<[1], [0], [0], [1], [0, 0, 1, 1], [], []>} : vector<16x24xf32>, vector<24x8xf32>, vector<16x8xf32> -> vector<16x8xf32>
    %118 = vector.extract_strided_slice %91 {offsets = [2, 0, 0], sizes = [1, 24, 16], strides = [1, 1, 1]} : vector<8x24x16xf32> to vector<1x24x16xf32>
    %119 = vector.shape_cast %118 : vector<1x24x16xf32> to vector<24x16xf32>
    %120 = vector.extract_strided_slice %32 {offsets = [0, 16], sizes = [16, 8], strides = [1, 1]} : vector<16x64xf32> to vector<16x8xf32>
    %cst_71 = arith.constant dense<0.000000e+00> : vector<24x8xf32>
    %121 = tpu.matmul %119, %120, %cst_71 {dimension_numbers = #tpu.dot_dimension_numbers<[1], [0], [0], [1], [0, 0, 1, 1], [], []>} : vector<24x16xf32>, vector<16x8xf32>, vector<24x8xf32> -> vector<24x8xf32>
    %122 = vector.extract_strided_slice %75 {offsets = [3, 0, 0], sizes = [1, 16, 24], strides = [1, 1, 1]} : vector<8x16x24xf32> to vector<1x16x24xf32>
    %123 = vector.shape_cast %122 : vector<1x16x24xf32> to vector<16x24xf32>
    %124 = vector.extract_strided_slice %30 {offsets = [0, 24], sizes = [24, 8], strides = [1, 1]} : vector<24x64xf32> to vector<24x8xf32>
    %cst_72 = arith.constant dense<0.000000e+00> : vector<16x8xf32>
    %125 = tpu.matmul %123, %124, %cst_72 {dimension_numbers = #tpu.dot_dimension_numbers<[1], [0], [0], [1], [0, 0, 1, 1], [], []>} : vector<16x24xf32>, vector<24x8xf32>, vector<16x8xf32> -> vector<16x8xf32>
    %126 = vector.extract_strided_slice %91 {offsets = [3, 0, 0], sizes = [1, 24, 16], strides = [1, 1, 1]} : vector<8x24x16xf32> to vector<1x24x16xf32>
    %127 = vector.shape_cast %126 : vector<1x24x16xf32> to vector<24x16xf32>
    %128 = vector.extract_strided_slice %32 {offsets = [0, 24], sizes = [16, 8], strides = [1, 1]} : vector<16x64xf32> to vector<16x8xf32>
    %cst_73 = arith.constant dense<0.000000e+00> : vector<24x8xf32>
    %129 = tpu.matmul %127, %128, %cst_73 {dimension_numbers = #tpu.dot_dimension_numbers<[1], [0], [0], [1], [0, 0, 1, 1], [], []>} : vector<24x16xf32>, vector<16x8xf32>, vector<24x8xf32> -> vector<24x8xf32>
    %130 = vector.extract_strided_slice %75 {offsets = [4, 0, 0], sizes = [1, 16, 24], strides = [1, 1, 1]} : vector<8x16x24xf32> to vector<1x16x24xf32>
    %131 = vector.shape_cast %130 : vector<1x16x24xf32> to vector<16x24xf32>
    %132 = vector.extract_strided_slice %30 {offsets = [0, 32], sizes = [24, 8], strides = [1, 1]} : vector<24x64xf32> to vector<24x8xf32>
    %cst_74 = arith.constant dense<0.000000e+00> : vector<16x8xf32>
    %133 = tpu.matmul %131, %132, %cst_74 {dimension_numbers = #tpu.dot_dimension_numbers<[1], [0], [0], [1], [0, 0, 1, 1], [], []>} : vector<16x24xf32>, vector<24x8xf32>, vector<16x8xf32> -> vector<16x8xf32>
    %134 = vector.extract_strided_slice %91 {offsets = [4, 0, 0], sizes = [1, 24, 16], strides = [1, 1, 1]} : vector<8x24x16xf32> to vector<1x24x16xf32>
    %135 = vector.shape_cast %134 : vector<1x24x16xf32> to vector<24x16xf32>
    %136 = vector.extract_strided_slice %32 {offsets = [0, 32], sizes = [16, 8], strides = [1, 1]} : vector<16x64xf32> to vector<16x8xf32>
    %cst_75 = arith.constant dense<0.000000e+00> : vector<24x8xf32>
    %137 = tpu.matmul %135, %136, %cst_75 {dimension_numbers = #tpu.dot_dimension_numbers<[1], [0], [0], [1], [0, 0, 1, 1], [], []>} : vector<24x16xf32>, vector<16x8xf32>, vector<24x8xf32> -> vector<24x8xf32>
    %138 = vector.extract_strided_slice %75 {offsets = [5, 0, 0], sizes = [1, 16, 24], strides = [1, 1, 1]} : vector<8x16x24xf32> to vector<1x16x24xf32>
    %139 = vector.shape_cast %138 : vector<1x16x24xf32> to vector<16x24xf32>
    %140 = vector.extract_strided_slice %30 {offsets = [0, 40], sizes = [24, 8], strides = [1, 1]} : vector<24x64xf32> to vector<24x8xf32>
    %cst_76 = arith.constant dense<0.000000e+00> : vector<16x8xf32>
    %141 = tpu.matmul %139, %140, %cst_76 {dimension_numbers = #tpu.dot_dimension_numbers<[1], [0], [0], [1], [0, 0, 1, 1], [], []>} : vector<16x24xf32>, vector<24x8xf32>, vector<16x8xf32> -> vector<16x8xf32>
    %142 = vector.extract_strided_slice %91 {offsets = [5, 0, 0], sizes = [1, 24, 16], strides = [1, 1, 1]} : vector<8x24x16xf32> to vector<1x24x16xf32>
    %143 = vector.shape_cast %142 : vector<1x24x16xf32> to vector<24x16xf32>
    %144 = vector.extract_strided_slice %32 {offsets = [0, 40], sizes = [16, 8], strides = [1, 1]} : vector<16x64xf32> to vector<16x8xf32>
    %cst_77 = arith.constant dense<0.000000e+00> : vector<24x8xf32>
    %145 = tpu.matmul %143, %144, %cst_77 {dimension_numbers = #tpu.dot_dimension_numbers<[1], [0], [0], [1], [0, 0, 1, 1], [], []>} : vector<24x16xf32>, vector<16x8xf32>, vector<24x8xf32> -> vector<24x8xf32>
    %146 = vector.extract_strided_slice %75 {offsets = [6, 0, 0], sizes = [1, 16, 24], strides = [1, 1, 1]} : vector<8x16x24xf32> to vector<1x16x24xf32>
    %147 = vector.shape_cast %146 : vector<1x16x24xf32> to vector<16x24xf32>
    %148 = vector.extract_strided_slice %30 {offsets = [0, 48], sizes = [24, 8], strides = [1, 1]} : vector<24x64xf32> to vector<24x8xf32>
    %cst_78 = arith.constant dense<0.000000e+00> : vector<16x8xf32>
    %149 = tpu.matmul %147, %148, %cst_78 {dimension_numbers = #tpu.dot_dimension_numbers<[1], [0], [0], [1], [0, 0, 1, 1], [], []>} : vector<16x24xf32>, vector<24x8xf32>, vector<16x8xf32> -> vector<16x8xf32>
    %150 = vector.extract_strided_slice %91 {offsets = [6, 0, 0], sizes = [1, 24, 16], strides = [1, 1, 1]} : vector<8x24x16xf32> to vector<1x24x16xf32>
    %151 = vector.shape_cast %150 : vector<1x24x16xf32> to vector<24x16xf32>
    %152 = vector.extract_strided_slice %32 {offsets = [0, 48], sizes = [16, 8], strides = [1, 1]} : vector<16x64xf32> to vector<16x8xf32>
    %cst_79 = arith.constant dense<0.000000e+00> : vector<24x8xf32>
    %153 = tpu.matmul %151, %152, %cst_79 {dimension_numbers = #tpu.dot_dimension_numbers<[1], [0], [0], [1], [0, 0, 1, 1], [], []>} : vector<24x16xf32>, vector<16x8xf32>, vector<24x8xf32> -> vector<24x8xf32>
    %154 = vector.extract_strided_slice %75 {offsets = [7, 0, 0], sizes = [1, 16, 24], strides = [1, 1, 1]} : vector<8x16x24xf32> to vector<1x16x24xf32>
    %155 = vector.shape_cast %154 : vector<1x16x24xf32> to vector<16x24xf32>
    %156 = vector.extract_strided_slice %30 {offsets = [0, 56], sizes = [24, 8], strides = [1, 1]} : vector<24x64xf32> to vector<24x8xf32>
    %cst_80 = arith.constant dense<0.000000e+00> : vector<16x8xf32>
    %157 = tpu.matmul %155, %156, %cst_80 {dimension_numbers = #tpu.dot_dimension_numbers<[1], [0], [0], [1], [0, 0, 1, 1], [], []>} : vector<16x24xf32>, vector<24x8xf32>, vector<16x8xf32> -> vector<16x8xf32>
    %158 = vector.extract_strided_slice %91 {offsets = [7, 0, 0], sizes = [1, 24, 16], strides = [1, 1, 1]} : vector<8x24x16xf32> to vector<1x24x16xf32>
    %159 = vector.shape_cast %158 : vector<1x24x16xf32> to vector<24x16xf32>
    %160 = vector.extract_strided_slice %32 {offsets = [0, 56], sizes = [16, 8], strides = [1, 1]} : vector<16x64xf32> to vector<16x8xf32>
    %cst_81 = arith.constant dense<0.000000e+00> : vector<24x8xf32>
    %161 = tpu.matmul %159, %160, %cst_81 {dimension_numbers = #tpu.dot_dimension_numbers<[1], [0], [0], [1], [0, 0, 1, 1], [], []>} : vector<24x16xf32>, vector<16x8xf32>, vector<24x8xf32> -> vector<24x8xf32>
    %162 = tpu.concatenate %101, %109, %117, %125, %133, %141, %149, %157 in 1 : vector<16x8xf32>, vector<16x8xf32>, vector<16x8xf32>, vector<16x8xf32>, vector<16x8xf32>, vector<16x8xf32>, vector<16x8xf32>, vector<16x8xf32> -> vector<16x64xf32>
    %163 = tpu.concatenate %105, %113, %121, %129, %137, %145, %153, %161 in 1 : vector<24x8xf32>, vector<24x8xf32>, vector<24x8xf32>, vector<24x8xf32>, vector<24x8xf32>, vector<24x8xf32>, vector<24x8xf32>, vector<24x8xf32> -> vector<24x64xf32>
    %c0_82 = arith.constant 0 : index
    %c0_83 = arith.constant 0 : index
    %164 = vector.load %arg13[%c0_82, %c0_83] : memref<64x32xf32, #tpu.memory_space<vmem>>, vector<64x32xf32>
    %cst_84 = arith.constant dense<0.000000e+00> : vector<16x32xf32>
    %165 = tpu.matmul %162, %164, %cst_84 {dimension_numbers = #tpu.dot_dimension_numbers<[1], [0], [0], [1], [0, 0, 1, 1], [], []>} : vector<16x64xf32>, vector<64x32xf32>, vector<16x32xf32> -> vector<16x32xf32>
    %c0_85 = arith.constant 0 : index
    %c0_86 = arith.constant 0 : index
    %166 = vector.load %arg14[%c0_85, %c0_86] : memref<1x32xf32, #tpu.memory_space<vmem>>, vector<1x32xf32>
    %167 = vector.broadcast %166 : vector<1x32xf32> to vector<16x32xf32>
    %168 = arith.addf %165, %167 : vector<16x32xf32>
    %169 = arith.mulf %1, %168 : vector<16x32xf32>
    %c0_87 = arith.constant 0 : index
    %c0_88 = arith.constant 0 : index
    %c0_89 = arith.constant 0 : index
    %170 = vector.load %arg15[%c0_87, %c0_88, %c0_89] : memref<1x16x32xf32, #tpu.memory_space<vmem>>, vector<1x16x32xf32>
    %171 = vector.shape_cast %170 : vector<1x16x32xf32> to vector<16x32xf32>
    %172 = vector.shape_cast %169 : vector<16x32xf32> to vector<1x16x32xf32>
    tpu.vector_store %arg15[%c0_87, %c0_88, %c0_89], %172 {strides = array<i32>} : memref<1x16x32xf32, #tpu.memory_space<vmem>>, vector<1x16x32xf32>,
    %173 = arith.mulf %3, %163 : vector<24x64xf32>
    %c0_90 = arith.constant 0 : index
    %c0_91 = arith.constant 0 : index
    %c0_92 = arith.constant 0 : index
    %174 = vector.load %arg16[%c0_90, %c0_91, %c0_92] : memref<1x24x64xf32, #tpu.memory_space<vmem>>, vector<1x24x64xf32>
    %175 = vector.shape_cast %174 : vector<1x24x64xf32> to vector<24x64xf32>
    %176 = vector.shape_cast %173 : vector<24x64xf32> to vector<1x24x64xf32>
    tpu.vector_store %arg16[%c0_90, %c0_91, %c0_92], %176 {strides = array<i32>} : memref<1x24x64xf32, #tpu.memory_space<vmem>>, vector<1x24x64xf32>,
    return
  }
  func.func @transform_0(%arg0: i32) -> (i32, i32, i32) {
    %c0_i32 = arith.constant 0 : i32
    %c0_i32_0 = arith.constant 0 : i32
    %c0_i32_1 = arith.constant 0 : i32
    return %arg0, %c0_i32, %c0_i32_0 : i32, i32, i32
  }
  func.func @transform_1(%arg0: i32) -> (i32, i32, i32) {
    %c0_i32 = arith.constant 0 : i32
    %c0_i32_0 = arith.constant 0 : i32
    %c0_i32_1 = arith.constant 0 : i32
    return %arg0, %c0_i32, %c0_i32_0 : i32, i32, i32
  }
  func.func @transform_2(%arg0: i32) -> (i32, i32, i32, i32) {
    %c0_i32 = arith.constant 0 : i32
    %c0_i32_0 = arith.constant 0 : i32
    %c0_i32_1 = arith.constant 0 : i32
    %c0_i32_2 = arith.constant 0 : i32
    return %arg0, %c0_i32, %c0_i32_0, %c0_i32_1 : i32, i32, i32, i32
  }
  func.func @transform_3(%arg0: i32) -> (i32, i32, i32, i32) {
    %c0_i32 = arith.constant 0 : i32
    %c0_i32_0 = arith.constant 0 : i32
    %c0_i32_1 = arith.constant 0 : i32
    %c0_i32_2 = arith.constant 0 : i32
    return %arg0, %c0_i32, %c0_i32_0, %c0_i32_1 : i32, i32, i32, i32
  }
  func.func @transform_4(%arg0: i32) -> (i32, i32, i32, i32) {
    %c0_i32 = arith.constant 0 : i32
    %c0_i32_0 = arith.constant 0 : i32
    %c0_i32_1 = arith.constant 0 : i32
    %c0_i32_2 = arith.constant 0 : i32
    return %arg0, %c0_i32, %c0_i32_0, %c0_i32_1 : i32, i32, i32, i32
  }
  func.func @transform_5(%arg0: i32) -> (i32, i32, i32, i32) {
    %c0_i32 = arith.constant 0 : i32
    %c0_i32_0 = arith.constant 0 : i32
    %c0_i32_1 = arith.constant 0 : i32
    %c0_i32_2 = arith.constant 0 : i32
    return %arg0, %c0_i32, %c0_i32_0, %c0_i32_1 : i32, i32, i32, i32
  }
  func.func @transform_6(%arg0: i32) -> (i32, i32, i32, i32) {
    %c0_i32 = arith.constant 0 : i32
    %c0_i32_0 = arith.constant 0 : i32
    %c0_i32_1 = arith.constant 0 : i32
    %c0_i32_2 = arith.constant 0 : i32
    return %arg0, %c0_i32, %c0_i32_0, %c0_i32_1 : i32, i32, i32, i32
  }
  func.func @transform_7(%arg0: i32) -> (i32, i32, i32, i32) {
    %c0_i32 = arith.constant 0 : i32
    %c0_i32_0 = arith.constant 0 : i32
    %c0_i32_1 = arith.constant 0 : i32
    %c0_i32_2 = arith.constant 0 : i32
    return %arg0, %c0_i32, %c0_i32_0, %c0_i32_1 : i32, i32, i32, i32
  }
  func.func @transform_8(%arg0: i32) -> (i32, i32) {
    %c0_i32 = arith.constant 0 : i32
    %c0_i32_0 = arith.constant 0 : i32
    %c0_i32_1 = arith.constant 0 : i32
    return %c0_i32, %c0_i32_0 : i32, i32
  }
  func.func @transform_9(%arg0: i32) -> (i32, i32) {
    %c0_i32 = arith.constant 0 : i32
    %c0_i32_0 = arith.constant 0 : i32
    %c0_i32_1 = arith.constant 0 : i32
    return %c0_i32, %c0_i32_0 : i32, i32
  }
  func.func @transform_10(%arg0: i32) -> (i32, i32, i32) {
    %c0_i32 = arith.constant 0 : i32
    %c0_i32_0 = arith.constant 0 : i32
    %c0_i32_1 = arith.constant 0 : i32
    %c0_i32_2 = arith.constant 0 : i32
    return %c0_i32, %c0_i32_0, %c0_i32_1 : i32, i32, i32
  }
  func.func @transform_11(%arg0: i32) -> (i32, i32, i32) {
    %c0_i32 = arith.constant 0 : i32
    %c0_i32_0 = arith.constant 0 : i32
    %c0_i32_1 = arith.constant 0 : i32
    %c0_i32_2 = arith.constant 0 : i32
    return %c0_i32, %c0_i32_0, %c0_i32_1 : i32, i32, i32
  }
  func.func @transform_12(%arg0: i32) -> (i32, i32) {
    %c0_i32 = arith.constant 0 : i32
    %c0_i32_0 = arith.constant 0 : i32
    %c0_i32_1 = arith.constant 0 : i32
    return %c0_i32, %c0_i32_0 : i32, i32
  }
  func.func @transform_13(%arg0: i32) -> (i32, i32) {
    %c0_i32 = arith.constant 0 : i32
    %c0_i32_0 = arith.constant 0 : i32
    %c0_i32_1 = arith.constant 0 : i32
    return %c0_i32, %c0_i32_0 : i32, i32
  }
  func.func @transform_14(%arg0: i32) -> (i32, i32, i32) {
    %c0_i32 = arith.constant 0 : i32
    %c0_i32_0 = arith.constant 0 : i32
    %c0_i32_1 = arith.constant 0 : i32
    return %arg0, %c0_i32, %c0_i32_0 : i32, i32, i32
  }
  func.func @transform_15(%arg0: i32) -> (i32, i32, i32) {
    %c0_i32 = arith.constant 0 : i32
    %c0_i32_0 = arith.constant 0 : i32
    %c0_i32_1 = arith.constant 0 : i32
    return %arg0, %c0_i32, %c0_i32_0 : i32, i32, i32
  }
  func.func @transform_16(%arg0: i32) -> (i32, i32, i32, i32) {
    %c0_i32 = arith.constant 0 : i32
    %c0_i32_0 = arith.constant 0 : i32
    %c0_i32_1 = arith.constant 0 : i32
    %c0_i32_2 = arith.constant 0 : i32
    return %arg0, %c0_i32, %c0_i32_0, %c0_i32_1 : i32, i32, i32, i32
  }
  func.func @transform_17(%arg0: i32) -> (i32, i32, i32, i32) {
    %c0_i32 = arith.constant 0 : i32
    %c0_i32_0 = arith.constant 0 : i32
    %c0_i32_1 = arith.constant 0 : i32
    %c0_i32_2 = arith.constant 0 : i32
    return %arg0, %c0_i32, %c0_i32_0, %c0_i32_1 : i32, i32, i32, i32
  }
}

</mosaic_0001>

<bundles_post_ra>
// kernel: tpu_custom_call.1
= control target key start
LH: loop header
LB: loop body
LE: loop exit
PB: predicated region body
PF: predicated region fallthrough
CT: control target
= control target key end

     0   :  { %s9096_s0 = inlined_call_operand.vmem [shape: f32[2,16,32], index: 0, kind: input, shape index: {}]   ;;  %s9097_s1 = inlined_call_operand.vmem [shape: f32[2,24,64], index: 1, kind: input, shape index: {}]   ;;  %s9098_s2 = inlined_call_operand.vmem [shape: f32[2,8,24,16], index: 2, kind: input, shape index: {}]   ;;  %s9099_s3 = inlined_call_operand.vmem [shape: f32[2,8,16,24], index: 3, kind: input, shape index: {}]   ;;  %s9100_s4 = inlined_call_operand.vmem [shape: f32[2,8,24,16], index: 4, kind: input, shape index: {}]   ;;  %s9101_s5 = inlined_call_operand.vmem [shape: f32[2,8,16,24], index: 5, kind: input, shape index: {}]   ;;  %s9102_s6 = inlined_call_operand.vmem [shape: f32[2,1,1,24], index: 6, kind: input, shape index: {}]   ;;  %s9103_s7 = inlined_call_operand.vmem [shape: f32[2,1,16,1], index: 7, kind: input, shape index: {}]   ;;  %s9104_s8 = inlined_call_operand.vmem [shape: f32[32,64], index: 8, kind: input, shape index: {}]   ;;  %s9105_s9 = inlined_call_operand.vmem [shape: f32[1,64], index: 9, kind: input, shape index: {}]   ;;  %s9106_s10 = inlined_call_operand.vmem [shape: f32[8,1,1], index: 10, kind: input, shape index: {}]   ;;  %s9107_s11 = inlined_call_operand.vmem [shape: f32[8,1,1], index: 11, kind: input, shape index: {}]   ;;  %s9108_s12 = inlined_call_operand.vmem [shape: f32[64,32], index: 12, kind: input, shape index: {}]   ;;  %s9109_s13 = inlined_call_operand.vmem [shape: f32[1,32], index: 13, kind: input, shape index: {}]   ;;  %s9110_s14 = inlined_call_operand.hbm [shape: f32[2,16,32], index: 14, kind: output, shape index: {0}]   ;;  %s9111_s15 = inlined_call_operand.hbm [shape: f32[2,24,64], index: 15, kind: output, shape index: {1}]   ;;  %s9112_s16 = inlined_call_operand.hbm [shape: f32[2,8,16,24], index: 16, kind: output, shape index: {2}]   ;;  %s9113_s17 = inlined_call_operand.vmem [shape: f32[2,8,24,16], index: 17, kind: output, shape index: {3}]  }
   0x1   :  { %9138 = sst [smem:[#allocation22_spill]] %s9096_s0 }
   0x2   :  { %9139 = sst [smem:[#allocation23_spill]] %s9097_s1 }
   0x3   :  { %9140 = sst [smem:[#allocation24_spill]] %s9100_s4 }
   0x4   :  { %9141 = sst [smem:[#allocation25_spill]] %s9101_s5 }
   0x5   :  { %9142 = sst [smem:[#allocation26_spill]] %s9104_s8 }
   0x6   :  { %9143 = sst [smem:[#allocation27_spill]] %s9112_s16 }
   0x7   :  { %23 = vsyncpa [#allocation3], 0 }
   0x8   :  { %25 = vsyncpa [#allocation3 + $0x1], 0 }
   0x9   :  { %26 = vsyncpa [#allocation5], 0 }
   0xa   :  { %28 = vsyncpa [#allocation5 + $0x1], 0  ;;  %s7333_s24 = smov 0   ;;  %s7335_s25 = smov 0  }
   0xb   :  { %s7337_s26 = smov 0   ;;  %s7339_s27 = smov 0  }
   0xc LB: > { %9144 = sst [smem:[#allocation9_spill]] %s7207_s24  ;;  %s7354_s28 = sadd.s32 4294967295, %s7219_s27   ;;  %s7219_s27 = sphi %s7339_s27, %s9181_s27   ;;  %s7215_s26 = sphi %s7337_s26, %s9183_s26   ;;  %s7211_s25 = sphi %s7335_s25, %s9185_s25   ;;  %s7207_s24 = sphi %s7333_s24, %s9184_s24  }
   0xd   : > { %9145 = sst [smem:[#allocation10_spill]] %s7215_s26  ;;  %s9114_s29 = sadd.s32 4294967294, %s7219_s27  }
   0xe   : > { %9146 = sst [smem:[#allocation11_spill]] %s7219_s27  ;;  %s7358_s0 = sadd.s32 1, %s7219_s27  }
   0xf   : > { %9147 = sst [smem:[#allocation12_spill]] %s7358_s0  ;;  %s375_s30 = sadd.s32 1, %s7215_s26 }
  0x10   : > { %s372_s18 = ssub.s32 %s7219_s27, %s7358_s0  ;;  %p385_p0 = scmp.ne.s32.totalorder %s7215_s26, %s7211_s25 }
  0x11   : > { %p373_p1 = scmp.eq.s32.totalorder %s372_s18, 0  ;;  %p386_p2 = scmp.eq.s32.totalorder %s7354_s28, 1 }
  0x12   : > { %p391_p3 = scmp.ne.s32.totalorder %s7211_s25, %s7207_s24  ;;  %p392_p4 = scmp.eq.s32.totalorder %s9114_s29, 1 }
  0x13   : > { %s7371_s19 = scalar_select %p373_p1, %s7215_s26, %s375_s30  }
  0x14   : > { %p7373_p5 = por %p386_p2, %p385_p0  ;;  %p7377_p6 = por %p392_p4, %p391_p3 }
  0x15   : > { %9148 = sst [smem:[#allocation13_spill]] %s7371_s19  ;;  %p5914_p7 = scmp.ge.s32.totalorder %s7219_s27, 1 }
  0x16   : > { %s9150_s20 = scalar_select %p7377_p6, 1, 0 }
  0x17   : > { %p568_p8 = scmp.lt.s32.totalorder %s7219_s27, 3 }
  0x18   : > { %9151 = sst [smem:[#allocation14_spill]] %s9150_s20 }
  0x19   : > { %p569_p9 = pnand %p5914_p7, %p568_p8 }
  0x1b   : > { %572 = sbr.rel (%p569_p9) target bundleno = 1872 (0x750), region = 76 }
  0x22   : > { %p668_p10 = scmp.lt.s32.totalorder %s7354_s28, 1  ;;  %s9152_s8 = sld [smem:[#allocation26_spill]]  ;;  %vm1011_vm0 = vcmask 195584   ;;  %vm810_vm1 = vcmask 261120   ;;  %vm922_vm2 = vcmask 130048   ;;  %v9126_v48 = vmov 0.0|0.0  }
  0x23   : > { %s9153_s5 = sld [smem:[#allocation25_spill]]  ;;  %s9154_s18 = sld [smem:[#allocation22_spill]]  ;;  %6612 = vmatprep.subr.bf16.mxu1 %v9126_v48  ;;  %vm7222_vm3 = vmmov 0   ;;  %v9124_v53 = vmov 0.0   ;;  %vm892_vm6 = vcmask 523264   ;;  %vm5389_vm11 = vcmask 64512  }
  0x24   : > { %s7397_s0 = scalar_select %p668_p10, %s7354_s28, 1  ;;  %6237 = vmatprep.mubr.msk.f32.mxu1 %vm7222_vm3, %v9124_v53  ;;  %vm5398_vm12 = vcmask 326656   ;;  %vm5401_vm13 = vcmask 392192   ;;  %vm5404_vm14 = vcmask 457728  }
  0x25   : > { %s9155_s4 = sld [smem:[#allocation24_spill]]  ;;  %s7226_s16 = smov 112  }
  0x26   : > { %s9118_s21 = sshll.u32 %s7397_s0, 7  ;;  %s6040_s26 = sshll.u32 %s7397_s0, 4 }
  0x27   : > { %s7442_s23 = smul.u32 192, %s7397_s0  ;;  %s9156_s19 = sshll.u32 %s7397_s0, 7 }
  0x28   : > { %v799_v0 = vld [vmem:[%s9152_s8] sm:$0xff]  ;;  %v800_v1 = vld [vmem:[%s9152_s8 + $0x8] sm:$0xff]  ;;  %v801_v2 = vld [vmem:[%s9152_s8 + $0x10] sm:$0xff]  ;;  %s7227_s24 = smov 104   ;;  %s700_s20 = scalar_lea.vmem %s9102_s6, %s7397_s0 }
  0x29   : > { %v6604_v3 = vpack.c.bf16 %v800_v1, %v799_v0  ;;  %v802_v4 = vld [vmem:[%s9152_s8 + $0x18] sm:$0xff]  ;;  %s7405_s29 = scalar_lea.vmem %s9153_s5, %s9118_s21  ;;  %s7427_s22 = scalar_lea.vmem %s9154_s18, %s6040_s26 }
  0x2a   : > { %v6608_v5 = vpack.c.bf16 %v802_v4, %v801_v2  ;;  %v782_v6 = vld [vmem:[%s7405_s29 + $0x10] sm:$0xff]  ;;  %v780_v7 = vld [vmem:[%s7405_s29] sm:$0xff]  ;;  %v783_v8 = vld [vmem:[%s7405_s29 + $0x18] sm:$0xff]  ;;  %s7612_s8 = scalar_lea.vmem %s9098_s2, %s7442_s23  ;;  %s7685_s5 = scalar_lea.vmem %s9099_s3, %s9156_s19 }
  0x2b   : > { %6605 = vmatprep.subr.bf16.mxu0 %v6604_v3  ;;  %v1162_v9 = vsel %vm1011_vm0, %v782_v6, 0.0  ;;  %v1156_v10 = vsel %vm1011_vm0, %v780_v7, 0.0  ;;  %v781_v11 = vld [vmem:[%s7405_s29 + $0x8] sm:$0xff]  ;;  %v1165_v12 = vsel %vm1011_vm0, %v783_v8, 0.0  ;;  %v784_v15 = vld [vmem:[%s7405_s29 + $0x20] sm:$0xff]  ;;  %v787_v24 = vld [vmem:[%s7405_s29 + $0x38] sm:$0xff]  ;;  %s7452_s18 = scalar_lea.vmem %s9155_s4, %s7442_s23  ;;  %s705_s4 = scalar_lea.vmem %s9103_s7, %s6040_s26 }
  0x2c   : > { %6607 = vmatpush3.bf16.msra.mxu0 %v6604_v3  ;;  %1163 = vadd.xlane.f32.xlu1 %v1162_v9  ;;  %v1159_v13 = vsel %vm1011_vm0, %v781_v11, 0.0  ;;  %v785_v14 = vld [vmem:[%s7405_s29 + $0x28] sm:$0xff]  ;;  %v1168_v17 = vsel %vm1011_vm0, %v784_v15, 0.0  ;;  %v788_v19 = vld [vmem:[%s7405_s29 + $0x40] sm:$0xff]  ;;  %v786_v25 = vld [vmem:[%s7405_s29 + $0x30] sm:$0xff]  ;;  %v1177_v26 = vsel %vm1011_vm0, %v787_v24, 0.0 }
  0x2d   : > { %6609 = vmatprep.subr.bf16.mxu0 %v6608_v5  ;;  %1157 = vadd.xlane.f32.xlu0 %v1156_v10  ;;  %v1171_v16 = vsel %vm1011_vm0, %v785_v14, 0.0  ;;  %v789_v18 = vld [vmem:[%s7405_s29 + $0x48] sm:$0xff]  ;;  %v711_v20 = vld [vmem:[%s7427_s22] sm:$0xff]  ;;  %v1180_v23 = vsel %vm1011_vm0, %v788_v19, 0.0  ;;  %v1174_v27 = vsel %vm1011_vm0, %v786_v25, 0.0  ;;  %v791_v32 = vld [vmem:[%s7405_s29 + $0x58] sm:$0xff] }
  0x2e   : > { %v712_v21 = vld [vmem:[%s7427_s22 + $0x8] sm:$0xff]  ;;  %v1183_v22 = vsel %vm1011_vm0, %v789_v18, 0.0  ;;  %6230 = vmatprep.mubr.msk.f32.mxu0 %vm810_vm1, %v711_v20  ;;  %v792_v29 = vld [vmem:[%s7405_s29 + $0x60] sm:$0xff]  ;;  %v790_v33 = vld [vmem:[%s7405_s29 + $0x50] sm:$0xff]  ;;  %v1189_v34 = vsel %vm1011_vm0, %v791_v32, 0.0  ;;  %s7230_s21 = smov 80  }
  0x2f   : > { %v793_v28 = vld [vmem:[%s7405_s29 + $0x68] sm:$0xff]  ;;  %v1192_v31 = vsel %vm1011_vm0, %v792_v29, 0.0  ;;  %v1186_v35 = vsel %vm1011_vm0, %v790_v33, 0.0  ;;  %v7460_v37 = vld [vmem:[%s7452_s18] sm:$0xff]  ;;  %v7467_v40 = vld [vmem:[%s7452_s18 + $0x18] sm:$0xff]  ;;  %s7231_s26 = smov 72  }
  0x30   : > { %6611 = vmatpush3.bf16.msra.mxu0 %v6608_v5  ;;  %1166 = vadd.xlane.f32.xlu1 %v1165_v12  ;;  %v1195_v30 = vsel %vm1011_vm0, %v793_v28, 0.0  ;;  %v7457_v36 = vld [vmem:[%s7452_s18 + $0x8] sm:$0xff]  ;;  %v1084_v39 = vsel %vm922_vm2, %v7460_v37, 0.0  ;;  %v7470_v41 = vld [vmem:[%s7452_s18 + $0x10] sm:$0xff]  ;;  %v1093_v42 = vsel %vm922_vm2, %v7467_v40, 0.0  ;;  %v7480_v45 = vld [vmem:[%s7452_s18 + $0x20] sm:$0xff] }
  0x31   : > { %1160 = vadd.xlane.f32.xlu0 %v1159_v13  ;;  %v1087_v38 = vsel %vm922_vm2, %v7457_v36, 0.0  ;;  %v1090_v43 = vsel %vm922_vm2, %v7470_v41, 0.0  ;;  %v7477_v44 = vld [vmem:[%s7452_s18 + $0x28] sm:$0xff]  ;;  %v1096_v47 = vsel %vm922_vm2, %v7480_v45, 0.0  ;;  %6615 = vmatprep.subr.bf16.mxu0 %v9126_v48  ;;  %v795_v49 = vld [vmem:[%s7405_s29 + $0x78] sm:$0xff]  ;;  %v794_v50 = vld [vmem:[%s7405_s29 + $0x70] sm:$0xff] }
  0x32   : > { %v1099_v46 = vsel %vm922_vm2, %v7477_v44, 0.0  ;;  %v1201_v51 = vsel %vm1011_vm0, %v795_v49, 0.0  ;;  %v1198_v52 = vsel %vm1011_vm0, %v794_v50, 0.0  ;;  %v7497_v54 = vld [vmem:[%s7452_s18 + $0x38] sm:$0xff]  ;;  %v7500_v55 = vld [vmem:[%s7452_s18 + $0x30] sm:$0xff]  ;;  %v7510_v59 = vld [vmem:[%s7452_s18 + $0x48] sm:$0xff] }
  0x33   : > { %6231 = vmatmul.mubr.msk.f32.vlgmr.msra.gmra.mrb[0].mxu0 %vm810_vm1, %v712_v21  ;;  %v1105_v56 = vsel %vm922_vm2, %v7497_v54, 0.0  ;;  %v1102_v57 = vsel %vm922_vm2, %v7500_v55, 0.0  ;;  %v7507_v58 = vld [vmem:[%s7452_s18 + $0x50] sm:$0xff]  ;;  %v1111_v61 = vsel %vm922_vm2, %v7510_v59, 0.0  ;;  %v7517_v62 = vld [vmem:[%s7452_s18 + $0x58] sm:$0xff]  ;;  %v7520_v63 = vld [vmem:[%s7452_s18 + $0x40] sm:$0xff] }
  0x34   : > { %1172 = vadd.xlane.f32.xlu1 %v1171_v16  ;;  %6250 = vmatprep.mubr.msk.f32.mxu0 %vm7222_vm3, %v9124_v53  ;;  %v1114_v60 = vsel %vm922_vm2, %v7507_v58, 0.0  ;;  %v1117_v0 = vsel %vm922_vm2, %v7517_v62, 0.0  ;;  %v1108_v1 = vsel %vm922_vm2, %v7520_v63, 0.0  ;;  %v7527_v2 = vld [vmem:[%s7452_s18 + $0x68] sm:$0xff]  ;;  %v7530_v3 = vld [vmem:[%s7452_s18 + $0x60] sm:$0xff]  ;;  %v7540_v7 = vld [vmem:[%s7452_s18 + $0x78] sm:$0xff] }
  0x35   : > { %1169 = vadd.xlane.f32.xlu0 %v1168_v17  ;;  %v1123_v4 = vsel %vm922_vm2, %v7527_v2, 0.0  ;;  %v1120_v5 = vsel %vm922_vm2, %v7530_v3, 0.0  ;;  %v7537_v6 = vld [vmem:[%s7452_s18 + $0x80] sm:$0xff]  ;;  %v1129_v9 = vsel %vm922_vm2, %v7540_v7, 0.0  ;;  %v7547_v10 = vld [vmem:[%s7452_s18 + $0x88] sm:$0xff]  ;;  %v7550_v11 = vld [vmem:[%s7452_s18 + $0x70] sm:$0xff] }
  0x36   : > { %v1132_v8 = vsel %vm922_vm2, %v7537_v6, 0.0  ;;  %v1135_v12 = vsel %vm922_vm2, %v7547_v10, 0.0  ;;  %v1126_v13 = vsel %vm922_vm2, %v7550_v11, 0.0  ;;  %v7557_v14 = vld [vmem:[%s7452_s18 + $0x98] sm:$0xff]  ;;  %v7560_v15 = vld [vmem:[%s7452_s18 + $0x90] sm:$0xff]  ;;  %v7570_v19 = vld [vmem:[%s7452_s18 + $0xa8] sm:$0xff] }
  0x37   : > { %v1141_v16 = vsel %vm922_vm2, %v7557_v14, 0.0  ;;  %v1138_v17 = vsel %vm922_vm2, %v7560_v15, 0.0  ;;  %v7567_v18 = vld [vmem:[%s7452_s18 + $0xb0] sm:$0xff]  ;;  %v1147_v21 = vsel %vm922_vm2, %v7570_v19, 0.0  ;;  %v5980_v28 = vld [vmem:[%s9107_s11] ss:$0 sm:$0xff] }
  0x38   : > { %1184 = vadd.xlane.f32.xlu1 %v1183_v22  ;;  %v1150_v20 = vsel %vm922_vm2, %v7567_v18, 0.0  ;;  %v7577_v22 = vld [vmem:[%s7452_s18 + $0xb8] sm:$0xff]  ;;  %v5972_v29 = vld [vmem:[%s9106_s10] ss:$0 sm:$0xff]  ;;  %v5983_v32 = vld [vmem:[%s9107_s11 + $0x3] ss:$0 sm:$0xff] }
  0x39   : > { %1181 = vadd.xlane.f32.xlu0 %v1180_v23  ;;  %v7580_v23 = vld [vmem:[%s7452_s18 + $0xa0] sm:$0xff]  ;;  %v1153_v24 = vsel %vm922_vm2, %v7577_v22, 0.0  ;;  %v798_v33 = vld [vmem:[%s705_s4 + $0x8] sm:$0xff]  ;;  %s9157_s18 = sld [smem:[#allocation23_spill]]  ;;  %s7235_s27 = smov 32  }
  0x3a   : > { %v1144_v25 = vsel %vm922_vm2, %v7580_v23, 0.0  ;;  %vm3364_vm5 = vcmp.gt.f32.partialorder %v798_v33, 0.5  ;;  %v721_v50 = vld [vmem:[%s7612_s8 + $0x28] sm:$0xff] }
  0x3c   : > { %1178 = vadd.xlane.f32.xlu1 %v1177_v26  ;;  %v7224_v26 = vmov 0  }
  0x3d   : > { %1175 = vadd.xlane.f32.xlu0 %v1174_v27  ;;  %6813 = vset.pattern.permute.xlu1 %v7224_v26  ;;  %v5973_v27 = vld [vmem:[%s9106_s10 + $0x1] ss:$0 sm:$0xff] }
  0x3e   : > { %6812 = vset.pattern.permute.xlu0 %v7224_v26 }
  0x40   : > { %1196 = vadd.xlane.f32.xlu1 %v1195_v30  ;;  %v797_v30 = vld [vmem:[%s705_s4] sm:$0xff]  ;;  %s7229_s4 = smov 96  }
  0x41   : > { %1193 = vadd.xlane.f32.xlu0 %v1192_v31  ;;  %v5981_v31 = vld [vmem:[%s9107_s11 + $0x1] ss:$0 sm:$0xff]  ;;  %vm3363_vm4 = vcmp.gt.f32.partialorder %v797_v30, 0.5  ;;  %v725_v30 = vld [vmem:[%s7612_s8 + $0x48] sm:$0xff] }
  0x44   : > { %1190 = vadd.xlane.f32.xlu1 %v1189_v34  ;;  %v3365_v34 = vsel %vm3363_vm4, 1, %v7224_v26 }
  0x45   : > { %1187 = vadd.xlane.f32.xlu0 %v1186_v35  ;;  %v5976_v35 = vld [vmem:[%s9106_s10 + $0x4] ss:$0 sm:$0xff] }
  0x48   : > { %1088 = vadd.xlane.f32.xlu1 %v1087_v38  ;;  %v719_v38 = vld [vmem:[%s7612_s8 + $0x18] sm:$0xff] }
  0x49   : > { %1085 = vadd.xlane.f32.xlu0 %v1084_v39  ;;  %v720_v39 = vld [vmem:[%s7612_s8 + $0x20] sm:$0xff] }
  0x4a   : > { %v935_v49 = vsel %vm922_vm2, %v720_v39, 0.0  ;;  %v730_v39 = vld [vmem:[%s7612_s8 + $0x70] sm:$0xff] }
  0x4c   : > { %1094 = vadd.xlane.f32.xlu1 %v1093_v42  ;;  %v716_v42 = vld [vmem:[%s7612_s8] sm:$0xff] }
  0x4d   : > { %1091 = vadd.xlane.f32.xlu0 %v1090_v43  ;;  %v717_v43 = vld [vmem:[%s7612_s8 + $0x8] sm:$0xff] }
  0x50   : > { %1100 = vadd.xlane.f32.xlu1 %v1099_v46  ;;  %v3366_v46 = vsel %vm3364_vm5, 1, %v7224_v26 }
  0x51   : > { %1097 = vadd.xlane.f32.xlu0 %v1096_v47  ;;  %v934_v47 = vsel %vm922_vm2, %v719_v38, 0.0 }
  0x54   : > { %1202 = vadd.xlane.f32.xlu1 %v1201_v51  ;;  %v923_v51 = vsel %vm922_vm2, %v716_v42, 0.0  ;;  %v956_v42 = vsel %vm922_vm2, %v725_v30, 0.0 }
  0x55   : > { %1199 = vadd.xlane.f32.xlu0 %v1198_v52  ;;  %v924_v52 = vsel %vm922_vm2, %v717_v43, 0.0 }
  0x58   : > { %1106 = vadd.xlane.f32.xlu1 %v1105_v56  ;;  %v718_v56 = vld [vmem:[%s7612_s8 + $0x10] sm:$0xff] }
  0x59   : > { %1103 = vadd.xlane.f32.xlu0 %v1102_v57  ;;  %v936_v57 = vadd.f32 %v935_v49, %v934_v47  ;;  %v727_v47 = vld [vmem:[%s7612_s8 + $0x58] sm:$0xff]  ;;  %v5977_v49 = vld [vmem:[%s9106_s10 + $0x5] ss:$0 sm:$0xff] }
  0x5c   : > { %1115 = vadd.xlane.f32.xlu1 %v1114_v60  ;;  %v5974_v60 = vld [vmem:[%s9106_s10 + $0x2] ss:$0 sm:$0xff] }
  0x5d   : > { %1112 = vadd.xlane.f32.xlu0 %v1111_v61  ;;  %v937_v61 = vsel %vm922_vm2, %v721_v50, 0.0 }
  0x60   : > { %1118 = vadd.xlane.f32.xlu1 %v1117_v0  ;;  %v925_v0 = vadd.f32 %v924_v52, %v923_v51  ;;  %v970_v52 = vsel %vm922_vm2, %v730_v39, 0.0  ;;  %v5986_v39 = vld [vmem:[%s9107_s11 + $0x6] ss:$0 sm:$0xff] }
  0x61   : > { %1109 = vadd.xlane.f32.xlu0 %v1108_v1  ;;  %v722_v1 = vld [vmem:[%s7612_s8 + $0x30] sm:$0xff] }
  0x64   : > { %1124 = vadd.xlane.f32.xlu1 %v1123_v4  ;;  %v723_v4 = vld [vmem:[%s7612_s8 + $0x38] sm:$0xff] }
  0x65   : > { %1121 = vadd.xlane.f32.xlu0 %v1120_v5  ;;  %v926_v5 = vsel %vm922_vm2, %v718_v56, 0.0 }
  0x68   : > { %1133 = vadd.xlane.f32.xlu1 %v1132_v8  ;;  %v938_v8 = vadd.f32 %v937_v61, %v936_v57 }
  0x69   : > { %1130 = vadd.xlane.f32.xlu0 %v1129_v9  ;;  %v945_v9 = vsel %vm922_vm2, %v722_v1, 0.0 }
  0x6c   : > { %1136 = vadd.xlane.f32.xlu1 %v1135_v12  ;;  %v946_v12 = vsel %vm922_vm2, %v723_v4, 0.0 }
  0x6d   : > { %1127 = vadd.xlane.f32.xlu0 %v1126_v13  ;;  %v5975_v13 = vld [vmem:[%s9106_s10 + $0x3] ss:$0 sm:$0xff] }
  0x70   : > { %1142 = vadd.xlane.f32.xlu1 %v1141_v16  ;;  %v5985_v16 = vld [vmem:[%s9107_s11 + $0x5] ss:$0 sm:$0xff] }
  0x71   : > { %1139 = vadd.xlane.f32.xlu0 %v1138_v17  ;;  %v927_v17 = vadd.f32 %v926_v5, %v925_v0  ;;  %v5984_v0 = vld [vmem:[%s9107_s11 + $0x4] ss:$0 sm:$0xff]  ;;  %v731_v5 = vld [vmem:[%s7612_s8 + $0x78] sm:$0xff] }
  0x73   : > { %v928_v33 = vrot.slane %v927_v17, 4 }
  0x74   : > { %1151 = vadd.xlane.f32.xlu1 %v1150_v20  ;;  %v724_v20 = vld [vmem:[%s7612_s8 + $0x40] sm:$0xff] }
  0x75   : > { %1148 = vadd.xlane.f32.xlu0 %v1147_v21  ;;  %v5979_v21 = vld [vmem:[%s9106_s10 + $0x7] ss:$0 sm:$0xff]  ;;  %v929_v50 = vadd.f32 %v928_v33, %v927_v17  ;;  %v735_v17 = vld [vmem:[%s7612_s8 + $0x98] sm:$0xff] }
  0x77   : > { %v930_v1 = vrot.slane %v929_v50, 2 }
  0x78   : > { %1154 = vadd.xlane.f32.xlu1 %v1153_v24  ;;  %v947_v24 = vadd.f32 %v946_v12, %v945_v9 }
  0x79   : > { %1145 = vadd.xlane.f32.xlu0 %v1144_v25  ;;  %v728_v25 = vld [vmem:[%s7612_s8 + $0x60] sm:$0xff] }
  0x89   : > { %2969 = vperm.xlu1 %6813, %v5973_v27   ;;  %v729_v27 = vld [vmem:[%s7612_s8 + $0x68] sm:$0xff] }
  0x8d   : > { %3061 = vperm.xlu1 %6813, %v5980_v28   ;;  %v939_v28 = vrot.slane %v938_v8, 4 }
  0x8f   : > { %2965 = vperm.xlu0 %6812, %v5972_v29   ;;  %v948_v29 = vsel %vm922_vm2, %v724_v20, 0.0  ;;  %v978_v20 = vsel %vm922_vm2, %v731_v5, 0.0 }
  0x90   : > { %v949_v38 = vadd.f32 %v948_v29, %v947_v24  ;;  %v5978_v24 = vld [vmem:[%s9106_s10 + $0x6] ss:$0 sm:$0xff] }
  0x91   : > { %3065 = vperm.xlu1 %6813, %v5981_v31   ;;  %v726_v31 = vld [vmem:[%s7612_s8 + $0x50] sm:$0xff] }
  0x92   : > { %v957_v43 = vsel %vm922_vm2, %v726_v31, 0.0  ;;  %v950_v57 = vrot.slane %v949_v38, 4 }
  0x93   : > { %3073 = vperm.xlu0 %6812, %v5983_v32   ;;  %v5982_v32 = vld [vmem:[%s9107_s11 + $0x2] ss:$0 sm:$0xff]  ;;  %v958_v56 = vadd.f32 %v957_v43, %v956_v42 }
  0x94   : > { %v951_v12 = vadd.f32 %v950_v57, %v949_v38 }
  0x95   : > { %3368 = vperm.xlu1 %6813, %v3365_v34   ;;  %v967_v34 = vsel %vm922_vm2, %v728_v25, 0.0  ;;  %v931_v25 = vadd.f32 %v930_v1, %v929_v50  ;;  %v741_v50 = vld [vmem:[%s7685_s5 + $0x8] sm:$0xff] }
  0x96   : > { %v952_v30 = vrot.slane %v951_v12, 2 }
  0x97   : > { %2981 = vperm.xlu0 %6812, %v5976_v35   ;;  %v968_v35 = vsel %vm922_vm2, %v729_v27, 0.0  ;;  %v932_v42 = vrot.slane %v931_v25, 1 }
  0x98   : > { %v969_v51 = vadd.f32 %v968_v35, %v967_v34  ;;  %v736_v35 = vld [vmem:[%s7612_s8 + $0xa0] sm:$0xff] }
  0x99   : > { %3371 = vperm.xlu1 %6813, %v3366_v46   ;;  %v940_v46 = vadd.f32 %v939_v28, %v938_v8  ;;  %v732_v8 = vld [vmem:[%s7612_s8 + $0x80] sm:$0xff]  ;;  %v733_v28 = vld [vmem:[%s7612_s8 + $0x88] sm:$0xff] }
  0x9a   : > { %v971_v4 = vadd.f32 %v970_v52, %v969_v51  ;;  %v981_v38 = vsel %vm922_vm2, %v733_v28, 0.0  ;;  %v953_v51 = vadd.f32 %v952_v30, %v951_v12  ;;  %v992_v52 = vsel %vm922_vm2, %v736_v35, 0.0 }
  0x9b   : > { %3081 = vperm.xlu0 %6812, %v5985_v16   ;;  %v941_v61 = vrot.slane %v940_v46, 2  ;;  %v734_v16 = vld [vmem:[%s7612_s8 + $0x90] sm:$0xff] }
  0x9c   : > { %v972_v27 = vrot.slane %v971_v4, 4  ;;  %v989_v31 = vsel %vm922_vm2, %v734_v16, 0.0  ;;  %v954_v16 = vrot.slane %v953_v51, 1 }
  0x9d   : > { %2973 = vperm.xlu1 %6813, %v5974_v60   ;;  %v959_v60 = vsel %vm922_vm2, %v727_v47, 0.0 }
  0x9e   : > { %v960_v9 = vadd.f32 %v959_v60, %v958_v56  ;;  %v973_v43 = vadd.f32 %v972_v27, %v971_v4  ;;  %v5987_v60 = vld [vmem:[%s9107_s11 + $0x7] ss:$0 sm:$0xff]  ;;  %v1013_v4 = vsel %vm1011_vm0, %v741_v50, 0.0 }
  0x9f   : > { %2993 = vperm.xlu0 %6812, %v5979_v21   ;;  %v979_v21 = vsel %vm922_vm2, %v732_v8, 0.0 }
  0xa0   : > { %v961_v29 = vrot.slane %v960_v9, 4  ;;  %v980_v33 = vadd.f32 %v979_v21, %v978_v20  ;;  %v737_v21 = vld [vmem:[%s7612_s8 + $0xa8] sm:$0xff] }
  0xa1   : > { %2977 = vperm.xlu1 %6813, %v5975_v13   ;;  %v942_v13 = vadd.f32 %v941_v61, %v940_v46  ;;  %v933_v61 = vadd.f32 %v932_v42, %v931_v25 }
  0xa2   : > { %v962_v46 = vadd.f32 %v961_v29, %v960_v9  ;;  %v982_v56 = vadd.f32 %v981_v38, %v980_v33 }
  0xa3   : > { %v943_v34 = vrot.slane %v942_v13, 1 }
  0xa4   : > { %v963_v5 = vrot.slane %v962_v46, 2 }
  0xa5   : > { %3069 = vperm.xlu1 %6813, %v5982_v32   ;;  %v990_v32 = vsel %vm922_vm2, %v735_v17, 0.0  ;;  %v944_v57 = vadd.f32 %v943_v34, %v942_v13  ;;  %v983_v17 = vrot.slane %v982_v56, 4  ;;  %v1000_v34 = vsel %vm922_vm2, %v737_v21, 0.0 }
  0xa6   : > { %v991_v47 = vadd.f32 %v990_v32, %v989_v31  ;;  %v964_v25 = vadd.f32 %v963_v5, %v962_v46  ;;  %v955_v32 = vadd.f32 %v954_v16, %v953_v51 }
  0xa7   : > { %v984_v33 = vadd.f32 %v983_v17, %v982_v56  ;;  %v742_v56 = vld [vmem:[%s7685_s5 + $0x10] sm:$0xff] }
  0xa8   : > { %v993_v8 = vadd.f32 %v992_v52, %v991_v47  ;;  %v965_v51 = vrot.slane %v964_v25, 1 }
  0xa9   : > { %2985 = vperm.xlu1 %6813, %v5977_v49   ;;  %v740_v49 = vld [vmem:[%s7685_s5] sm:$0xff]  ;;  %v985_v52 = vrot.slane %v984_v33, 2 }
  0xaa   : > { %v1012_v1 = vsel %vm1011_vm0, %v740_v49, 0.0  ;;  %v994_v29 = vrot.slane %v993_v8, 4  ;;  %v739_v49 = vld [vmem:[%s7612_s8 + $0xb8] sm:$0xff] }
  0xab   : > { %v1014_v13 = vadd.f32 %v1013_v4, %v1012_v1 }
  0xad   : > { %3077 = vperm.xlu1 %6813, %v5984_v0   ;;  %v974_v0 = vrot.slane %v973_v43, 2  ;;  %v1015_v42 = vrot.slane %v1014_v13, 4 }
  0xaf   : > { %v975_v28 = vadd.f32 %v974_v0, %v973_v43  ;;  %v995_v43 = vadd.f32 %v994_v29, %v993_v8  ;;  %v1021_v8 = vsel %vm1011_vm0, %v742_v56, 0.0  ;;  %v966_v29 = vadd.f32 %v965_v51, %v964_v25 }
  0xb1   : > { %2989 = vperm.xlu1 %6813, %v5978_v24   ;;  %v738_v24 = vld [vmem:[%s7612_s8 + $0xb0] sm:$0xff]  ;;  %v976_v47 = vrot.slane %v975_v28, 1  ;;  %v996_v16 = vrot.slane %v995_v43, 2  ;;  %s6741_s8 = smul.u32 24, %s7397_s0  ;;  %s8289_s0 = sand.u32 1, %s7211_s25  }
  0xb2   : > { %v1001_v35 = vsel %vm922_vm2, %v738_v24, 0.0  ;;  %v986_v24 = vadd.f32 %v985_v52, %v984_v33  ;;  %s5916_s30 = sshll.u32 %s8289_s0, 7 }
  0xb3   : > { %v1002_v0 = vadd.f32 %v1001_v35, %v1000_v34  ;;  %v977_v5 = vadd.f32 %v976_v47, %v975_v28  ;;  %v997_v35 = vadd.f32 %v996_v16, %v995_v43  ;;  %s7780_s19 = scalar_lea.vmem %s9157_s18, %s6741_s8  ;;  %s8347_s18 = scalar_lea.vmem [#allocation6], %s5916_s30 }
  0xb4   : > { %v987_v47 = vrot.slane %v986_v24, 1  ;;  %s5619_s8 = scalar_lea.sflag [#allocation3], %s8289_s0 }
  0xb5   : > { %3085 = vperm.xlu1 %6813, %v5986_v39   ;;  %v998_v43 = vrot.slane %v997_v35, 1 }
  0xb6   : > { %v988_v16 = vadd.f32 %v987_v47, %v986_v24 }
  0xb9   : > { %v1164_v9 = vpop.xlane.xlu1 %1163  ;;  %3089 = vperm.xlu1 %6813, %v5987_v60   ;;  %v743_v60 = vld [vmem:[%s7685_s5 + $0x18] sm:$0xff] }
  0xba   : > { %v1158_v12 = vpop.xlane.xlu0 %1157  ;;  %v1206_v20 = vmul.f32 %v1164_v9, %v944_v57  ;;  %v744_v9 = vld [vmem:[%s7685_s5 + $0x20] sm:$0xff]  ;;  %v1022_v17 = vsel %vm1011_vm0, %v743_v60, 0.0 }
  0xbb   : > { %v1204_v27 = vmul.f32 %v1158_v12, %v933_v61  ;;  %v745_v12 = vld [vmem:[%s7685_s5 + $0x28] sm:$0xff] }
  0xbc   : > { %6884 = vtanh.f32 %v1206_v20 }
  0xbd   : > { %v1167_v30 = vpop.xlane.xlu1 %1166  ;;  %6886 = vtanh.f32 %v1204_v27 }
  0xbe   : > { %v1161_v31 = vpop.xlane.xlu0 %1160  ;;  %v1207_v38 = vmul.f32 %v1167_v30, %v944_v57  ;;  %v1016_v57 = vadd.f32 %v1015_v42, %v1014_v13  ;;  %v1030_v13 = vsel %vm1011_vm0, %v744_v9, 0.0 }
  0xbf   : > { %v1205_v39 = vmul.f32 %v1161_v31, %v933_v61  ;;  %v1003_v61 = vsel %vm922_vm2, %v739_v49, 0.0  ;;  %v1031_v31 = vsel %vm1011_vm0, %v745_v12, 0.0 }
  0xc0   : > { %6888 = vtanh.f32 %v1207_v38  ;;  %v1004_v27 = vadd.f32 %v1003_v61, %v1002_v0  ;;  %v1017_v30 = vrot.slane %v1016_v57, 2 }
  0xc1   : > { %6890 = vtanh.f32 %v1205_v39  ;;  %v1173_v46 = vpop.xlane.xlu1 %1172 }
  0xc2   : > { %v1170_v50 = vpop.xlane.xlu0 %1169  ;;  %v1209_v1 = vmul.f32 %v1173_v46, %v955_v32  ;;  %v1005_v49 = vrot.slane %v1004_v27, 4  ;;  %v1032_v46 = vadd.f32 %v1031_v31, %v1030_v13  ;;  %v1018_v52 = vadd.f32 %v1017_v30, %v1016_v57  ;;  %v749_v30 = vld [vmem:[%s7685_s5 + $0x48] sm:$0xff] }
  0xc3   : > { %v1208_v4 = vmul.f32 %v1170_v50, %v955_v32  ;;  %v1023_v32 = vadd.f32 %v1022_v17, %v1021_v8  ;;  %v1049_v47 = vsel %vm1011_vm0, %v749_v30, 0.0 }
  0xc4   : > { %6892 = vtanh.f32 %v1209_v1  ;;  %v746_v1 = vld [vmem:[%s7685_s5 + $0x30] sm:$0xff]  ;;  %v1033_v8 = vrot.slane %v1032_v46, 4  ;;  %v1019_v57 = vrot.slane %v1018_v52, 1 }
  0xc5   : > { %6894 = vtanh.f32 %v1208_v4  ;;  %v1185_v20 = vpop.xlane.xlu1 %1184  ;;  %v1024_v0 = vrot.slane %v1023_v32, 4  ;;  %v747_v4 = vld [vmem:[%s7685_s5 + $0x38] sm:$0xff] }
  0xc6   : > { %v1182_v21 = vpop.xlane.xlu0 %1181  ;;  %v1213_v28 = vmul.f32 %v1185_v20, %v977_v5  ;;  %v6885_v34 = vpop.eup %6884  ;;  %v1039_v20 = vsel %vm1011_vm0, %v746_v1, 0.0  ;;  %v751_v1 = vld [vmem:[%s7685_s5 + $0x58] sm:$0xff] }
  0xc7   : > { %v6887_v38 = vpop.eup %6886  ;;  %v1212_v50 = vmul.f32 %v1182_v21, %v977_v5  ;;  %v1006_v5 = vadd.f32 %v1005_v49, %v1004_v27  ;;  %v1040_v21 = vsel %vm1011_vm0, %v747_v4, 0.0  ;;  %v1025_v31 = vadd.f32 %v1024_v0, %v1023_v32  ;;  %v750_v0 = vld [vmem:[%s7685_s5 + $0x50] sm:$0xff] }
  0xc8   : > { %6896 = vtanh.f32 %v1213_v28  ;;  %v999_v28 = vadd.f32 %v998_v43, %v997_v35 }
  0xc9   : > { %v1179_v39 = vpop.xlane.xlu1 %1178  ;;  %v1026_v49 = vrot.slane %v1025_v31, 2 }
  0xca   : > { %v1176_v42 = vpop.xlane.xlu0 %1175  ;;  %v6889_v33 = vpop.eup %6888  ;;  %v1211_v25 = vmul.f32 %v1179_v39, %v966_v29  ;;  %v1041_v39 = vadd.f32 %v1040_v21, %v1039_v20 }
  0xcb   : > { %v1210_v51 = vmul.f32 %v1176_v42, %v966_v29  ;;  %v6891_v56 = vpop.eup %6890  ;;  %v6616_v60 = vpack.c.bf16 %v6889_v33, %v6885_v34  ;;  %v748_v29 = vld [vmem:[%s7685_s5 + $0x40] sm:$0xff] }
  0xcc   : > { %6898 = vtanh.f32 %v1211_v25  ;;  %v6613_v61 = vpack.c.bf16 %v6891_v56, %v6887_v38  ;;  %v1034_v38 = vadd.f32 %v1033_v8, %v1032_v46  ;;  %v1048_v42 = vsel %vm1011_vm0, %v748_v29, 0.0 }
  0xcd   : > { %6900 = vtanh.f32 %v1210_v51  ;;  %v1197_v9 = vpop.xlane.xlu1 %1196  ;;  %6617 = vmatpush3.bf16.msra.mxu0 %v6616_v60  ;;  %v1050_v33 = vadd.f32 %v1049_v47, %v1048_v42  ;;  %v1042_v60 = vrot.slane %v1041_v39, 4  ;;  %v1057_v8 = vsel %vm1011_vm0, %v750_v0, 0.0  ;;  %v7799_v0 = vld [vmem:[%s7780_s19 + $0x8] sm:$0xff] }
  0xce   : > { %v1194_v12 = vpop.xlane.xlu0 %1193  ;;  %v6893_v17 = vpop.eup %6892  ;;  %6902 = vtanh.f32 %v1212_v50  ;;  %6614 = vmatpush3.bf16.msra.mxu1 %v6613_v61  ;;  %6621 = vmatprep.subr.bf16.mxu0 %v9126_v48  ;;  %v1217_v46 = vmul.f32 %v1197_v9, %v999_v28  ;;  %v1035_v56 = vrot.slane %v1034_v38, 2 }
  0xcf   : > { %v6895_v13 = vpop.eup %6894  ;;  %6618 = vmatprep.subr.bf16.mxu1 %v9126_v48  ;;  %v1216_v25 = vmul.f32 %v1194_v12, %v999_v28  ;;  %v1051_v21 = vrot.slane %v1050_v33, 4  ;;  %v753_v28 = vld [vmem:[%s7685_s5 + $0x68] sm:$0xff] }
  0xd0   : > { %6251 = vmatmul.mubr.msk.f32.vlgmr.msra.gmra.mrb[2].mxu0 %vm922_vm2, %v7467_v40  ;;  %v6619_v24 = vpack.c.bf16 %v6893_v17, %v6895_v13  ;;  %v7734_v40 = vadd.f32 %v1019_v57, %v1018_v52  ;;  %v1058_v17 = vsel %vm1011_vm0, %v751_v1, 0.0  ;;  %v1036_v20 = vadd.f32 %v1035_v56, %v1034_v38 }
  0xd1   : > { %6238 = vmatmul.mubr.msk.f32.vlgmr.msra.gmra.mrb[0].mxu1 %vm922_vm2, %v7460_v37  ;;  %v1191_v27 = vpop.xlane.xlu1 %1190  ;;  %6253 = vmatprep.mubr.msk.f32.mxu0 %vm7222_vm3, %v9124_v53  ;;  %v1007_v37 = vrot.slane %v1006_v5, 2  ;;  %v1059_v13 = vadd.f32 %v1058_v17, %v1057_v8  ;;  %v1067_v47 = vsel %vm1011_vm0, %v753_v28, 0.0  ;;  %v905_v8 = vsel %vm892_vm6, %v7799_v0, 0.0 }
  0xd2   : > { %v1188_v34 = vpop.xlane.xlu0 %1187  ;;  %v1215_v32 = vmul.f32 %v1191_v27, %v988_v16  ;;  %6240 = vmatprep.mubr.msk.f32.mxu1 %vm7222_vm3, %v9124_v53  ;;  %6620 = vmatpush3.bf16.msra.mxu1 %v6619_v24  ;;  %v6897_v50 = vpop.eup %6896 }
  0xd3   : > { %v1214_v35 = vmul.f32 %v1188_v34, %v988_v16  ;;  %6624 = vmatprep.subr.bf16.mxu1 %v9126_v48  ;;  %v1037_v34 = vrot.slane %v1036_v20, 1 }
  0xd4   : > { %6904 = vtanh.f32 %v1215_v32  ;;  %6254 = vmatmul.mubr.msk.f32.gmra.mrb[4].mxu0 %vm922_vm2, %v7480_v45  ;;  %v1008_v45 = vadd.f32 %v1007_v37, %v1006_v5  ;;  %v1060_v37 = vrot.slane %v1059_v13, 4 }
  0xd5   : > { %6906 = vtanh.f32 %v1214_v35  ;;  %6241 = vmatmul.mubr.msk.f32.gmra.mrb[2].mxu1 %vm922_vm2, %v7457_v36  ;;  %v1089_v51 = vpop.xlane.xlu1 %1088  ;;  %6256 = vmatprep.mubr.msk.f32.mxu0 %vm7222_vm3, %v9124_v53  ;;  %v1027_v36 = vadd.f32 %v1026_v49, %v1025_v31  ;;  %v752_v31 = vld [vmem:[%s7685_s5 + $0x60] sm:$0xff]  ;;  %v754_v49 = vld [vmem:[%s7685_s5 + $0x70] sm:$0xff] }
  0xd6   : > { %v1086_v52 = vpop.xlane.xlu0 %1085  ;;  %v6899_v4 = vpop.eup %6898  ;;  %v1237_v43 = vmul.f32 %v1089_v51, %v7734_v40  ;;  %6243 = vmatprep.mubr.msk.f32.mxu1 %vm7222_vm3, %v9124_v53  ;;  %6908 = vtanh.f32 %v1217_v46  ;;  %v1009_v29 = vrot.slane %v1008_v45, 1  ;;  %v755_v46 = vld [vmem:[%s7685_s5 + $0x78] sm:$0xff]  ;;  %v7793_v51 = vadd.f32 %v1037_v34, %v1036_v20  ;;  %s7225_s5 = smov 120  }
  0xd7   : > { %v6901_v61 = vpop.eup %6900  ;;  %v1236_v9 = vmul.f32 %v1086_v52, %v7734_v40  ;;  %6910 = vtanh.f32 %v1216_v25 }
  0xd8   : > { %v6903_v12 = vpop.eup %6902  ;;  %6257 = vmatmul.mubr.msk.f32.gmra.mrb[6].mxu0 %vm922_vm2, %v7477_v44  ;;  %v6622_v16 = vpack.c.bf16 %v6899_v4, %v6901_v61  ;;  %v1043_v44 = vadd.f32 %v1042_v60, %v1041_v39  ;;  %6912 = vtanh.f32 %v1237_v43  ;;  %v1052_v39 = vadd.f32 %v1051_v21, %v1050_v33  ;;  %v7796_v60 = vld [vmem:[%s7780_s19] sm:$0xff] }
  0xd9   : > { %6244 = vmatmul.mubr.msk.f32.gmra.mrb[4].mxu1 %vm922_vm2, %v7470_v41  ;;  %v1095_v5 = vpop.xlane.xlu1 %1094  ;;  %6276 = vmatprep.mubr.msk.f32.mxu0 %vm7222_vm3, %v9124_v53  ;;  %6914 = vtanh.f32 %v1236_v9  ;;  %v1028_v41 = vrot.slane %v1027_v36, 1  ;;  %v6625_v30 = vpack.c.bf16 %v6897_v50, %v6903_v12 }
  0xda   : > { %v7755_v57 = vpop.xlane.xlu0 %1091  ;;  %6623 = vmatpush3.bf16.msra.mxu0 %v6622_v16  ;;  %6263 = vmatprep.mubr.msk.f32.mxu1 %vm7222_vm3, %v9124_v53  ;;  %v1044_v38 = vrot.slane %v1043_v44, 2  ;;  %v1053_v56 = vrot.slane %v1052_v39, 2  ;;  %v904_v16 = vsel %vm892_vm6, %v7796_v60, 0.0 }
  0xdb   : > { %6627 = vmatprep.subr.bf16.mxu0 %v9126_v48  ;;  %v7784_v35 = vadd.f32 %v1028_v41, %v1027_v36  ;;  %v1061_v36 = vadd.f32 %v1060_v37, %v1059_v13  ;;  %v1238_v41 = vmul.f32 %v7755_v57, %v7734_v40  ;;  %v906_v57 = vadd.f32 %v905_v8, %v904_v16 }
  0xdc   : > { %v1045_v52 = vadd.f32 %v1044_v38, %v1043_v44  ;;  %v1054_v44 = vadd.f32 %v1053_v56, %v1052_v39 }
  0xdd   : > { %6264 = vmatmul.mubr.msk.f32.vlgmr.msra.gmra.mrb[6].mxu1 %vm922_vm2, %v7500_v55  ;;  %6277 = vmatmul.mubr.msk.f32.vlgmr.msra.gmra.mrb[8].mxu0 %vm922_vm2, %v7510_v59  ;;  %v7769_v24 = vpop.xlane.xlu1 %1100  ;;  %v1010_v55 = vadd.f32 %v1009_v29, %v1008_v45  ;;  %v1066_v59 = vsel %vm1011_vm0, %v752_v31, 0.0  ;;  %v1239_v9 = vmul.f32 %v1095_v5, %v7784_v35  ;;  %v1062_v34 = vrot.slane %v1061_v36, 2 }
  0xde   : > { %v7771_v27 = vpop.xlane.xlu0 %1097  ;;  %v6905_v42 = vpop.eup %6904  ;;  %6266 = vmatprep.mubr.msk.f32.mxu1 %vm7222_vm3, %v9124_v53  ;;  %6279 = vmatprep.mubr.msk.f32.mxu0 %vm7222_vm3, %v9124_v53  ;;  %v1068_v1 = vadd.f32 %v1067_v47, %v1066_v59  ;;  %v1046_v13 = vrot.slane %v1045_v52, 1  ;;  %v1055_v59 = vrot.slane %v1054_v44, 1 }
  0xdf   : > { %v6907_v32 = vpop.eup %6906  ;;  %6626 = vmatpush3.bf16.msra.mxu1 %v6625_v30  ;;  %v1240_v31 = vmul.f32 %v7771_v27, %v7784_v35 }
  0xe0   : > { %v6628_v33 = vpack.c.bf16 %v6905_v42, %v6907_v32  ;;  %6630 = vmatprep.subr.bf16.mxu1 %v9126_v48  ;;  %v6909_v4 = vpop.eup %6908  ;;  %v1069_v21 = vrot.slane %v1068_v1, 4 }
  0xe1   : > { %6267 = vmatmul.mubr.msk.f32.gmra.mrb[8].mxu1 %vm922_vm2, %v7497_v54  ;;  %6280 = vmatmul.mubr.msk.f32.gmra.mrb[10].mxu0 %vm922_vm2, %v7507_v58  ;;  %v1203_v50 = vpop.xlane.xlu1 %1202  ;;  %v1075_v54 = vsel %vm1011_vm0, %v754_v49, 0.0  ;;  %v1076_v58 = vsel %vm1011_vm0, %v755_v46, 0.0  ;;  %v6911_v61 = vpop.eup %6910 }
  0xe2   : > { %v1200_v25 = vpop.xlane.xlu0 %1199  ;;  %v1219_v43 = vmul.f32 %v1203_v50, %v1010_v55  ;;  %6269 = vmatprep.mubr.msk.f32.mxu1 %vm7222_vm3, %v9124_v53  ;;  %6282 = vmatprep.mubr.msk.f32.mxu0 %vm7222_vm3, %v9124_v53  ;;  %v6913_v12 = vpop.eup %6912  ;;  %v1077_v29 = vadd.f32 %v1076_v58, %v1075_v54  ;;  %v6631_v28 = vpack.c.bf16 %v6909_v4, %v6911_v61 }
  0xe3   : > { %v1218_v45 = vmul.f32 %v1200_v25, %v1010_v55  ;;  %6629 = vmatpush3.bf16.msra.mxu0 %v6628_v33  ;;  %v6915_v17 = vpop.eup %6914  ;;  %v1070_v55 = vadd.f32 %v1069_v21, %v1068_v1  ;;  %v1241_v50 = vmul.f32 %v7769_v24, %v7784_v35 }
  0xe4   : > { %6916 = vtanh.f32 %v1219_v43  ;;  %6633 = vmatprep.subr.bf16.mxu0 %v9126_v48  ;;  %v7830_v40 = vpack.c.bf16 %v6913_v12, %v6915_v17  ;;  %v1078_v27 = vrot.slane %v1077_v29, 4 }
  0xe5   : > { %6918 = vtanh.f32 %v1218_v45  ;;  %6270 = vmatmul.mubr.msk.f32.gmra.mrb[10].mxu1 %vm922_vm2, %v7520_v63  ;;  %6283 = vmatmul.mubr.msk.f32.gmra.mrb[12].mxu0 %vm922_vm2, %v7517_v62  ;;  %v1107_v5 = vpop.xlane.xlu1 %1106  ;;  %v7826_v62 = vld [vmem:[%s7780_s19 + $0x10] sm:$0xff]  ;;  %v1071_v49 = vrot.slane %v1070_v55, 2 }
  0xe6   : > { %v1104_v20 = vpop.xlane.xlu0 %1103  ;;  %6289 = vmatprep.mubr.msk.f32.mxu1 %vm7222_vm3, %v9124_v53  ;;  %6302 = vmatprep.mubr.msk.f32.mxu0 %vm7222_vm3, %v9124_v53  ;;  %v1243_v30 = vmul.f32 %v1107_v5, %v7793_v51  ;;  %6920 = vtanh.f32 %v1239_v9  ;;  %v907_v42 = vsel %vm892_vm6, %v7826_v62, 0.0  ;;  %v1079_v46 = vadd.f32 %v1078_v27, %v1077_v29 }
  0xe7   : > { %v1242_v63 = vmul.f32 %v1104_v20, %v7793_v51  ;;  %v908_v47 = vadd.f32 %v907_v42, %v906_v57  ;;  %v1072_v45 = vadd.f32 %v1071_v49, %v1070_v55  ;;  %v7076_v55 = vld [vmem:[%s7405_s29] sm:$0xff] }
  0xe8   : > { %6922 = vtanh.f32 %v1243_v30  ;;  %v1080_v54 = vrot.slane %v1079_v46, 2 }
  0xe9   : > { %6290 = vmatmul.mubr.msk.f32.vlgmr.msra.gmra.mrb[12].mxu1 %vm922_vm2, %v7530_v3  ;;  %6303 = vmatmul.mubr.msk.f32.vlgmr.msra.gmra.mrb[14].mxu0 %vm922_vm2, %v7540_v7  ;;  %6924 = vtanh.f32 %v1242_v63  ;;  %v1116_v38 = vpop.xlane.xlu1 %1115  ;;  %v1047_v3 = vadd.f32 %v1046_v13, %v1045_v52  ;;  %v1063_v7 = vadd.f32 %v1062_v34, %v1061_v36  ;;  %v909_v4 = vrot.slane %v908_v47, 4 }
  0xea   : > { %v1113_v39 = vpop.xlane.xlu0 %1112  ;;  %6926 = vtanh.f32 %v1238_v41  ;;  %6292 = vmatprep.mubr.msk.f32.mxu1 %vm7222_vm3, %v9124_v53  ;;  %6305 = vmatprep.mubr.msk.f32.mxu0 %vm7222_vm3, %v9124_v53  ;;  %v1081_v20 = vadd.f32 %v1080_v54, %v1079_v46  ;;  %v1073_v21 = vrot.slane %v1072_v45, 1 }
  0xeb   : > { %6928 = vtanh.f32 %v1240_v31  ;;  %6632 = vmatpush3.bf16.msra.mxu1 %v6631_v28  ;;  %v1246_v56 = vmul.f32 %v1116_v38, %v1047_v3  ;;  %v910_v12 = vadd.f32 %v909_v4, %v908_v47  ;;  %v7077_v47 = vld [vmem:[%s7405_s29 + $0x20] sm:$0xff] }
  0xec   : > { %6637 = vmatprep.subr.bf16.mxu1 %v7830_v40  ;;  %v1082_v13 = vrot.slane %v1081_v20, 1  ;;  %v1074_v28 = vadd.f32 %v1073_v21, %v1072_v45 }
  0xed   : > { %6293 = vmatmul.mubr.msk.f32.gmra.mrb[14].mxu1 %vm922_vm2, %v7527_v2  ;;  %6306 = vmatmul.mubr.msk.f32.gmra.mrb[16].mxu0 %vm922_vm2, %v7537_v6  ;;  %v1119_v32 = vpop.xlane.xlu1 %1118  ;;  %v1056_v2 = vadd.f32 %v1055_v59, %v1054_v44  ;;  %v1064_v6 = vrot.slane %v1063_v7, 1 }
  0xee   : > { %v1110_v37 = vpop.xlane.xlu0 %1109  ;;  %v6917_v33 = vpop.eup %6916  ;;  %6295 = vmatprep.mubr.msk.f32.mxu1 %vm7222_vm3, %v9124_v53  ;;  %6308 = vmatprep.mubr.msk.f32.mxu0 %vm7222_vm3, %v9124_v53  ;;  %v1247_v44 = vmul.f32 %v1119_v32, %v1047_v3 }
  0xef   : > { %v1244_v25 = vmul.f32 %v1110_v37, %v7793_v51  ;;  %v6919_v52 = vpop.eup %6918  ;;  %v1245_v51 = vmul.f32 %v1113_v39, %v1047_v3  ;;  %v1083_v39 = vadd.f32 %v1082_v13, %v1081_v20  ;;  %v7078_v37 = vld [vmem:[%s7405_s29 + $0x8] sm:$0xff] }
  0xf0   : > { %v6634_v1 = vpack.c.bf16 %v6917_v33, %v6919_v52  ;;  %v6921_v43 = vpop.eup %6920  ;;  %v7079_v33 = vld [vmem:[%s7405_s29 + $0x28] sm:$0xff] }
  0xf1   : > { %6296 = vmatmul.mubr.msk.f32.gmra.mrb[16].mxu1 %vm922_vm2, %v7550_v11  ;;  %6309 = vmatmul.mubr.msk.f32.gmra.mrb[18].mxu0 %vm922_vm2, %v7547_v10  ;;  %6930 = vtanh.f32 %v1244_v25  ;;  %v1125_v24 = vpop.xlane.xlu1 %1124  ;;  %v1065_v10 = vadd.f32 %v1064_v6, %v1063_v7  ;;  %v7084_v20 = vld [vmem:[%s7405_s29 + $0x48] sm:$0xff] }
  0xf2   : > { %v1122_v35 = vpop.xlane.xlu0 %1121  ;;  %v6923_v58 = vpop.eup %6922  ;;  %6932 = vtanh.f32 %v1241_v50  ;;  %6635 = vmatpush3.bf16.msra.mxu0 %v6634_v1  ;;  %6315 = vmatprep.mubr.msk.f32.mxu1 %vm7222_vm3, %v9124_v53  ;;  %v1249_v61 = vmul.f32 %v1125_v24, %v1056_v2  ;;  %v7081_v1 = vld [vmem:[%s7405_s29 + $0x40] sm:$0xff] }
  0xf3   : > { %v1248_v9 = vmul.f32 %v1122_v35, %v1056_v2  ;;  %v6925_v36 = vpop.eup %6924  ;;  %6328 = vmatprep.mubr.msk.f32.mxu0 %vm7222_vm3, %v9124_v53  ;;  %6934 = vtanh.f32 %v1246_v56 }
  0xf4   : > { %v6927_v11 = vpop.eup %6926  ;;  %6936 = vtanh.f32 %v1249_v61  ;;  %v6644_v16 = vpack.c.bf16 %v6923_v58, %v6925_v36  ;;  %v7082_v61 = vld [vmem:[%s7405_s29 + $0x18] sm:$0xff]  ;;  %v7083_v36 = vld [vmem:[%s7405_s29 + $0x30] sm:$0xff] }
  0xf5   : > { %v6929_v8 = vpop.eup %6928  ;;  %6316 = vmatmul.mubr.msk.f32.vlgmr.msra.gmra.mrb[18].mxu1 %vm922_vm2, %v7560_v15  ;;  %6329 = vmatmul.mubr.msk.f32.vlgmr.msra.gmra.mrb[20].mxu0 %vm922_vm2, %v7570_v19  ;;  %6938 = vtanh.f32 %v1248_v9  ;;  %v1134_v17 = vpop.xlane.xlu1 %1133  ;;  %v911_v19 = vrot.slane %v910_v12, 2 }
  0xf6   : > { %v1131_v5 = vpop.xlane.xlu0 %1130  ;;  %6318 = vmatprep.mubr.msk.f32.mxu1 %vm7222_vm3, %v9124_v53  ;;  %6331 = vmatprep.mubr.msk.f32.mxu0 %vm7222_vm3, %v9124_v53  ;;  %6940 = vtanh.f32 %v1245_v51  ;;  %v1252_v29 = vmul.f32 %v1134_v17, %v1065_v10  ;;  %v6640_v15 = vpack.c.bf16 %v6929_v8, %v6921_v43  ;;  %v5929_v51 = vld [vmem:[%s9105_s9] ss:$0 sm:$0xff] }
  0xf7   : > { %6639 = vmatpush3.bf16.msra.mxu1 %v7830_v40  ;;  %6645 = vmatprep.subr.bf16.mxu0 %v6644_v16  ;;  %v1251_v41 = vmul.f32 %v1131_v5, %v1065_v10  ;;  %6942 = vtanh.f32 %v1247_v44  ;;  %v912_v40 = vadd.f32 %v911_v19, %v910_v12  ;;  %v7085_v19 = vld [vmem:[%s7405_s29 + $0x60] sm:$0xff] }
  0xf8   : > { %6341 = vmatprep.subr.mxu1 %v6927_v11  ;;  %6647 = vmatpush3.bf16.msra.mxu0 %v6644_v16  ;;  %6944 = vtanh.f32 %v1252_v29 }
  0xf9   : > { %6319 = vmatmul.mubr.msk.f32.gmra.mrb[20].mxu1 %vm922_vm2, %v7557_v14  ;;  %6332 = vmatmul.mubr.msk.f32.gmra.mrb[22].mxu0 %vm922_vm2, %v7567_v18  ;;  %v1137_v30 = vpop.xlane.xlu1 %1136  ;;  %6946 = vtanh.f32 %v1251_v41 }
  0xfa   : > { %v1128_v63 = vpop.xlane.xlu0 %1127  ;;  %6321 = vmatprep.mubr.msk.f32.mxu1 %vm7222_vm3, %v9124_v53  ;;  %6334 = vmatprep.mubr.msk.f32.mxu0 %vm7222_vm3, %v9124_v53  ;;  %v1253_v27 = vmul.f32 %v1137_v30, %v1065_v10 }
  0xfb   : > { %v1250_v31 = vmul.f32 %v1128_v63, %v1056_v2  ;;  %v6931_v34 = vpop.eup %6930  ;;  %6342 = vmatpush3.msra.mxu1 %v6927_v11  ;;  %v7080_v2 = vld [vmem:[%s7405_s29 + $0x10] sm:$0xff]  ;;  %v7086_v63 = vld [vmem:[%s7405_s29 + $0x38] sm:$0xff] }
  0xfc   : > { %v6933_v14 = vpop.eup %6932  ;;  %6641 = vmatprep.subr.bf16.mxu1 %v6640_v15  ;;  %6359 = vmatprep.subr.mxu0 %v6931_v34 }
  0xfd   : > { %v6935_v18 = vpop.eup %6934  ;;  %6322 = vmatmul.mubr.msk.f32.gmra.mrb[22].mxu1 %vm922_vm2, %v7580_v23  ;;  %6335 = vmatmul.mubr.msk.f32.gmra.mrb[24].mxu0 %vm922_vm2, %v7577_v22  ;;  %6948 = vtanh.f32 %v1250_v31  ;;  %v1143_v57 = vpop.xlane.xlu1 %1142  ;;  %v913_v23 = vrot.slane %v912_v40, 1 }
  0xfe   : > { %v1140_v38 = vpop.xlane.xlu0 %1139  ;;  %v6937_v42 = vpop.eup %6936  ;;  %6343 = vmatprep.mubr.msk.f32.mxu1 %vm1011_vm0, %v7076_v55  ;;  %v1255_v59 = vmul.f32 %v1143_v57, %v1074_v28  ;;  %6360 = vmatpush3.msra.mxu0 %v6931_v34  ;;  %v7088_v55 = vld [vmem:[%s7405_s29 + $0x58] sm:$0xff] }
  0xff   : > { %v1254_v3 = vmul.f32 %v1140_v38, %v1074_v28  ;;  %v6939_v7 = vpop.eup %6938  ;;  %6361 = vmatprep.mubr.msk.f32.mxu0 %vm1011_vm0, %v7077_v47  ;;  %v914_v6 = vadd.f32 %v913_v23, %v912_v40  ;;  %v7090_v47 = vld [vmem:[%s7405_s29 + $0x68] sm:$0xff]  ;;  %v7091_v23 = vld [vmem:[%s7405_s29 + $0x78] sm:$0xff] }
 0x100   : > { %v6941_v22 = vpop.eup %6940  ;;  %6950 = vtanh.f32 %v1255_v59  ;;  %v6652_v32 = vpack.c.bf16 %v6937_v42, %v6939_v7  ;;  %v7089_v59 = vld [vmem:[%s7405_s29 + $0x70] sm:$0xff] }
 0x101   : > { %6344 = vmatmul.mubr.msk.f32.vlgmr.msra.gmra.mrb[24].mxu1 %vm1011_vm0, %v7078_v37  ;;  %6952 = vtanh.f32 %v1254_v3  ;;  %v1152_v49 = vpop.xlane.xlu1 %1151  ;;  %6362 = vmatmul.mubr.msk.f32.vlgmr.msra.gmra.mrb[26].mxu0 %vm1011_vm0, %v7079_v33  ;;  %v6648_v52 = vpack.c.bf16 %v6935_v18, %v6941_v22  ;;  %v6943_v56 = vpop.eup %6942  ;;  %v916_v9 = vmul.f32 0.041666668, %v914_v6 }
 0x102   : > { %v1149_v46 = vpop.xlane.xlu0 %1148  ;;  %6643 = vmatpush3.bf16.msra.mxu1 %v6640_v15  ;;  %6954 = vtanh.f32 %v1253_v27  ;;  %v1258_v50 = vmul.f32 %v1152_v49, %v1083_v39  ;;  %6352 = vmatprep.mubr.msk.f32.mxu1 %vm1011_vm0, %v7080_v2  ;;  %v6945_v4 = vpop.eup %6944 }
 0x103   : > { %v1257_v25 = vmul.f32 %v1149_v46, %v1083_v39  ;;  %6350 = vmatprep.subr.mxu1 %v6933_v14  ;;  %6653 = vmatprep.subr.bf16.mxu0 %v6652_v32  ;;  %v6947_v35 = vpop.eup %6946 }
 0x104   : > { %6956 = vtanh.f32 %v1258_v50  ;;  %6655 = vmatpush3.bf16.msra.mxu0 %v6652_v32  ;;  %6379 = vmatprep.mubr.msk.f32.mxu0 %vm1011_vm0, %v7081_v1  ;;  %v6656_v11 = vpack.c.bf16 %v6945_v4, %v6947_v35 }
 0x105   : > { %6958 = vtanh.f32 %v1257_v25  ;;  %v1155_v43 = vpop.xlane.xlu1 %1154 }
 0x106   : > { %v1146_v24 = vpop.xlane.xlu0 %1145  ;;  %6351 = vmatpush3.msra.mxu1 %v6933_v14  ;;  %v1259_v45 = vmul.f32 %v1155_v43, %v1083_v39  ;;  %v6232_v10 = vpop.f32.mrb[0].mxu0 }
 0x107   : > { %v1256_v54 = vmul.f32 %v1146_v24, %v1074_v28  ;;  %v6949_v58 = vpop.eup %6948  ;;  %6353 = vmatmul.mubr.msk.f32.vlgmr.msra.gmra.mrb[26].mxu1 %vm1011_vm0, %v7082_v61  ;;  %6649 = vmatprep.subr.bf16.mxu1 %v6648_v52  ;;  %v889_v16 = vadd.f32 %v6232_v10, %v5929_v51  ;;  %v883_v8 = vpop.f32.mrb[1].mxu0  ;;  %v7087_v28 = vld [vmem:[%s7405_s29 + $0x50] sm:$0xff]  ;;  %s7228_s29 = smov 88  }
 0x108   : > { %6651 = vmatpush3.bf16.msra.mxu1 %v6648_v52  ;;  %6960 = vtanh.f32 %v1259_v45  ;;  %6370 = vmatprep.mubr.msk.f32.mxu1 %vm1011_vm0, %v7083_v36  ;;  %v884_v5 = vadd.f32 %v5929_v51, %v883_v8 }
 0x109   : > { %6368 = vmatprep.subr.mxu1 %v6943_v56  ;;  %6962 = vtanh.f32 %v1256_v54  ;;  %6377 = vmatprep.subr.mxu0 %v6949_v58  ;;  %v894_v21 = vsel %vm892_vm6, %v889_v16, 0.0  ;;  %v921_v29 = vmul.f32 %v916_v9, %v889_v16 }
 0x10a   : > { %v6951_v12 = vpop.eup %6950  ;;  %6378 = vmatpush3.msra.mxu0 %v6949_v58  ;;  %v893_v41 = vsel %vm892_vm6, %v884_v5, 0.0  ;;  %v920_v30 = vmul.f32 %v916_v9, %v884_v5 }
 0x10b   : > { %v6953_v17 = vpop.eup %6952  ;;  %6380 = vmatmul.mubr.msk.f32.vlgmr.msra.gmra.mrb[28].mxu0 %vm1011_vm0, %v7084_v20  ;;  %v895_v31 = vadd.f32 %v894_v21, %v893_v41 }
 0x10c   : > { %v6955_v44 = vpop.eup %6954  ;;  %6369 = vmatpush3.msra.mxu1 %v6943_v56  ;;  %v6660_v15 = vpack.c.bf16 %v6951_v12, %v6953_v17  ;;  %6397 = vmatprep.mubr.msk.f32.mxu0 %vm1011_vm0, %v7085_v19  ;;  %v7912_v14 = vpack.i.bf16 %v921_v29, %v920_v30  ;;  %v6673_v57 = vpack.c.bf16 %v921_v29, %v920_v30 }
 0x10d   : > { %6657 = vmatprep.subr.bf16.mxu1 %v6656_v11  ;;  %6371 = vmatmul.mubr.msk.f32.vlgmr.msra.gmra.mrb[28].mxu1 %vm1011_vm0, %v7086_v63  ;;  %v896_v40 = vrot.slane %v895_v31, 4 }
 0x10e   : > { %v6957_v13 = vpop.eup %6956  ;;  %6659 = vmatpush3.bf16.msra.mxu1 %v6656_v11  ;;  %6388 = vmatprep.mubr.msk.f32.mxu1 %vm1011_vm0, %v7087_v28  ;;  %9158 = vst [vmem:[#allocation15_spill] sm:$0xff] %v7912_v14  ;;  %v7976_v24 = vpop.permute.xlu0 %2965 }
 0x10f   : > { %v6959_v34 = vpop.eup %6958  ;;  %6386 = vmatprep.subr.mxu1 %v6955_v44  ;;  %6661 = vmatprep.subr.bf16.mxu0 %v6660_v15  ;;  %v897_v39 = vadd.f32 %v896_v40, %v895_v31 }
 0x110   : > { %v6664_v18 = vpack.c.bf16 %v6957_v13, %v6959_v34  ;;  %6663 = vmatpush3.bf16.msra.mxu0 %v6660_v15  ;;  %6815 = vrot.lane.b32.xlu1 %v7912_v14, %s7225_s5 }
 0x111   : > { %v898_v27 = vrot.slane %v897_v39, 2 }
 0x112   : > { %v6961_v38 = vpop.eup %6960  ;;  %6387 = vmatpush3.msra.mxu1 %v6955_v44  ;;  %v7980_v45 = vpop.permute.xlu0 %3073 }
 0x113   : > { %v6963_v42 = vpop.eup %6962  ;;  %6665 = vmatprep.subr.bf16.mxu1 %v6664_v18  ;;  %6389 = vmatmul.mubr.msk.f32.vlgmr.msra.gmra.mrb[30].mxu1 %vm1011_vm0, %v7088_v55  ;;  %v899_v3 = vadd.f32 %v898_v27, %v897_v39 }
 0x114   : > { %6667 = vmatpush3.bf16.msra.mxu1 %v6664_v18  ;;  %6406 = vmatprep.mubr.msk.f32.mxu1 %vm1011_vm0, %v7089_v59 }
 0x115   : > { %6820 = vrot.lane.b32.xlu1 %v7912_v14, %s7226_s16  ;;  %6404 = vmatprep.subr.mxu1 %v6961_v38  ;;  %v900_v7 = vrot.slane %v899_v3, 1 }
 0x116   : > { %6395 = vmatprep.subr.mxu0 %v6963_v42  ;;  %v7984_v58 = vpop.permute.xlu0 %2981 }
 0x117   : > { %6396 = vmatpush3.msra.mxu0 %v6963_v42  ;;  %v901_v22 = vadd.f32 %v900_v7, %v899_v3 }
 0x118   : > { %6405 = vmatpush3.msra.mxu1 %v6961_v38  ;;  %6398 = vmatmul.mubr.msk.f32.vlgmr.msra.gmra.mrb[30].mxu0 %vm1011_vm0, %v7090_v47 }
 0x119   : > { %6825 = vrot.lane.b32.xlu1 %v7912_v14, %s7227_s24  ;;  %6672 = vmatprep.subr.bf16.mxu1 %v9126_v48  ;;  %v903_v32 = vmul.f32 0.0625, %v901_v22 }
 0x11a   : > { %6407 = vmatmul.mubr.msk.f32.vlgmr.msra.gmra.mrb[32].mxu1 %vm1011_vm0, %v7091_v23  ;;  %v7988_v61 = vpop.permute.xlu0 %3081 }
 0x11b   : > { %6674 = vmatpush3.bf16.msra.mxu1 %v6673_v57  ;;  %6422 = vmatprep.mubr.msk.f32.mxu1 %vm7222_vm3, %v9124_v53  ;;  %v917_v37 = vmul.f32 %v903_v32, %v7796_v60  ;;  %v918_v49 = vmul.f32 %v903_v32, %v7799_v0  ;;  %v7933_v46 = vmul.f32 %v903_v32, %v7826_v62  ;;  %v7954_v60 = vpop.permute.xlu1 %2969 }
 0x11d   : > { %v7935_v33 = vpack.i.bf16 %v918_v49, %v917_v37  ;;  %4040 = vrot.lane.b32.xlu0 %v7933_v46, %s7225_s5  ;;  %v6668_v50 = vpack.c.bf16 %v918_v49, %v917_v37 }
 0x11e   : > { %v7992_v36 = vpop.permute.xlu0 %2993 }
 0x11f   : > { %6830 = vrot.lane.b32.xlu1 %v7935_v33, %s7225_s5  ;;  %6669 = vmatprep.subr.bf16.mxu0 %v6668_v50  ;;  %v7956_v0 = vpop.permute.xlu1 %3061  ;;  %s7237_s5 = smov 48  }
 0x120   : > { %6671 = vmatpush3.bf16.msra.mxu0 %v6668_v50 }
 0x121   : > { %6835 = vrot.lane.b32.xlu0 %v7935_v33, %s7226_s16  ;;  %6413 = vmatprep.subr.mxu0 %v7933_v46 }
 0x123   : > { %6840 = vrot.lane.b32.xlu1 %v7935_v33, %s7227_s24  ;;  %v7958_v62 = vpop.permute.xlu1 %3065 }
 0x124   : > { %6414 = vmatpush3.msra.mxu0 %v7933_v46 }
 0x125   : > { %4227 = vrot.lane.b32.xlu0 %v7933_v46, %s7226_s16  ;;  %s7238_s16 = smov 56  }
 0x127   : > { %6850 = vrot.lane.b32.xlu1 %v7935_v33, %s7228_s29  ;;  %v7960_v25 = vpop.permute.xlu1 %3368 }
 0x128   : > { %vm3373_vm9 = vcmp.eq.s32.totalorder %v7960_v25, 1 }
 0x129   : > { %4412 = vrot.lane.b32.xlu0 %v7933_v46, %s7227_s24  ;;  %s8570_s24 = scalar_lea.vmem %s9113_s17, %s7442_s23  ;;  %s9136_s23 = smov 8  }
 0x12b   : > { %6855 = vrot.lane.b32.xlu1 %v7912_v14, %s7229_s4  ;;  %v7962_v2 = vpop.permute.xlu1 %3371 }
 0x12c   : > { %vm3374_vm10 = vcmp.eq.s32.totalorder %v7962_v2, 1 }
 0x12d   : > { %6845 = vrot.lane.b32.xlu0 %v7935_v33, %s7229_s4 }
 0x12f   : > { %v7964_v52 = vpop.permute.xlu1 %2973 }
 0x131   : > { %4597 = vrot.lane.b32.xlu0 %v7933_v46, %s7229_s4  ;;  %s7234_s4 = smov 24  }
 0x133   : > { %v7966_v56 = vpop.permute.xlu1 %2977 }
 0x137   : > { %v7968_v6 = vpop.permute.xlu1 %3069 }
 0x13b   : > { %v7970_v1 = vpop.permute.xlu1 %2985 }
 0x13f   : > { %v7972_v4 = vpop.permute.xlu1 %3077 }
 0x143   : > { %v7974_v43 = vpop.permute.xlu1 %2989 }
 0x147   : > { %v7978_v35 = vpop.permute.xlu1 %3085 }
 0x14b   : > { %v7982_v54 = vpop.permute.xlu1 %3089 }
 0x182   : > { %v7986_v51 = vpop.permute.xlu1 %6815 }
 0x187   : > { %v7990_v9 = vpop.permute.xlu1 %6820 }
 0x18b   : > { %v7994_v10 = vpop.permute.xlu1 %6825 }
 0x18c   : > { %9159 = vst [vmem:[#allocation16_spill] sm:$0xff] %v7994_v10 }
 0x18f   : > { %v7996_v11 = vpop.permute.xlu0 %4040 }
 0x191   : > { %v6831_v12 = vpop.permute.xlu1 %6830 }
 0x192   : > { %v6833_v16 = vunpack.i.h.bf16 %v6831_v12  ;;  %v6832_v8 = vunpack.i.l.bf16 %v6831_v12 }
 0x193   : > { %v6836_v17 = vpop.permute.xlu0 %6835 }
 0x194   : > { %v6838_v5 = vunpack.i.h.bf16 %v6836_v17  ;;  %v6837_v20 = vunpack.i.l.bf16 %v6836_v17  ;;  %v7998_v44 = vpack.c.bf16 %v6833_v16, %v6832_v8 }
 0x196   : > { %6676 = vmatprep.subr.bf16.mxu0 %v7998_v44  ;;  %v8001_v21 = vpack.c.bf16 %v6838_v5, %v6837_v20 }
 0x198   : > { %6683 = vmatprep.subr.bf16.mxu1 %v8001_v21 }
 0x1a3   : > { %v1448_v29 = vpop.f32.mrb[2].mxu0 }
 0x1a4   : > { %v1359_v15 = vpop.f32.mrb[0].mxu1  ;;  %v6252_v19 = vpop.f32.mrb[3].mxu0  ;;  %2676 = vxpose.xlu0.b32.start [1/3] (short) (narrow) %v1448_v29, 16 }
 0x1a5   : > { %2644 = vxpose.xlu1.b32.start [1/3] (short) (narrow) %v1359_v15, 16  ;;  %v6239_v41 = vpop.f32.mrb[1].mxu1 }
 0x1a7   : > { %v1453_v30 = vpop.f32.mrb[4].mxu0 }
 0x1a8   : > { %v1364_v63 = vpop.f32.mrb[2].mxu1  ;;  %v6255_v13 = vpop.f32.mrb[5].mxu0  ;;  %2677 = vxpose.xlu0.b32.cont [2/3] (short) (narrow) %v1453_v30, 16 }
 0x1a9   : > { %2645 = vxpose.xlu1.b32.cont [2/3] (short) (narrow) %v1364_v63, 16  ;;  %v6242_v31 = vpop.f32.mrb[3].mxu1 }
 0x1ab   : > { %v1458_v28 = vpop.f32.mrb[6].mxu0 }
 0x1ac   : > { %v1369_v34 = vpop.f32.mrb[4].mxu1  ;;  %v6258_v40 = vpop.f32.mrb[7].mxu0  ;;  %2678 = vxpose.xlu0.b32.end [3/3] (short) (narrow) %v1458_v28, 16 }
 0x1ad   : > { %2646 = vxpose.xlu1.b32.end [3/3] (short) (narrow) %v1369_v34, 16  ;;  %v6245_v18 = vpop.f32.mrb[5].mxu1 }
 0x1b0   : > { %v1537_v57 = vpop.f32.mrb[6].mxu1  ;;  %v1626_v38 = vpop.f32.mrb[8].mxu0 }
 0x1b1   : > { %2740 = vxpose.xlu0.b32.start [1/3] (short) (narrow) %v1626_v38, 16  ;;  %2708 = vxpose.xlu1.b32.start [1/3] (short) (narrow) %v1537_v57, 16  ;;  %v6265_v39 = vpop.f32.mrb[7].mxu1  ;;  %v6278_v42 = vpop.f32.mrb[9].mxu0 }
 0x1b4   : > { %v1542_v55 = vpop.f32.mrb[8].mxu1  ;;  %v1631_v27 = vpop.f32.mrb[10].mxu0 }
 0x1b5   : > { %2741 = vxpose.xlu0.b32.cont [2/3] (short) (narrow) %v1631_v27, 16  ;;  %2709 = vxpose.xlu1.b32.cont [2/3] (short) (narrow) %v1542_v55, 16  ;;  %v6268_v59 = vpop.f32.mrb[9].mxu1  ;;  %v6281_v3 = vpop.f32.mrb[11].mxu0 }
 0x1b8   : > { %v1547_v7 = vpop.f32.mrb[10].mxu1  ;;  %v1636_v47 = vpop.f32.mrb[12].mxu0 }
 0x1b9   : > { %2742 = vxpose.xlu0.b32.end [3/3] (short) (narrow) %v1636_v47, 16  ;;  %2710 = vxpose.xlu1.b32.end [3/3] (short) (narrow) %v1547_v7, 16  ;;  %v6271_v22 = vpop.f32.mrb[11].mxu1  ;;  %v6284_v23 = vpop.f32.mrb[13].mxu0 }
 0x1bc   : > { %v1715_v32 = vpop.f32.mrb[12].mxu1  ;;  %v1804_v37 = vpop.f32.mrb[14].mxu0 }
 0x1bd   : > { %2772 = vxpose.xlu0.b32.start [1/3] (short) (narrow) %v1715_v32, 16  ;;  %2804 = vxpose.xlu1.b32.start [1/3] (short) (narrow) %v1804_v37, 16  ;;  %v6291_v49 = vpop.f32.mrb[13].mxu1  ;;  %v6304_v50 = vpop.f32.mrb[15].mxu0 }
 0x1c0   : > { %v1720_v12 = vpop.f32.mrb[14].mxu1  ;;  %v1809_v16 = vpop.f32.mrb[16].mxu0 }
 0x1c1   : > { %2773 = vxpose.xlu0.b32.cont [2/3] (short) (narrow) %v1720_v12, 16  ;;  %2805 = vxpose.xlu1.b32.cont [2/3] (short) (narrow) %v1809_v16, 16  ;;  %v6294_v8 = vpop.f32.mrb[15].mxu1  ;;  %v6307_v17 = vpop.f32.mrb[17].mxu0 }
 0x1c2   : > { %v8026_v8 = vpop.permute.xlu0 %4227 }
 0x1c4   : > { %v1725_v5 = vpop.f32.mrb[16].mxu1  ;;  %v1814_v20 = vpop.f32.mrb[18].mxu0 }
 0x1c5   : > { %2774 = vxpose.xlu0.b32.end [3/3] (short) (narrow) %v1725_v5, 16  ;;  %2806 = vxpose.xlu1.b32.end [3/3] (short) (narrow) %v1814_v20, 16  ;;  %v6297_v29 = vpop.f32.mrb[17].mxu1  ;;  %v6310_v15 = vpop.f32.mrb[19].mxu0  ;;  %v3126_v20 = vlaneseq }
 0x1c6   : > { %v8028_v17 = vpop.permute.xlu0 %4412  ;;  %v8030_v5 = vpop.permute.xlu1 %6840 }
 0x1c7   : > { %9160 = vst [vmem:[#allocation17_spill] sm:$0xff] %v8028_v17  ;;  %v6843_v2 = vunpack.i.h.bf16 %v8030_v5 }
 0x1c8   : > { %v1893_v19 = vpop.f32.mrb[18].mxu1  ;;  %v1982_v41 = vpop.f32.mrb[20].mxu0 }
 0x1c9   : > { %2836 = vxpose.xlu0.b32.start [1/3] (short) (narrow) %v1893_v19, 16  ;;  %2868 = vxpose.xlu1.b32.start [1/3] (short) (narrow) %v1982_v41, 16  ;;  %v6317_v30 = vpop.f32.mrb[19].mxu1  ;;  %v6330_v63 = vpop.f32.mrb[21].mxu0  ;;  %v796_v19 = vld [vmem:[%s700_s20] sm:$0x1] }
 0x1ca   : > { %v8036_v29 = vpop.permute.xlu0 %6845  ;;  %v8038_v15 = vpop.permute.xlu1 %6850  ;;  %v3127_v41 = vshrl.u32 %v3126_v20, 7  ;;  %vm3124_vm7 = vcmp.gt.f32.partialorder %v796_v19, 0.5 }
 0x1cb   : > { %9161 = vst [vmem:[#allocation18_spill] sm:$0xff] %v8036_v29  ;;  %9162 = vst [vmem:[#allocation19_spill] sm:$0xff] %v8038_v15 }
 0x1cc   : > { %v1898_v13 = vpop.f32.mrb[20].mxu1  ;;  %v1987_v31 = vpop.f32.mrb[22].mxu0 }
 0x1cd   : > { %2837 = vxpose.xlu0.b32.cont [2/3] (short) (narrow) %v1898_v13, 16  ;;  %2869 = vxpose.xlu1.b32.cont [2/3] (short) (narrow) %v1987_v31, 16  ;;  %v6320_v28 = vpop.f32.mrb[21].mxu1  ;;  %v6333_v34 = vpop.f32.mrb[23].mxu0  ;;  %v3128_v13 = vsub.s32 0, %v3127_v41  ;;  %v3125_v31 = vsel %vm3124_vm7, 1, %v7224_v26 }
 0x1ce   : > { %v8040_v30 = vpop.permute.xlu0 %4597  ;;  %v8042_v63 = vpop.permute.xlu1 %6855 }
 0x1cf   : > { %9163 = vst [vmem:[#allocation20_spill] sm:$0xff] %v8040_v30  ;;  %9164 = vst [vmem:[#allocation21_spill] sm:$0xff] %v8042_v63 }
 0x1d0   : > { %v1903_v40 = vpop.f32.mrb[22].mxu1  ;;  %v1992_v18 = vpop.f32.mrb[24].mxu0 }
 0x1d1   : > { %2838 = vxpose.xlu0.b32.end [3/3] (short) (narrow) %v1903_v40, 16  ;;  %2870 = vxpose.xlu1.b32.end [3/3] (short) (narrow) %v1992_v18, 16  ;;  %v6336_v57 = vpop.f32.mrb[25].mxu0  ;;  %v6323_v38 = vpop.f32.mrb[23].mxu1  ;;  %v8045_v18 = vrot.slane %v3125_v31, %v3128_v13 }
 0x1d3   : > { %vm3130_vm8 = vcmp.eq.s32.totalorder %v8045_v18, 1 }
 0x1d4   : > { %v6345_v39 = vpop.f32.mrb[24].mxu1  ;;  %v8004_v42 = vpop.f32.mrb[26].mxu0 }
 0x1d5   : > { %v2068_v55 = vpop.f32.mrb[25].mxu1  ;;  %v8006_v27 = vpop.f32.mrb[27].mxu0 }
 0x1da   : > { %v6354_v59 = vpop.f32.mrb[26].mxu1 }
 0x1db   : > { %v2149_v3 = vpop.f32.mrb[27].mxu1 }
 0x1de   : > { %v8008_v7 = vpop.f32.mrb[28].mxu0 }
 0x1df   : > { %v8010_v47 = vpop.f32.mrb[29].mxu0 }
 0x1e0   : > { %v8012_v22 = vpop.f32.mrb[28].mxu1 }
 0x1e1   : > { %v2311_v23 = vpop.f32.mrb[29].mxu1 }
 0x1e6   : > { %v8014_v32 = vpop.f32.mrb[30].mxu1 }
 0x1e7   : > { %v8016_v37 = vpop.f32.mrb[31].mxu1 }
 0x1eb   : > { %v8018_v49 = vpop.f32.mrb[30].mxu0 }
 0x1ec   : > { %v8020_v50 = vpop.f32.mrb[31].mxu0 }
 0x1ed   : > { %v8022_v12 = vpop.f32.mrb[32].mxu1 }
 0x1ee   : > { %v8024_v16 = vpop.f32.mrb[33].mxu1 }
 0x224   : > { %v2692_v28 = vpop.trf.xlu0 }
 0x225   : > { %v2902_v34 = vmul.f32 %v2692_v28, %v2149_v3  ;;  %v2660_v40 = vpop.trf.xlu1 }
 0x226   : > { %v2900_v57 = vmul.f32 %v2660_v40, %v2068_v55 }
 0x227   : > { %v2998_v38 = vmul.f32 %v7954_v60, %v2902_v34 }
 0x228   : > { %v2996_v53 = vmul.f32 %v7976_v24, %v2900_v57  ;;  %v2693_v48 = vpop.trf.xlu0 }
 0x229   : > { %v2903_v20 = vmul.f32 %v6354_v59, %v2693_v48  ;;  %v2661_v19 = vpop.trf.xlu1  ;;  %v3094_v30 = vadd.f32 %v7958_v62, %v2998_v38 }
 0x22a   : > { %v2901_v41 = vmul.f32 %v6345_v39, %v2661_v19  ;;  %v3092_v26 = vadd.f32 %v7956_v0, %v2996_v53 }
 0x22b   : > { %v2999_v3 = vmul.f32 %v7954_v60, %v2903_v20  ;;  %v3110_v28 = vmul.f32 0.35355338, %v3094_v30 }
 0x22c   : > { %v2997_v55 = vmul.f32 %v7976_v24, %v2901_v41  ;;  %v3108_v13 = vmul.f32 0.35355338, %v3092_v26 }
 0x22d   : > { %v8057_v31 = vsel %vm3130_vm8, -1e+09, %v3110_v28  ;;  %v8061_v48 = vsel %vm3373_vm9, -1e+09, %v3110_v28  ;;  %v3095_v39 = vadd.f32 %v7958_v62, %v2999_v3 }
 0x22e   : > { %v3397_v53 = vsel %vm1011_vm0, %v8061_v48, -inf  ;;  %v8068_v60 = vsel %vm3373_vm9, -1e+09, %v3108_v13  ;;  %v8072_v24 = vsel %vm3130_vm8, -1e+09, %v3108_v13  ;;  %v3093_v30 = vadd.f32 %v7956_v0, %v2997_v55 }
 0x22f   : > { %3398 = vmax.xlane.f32.xlu1 %v3397_v53  ;;  %v3391_v59 = vsel %vm1011_vm0, %v8068_v60, -inf  ;;  %v3111_v34 = vmul.f32 0.35355338, %v3095_v39  ;;  %v3156_v20 = vsel %vm1011_vm0, %v8057_v31, -inf  ;;  %v3147_v26 = vsel %vm1011_vm0, %v8072_v24, -inf }
 0x230   : > { %3392 = vmax.xlane.f32.xlu0 %v3391_v59  ;;  %v3109_v57 = vmul.f32 0.35355338, %v3093_v30 }
 0x231   : > { %v2756_v62 = vpop.trf.xlu0  ;;  %v2724_v40 = vpop.trf.xlu1  ;;  %v8080_v38 = vsel %vm3130_vm8, -1e+09, %v3111_v34 }
 0x232   : > { %v2906_v19 = vmul.f32 %v2756_v62, %v2311_v23  ;;  %v2904_v41 = vmul.f32 %v2724_v40, %v8006_v27  ;;  %v3157_v0 = vsel %vm1011_vm0, %v8080_v38, -inf  ;;  %v8091_v3 = vsel %vm3374_vm10, -1e+09, %v3109_v57 }
 0x233   : > { %v8095_v28 = vsel %vm3130_vm8, -1e+09, %v3109_v57  ;;  %v3158_v55 = vmax.f32 %v3156_v20, %v3157_v0  ;;  %v3394_v27 = vsel %vm1011_vm0, %v8091_v3, -inf }
 0x234   : > { %v3002_v13 = vmul.f32 %v7966_v56, %v2906_v19  ;;  %v3000_v23 = vmul.f32 %v7964_v52, %v2904_v41  ;;  %v3148_v39 = vsel %vm1011_vm0, %v8095_v28, -inf  ;;  %3395 = vmax.xlane.f32.xlu0 %v3394_v27 }
 0x235   : > { %v3149_v53 = vmax.f32 %v3147_v26, %v3148_v39  ;;  %v2757_v59 = vpop.trf.xlu0  ;;  %v2725_v30 = vpop.trf.xlu1  ;;  %v3159_v62 = vrot.slane %v3158_v55, 4 }
 0x236   : > { %v2907_v40 = vmul.f32 %v8012_v22, %v2757_v59  ;;  %v2905_v57 = vmul.f32 %v8004_v42, %v2725_v30  ;;  %v3098_v20 = vadd.f32 %v7980_v45, %v3002_v13  ;;  %v3096_v19 = vadd.f32 %v7968_v6, %v3000_v23 }
 0x237   : > { %v3150_v41 = vrot.slane %v3149_v53, 4  ;;  %v3160_v0 = vmax.f32 %v3158_v55, %v3159_v62 }
 0x238   : > { %v3003_v63 = vmul.f32 %v7966_v56, %v2907_v40  ;;  %v3114_v15 = vmul.f32 0.35355338, %v3098_v20  ;;  %v8108_v10 = vmul.f32 0.35355338, %v3096_v19  ;;  %v3001_v26 = vmul.f32 %v7964_v52, %v2905_v57 }
 0x239   : > { %v3151_v27 = vmax.f32 %v3149_v53, %v3150_v41  ;;  %v3161_v39 = vrot.slane %v3160_v0, 2 }
 0x23a   : > { %v8113_v22 = vsel %vm3130_vm8, -1e+09, %v3114_v15  ;;  %v3099_v42 = vadd.f32 %v7980_v45, %v3003_v63  ;;  %v8119_v55 = vsel %vm3130_vm8, -1e+09, %v8108_v10  ;;  %v3097_v62 = vadd.f32 %v7968_v6, %v3001_v26 }
 0x23b   : > { %v3152_v13 = vrot.slane %v3151_v27, 2  ;;  %v3162_v59 = vmax.f32 %v3160_v0, %v3161_v39  ;;  %v3174_v19 = vsel %vm1011_vm0, %v8113_v22, -inf  ;;  %v8139_v6 = vsel %vm3374_vm10, -1e+09, %v3111_v34 }
 0x23c   : > { %v8121_v56 = vmul.f32 0.35355338, %v3099_v42  ;;  %v8143_v42 = vmul.f32 0.35355338, %v3097_v62 }
 0x23d   : > { %v3153_v23 = vmax.f32 %v3151_v27, %v3152_v13  ;;  %v2788_v53 = vpop.trf.xlu0  ;;  %v2820_v30 = vpop.trf.xlu1  ;;  %v3163_v52 = vrot.slane %v3162_v59, 1 }
 0x23e   : > { %v2908_v40 = vmul.f32 %v2788_v53, %v8010_v47  ;;  %v2910_v57 = vmul.f32 %v2820_v30, %v8016_v37  ;;  %v8129_v45 = vsel %vm3130_vm8, -1e+09, %v8121_v56 }
 0x23f   : > { %v3154_v63 = vrot.slane %v3153_v23, 1  ;;  %v3164_v20 = vmax.f32 %v3162_v59, %v3163_v52  ;;  %v3175_v41 = vsel %vm1011_vm0, %v8129_v45, -inf }
 0x240   : > { %6860 = vrot.lane.b32.xlu1 %v7912_v14, %s7228_s29  ;;  %v3176_v47 = vmax.f32 %v3174_v19, %v3175_v41  ;;  %v3004_v13 = vmul.f32 %v7984_v58, %v2908_v40  ;;  %v3006_v59 = vmul.f32 %v7970_v1, %v2910_v57 }
 0x241   : > { %v3155_v37 = vmax.f32 %v3153_v23, %v3154_v63  ;;  %v2789_v0 = vpop.trf.xlu0  ;;  %v2821_v27 = vpop.trf.xlu1  ;;  %v3221_v26 = vsub.f32 %v8057_v31, %v3164_v20  ;;  %v3222_v39 = vsub.f32 %v8080_v38, %v3164_v20  ;;  %v3165_v38 = vsel %vm1011_vm0, %v8119_v55, -inf }
 0x242   : > { %v2911_v53 = vmul.f32 %v8014_v32, %v2821_v27  ;;  %v3177_v30 = vrot.slane %v3176_v47, 4  ;;  %v2909_v19 = vmul.f32 %v8008_v7, %v2789_v0  ;;  %v8157_v32 = vsel %vm3130_vm8, -1e+09, %v8143_v42 }
 0x243   : > { %v3219_v34 = vsub.f32 %v8072_v24, %v3155_v37  ;;  %v3220_v52 = vsub.f32 %v8095_v28, %v3155_v37  ;;  %v3239_v23 = vmul.f32 1.442695, %v3221_v26  ;;  %v3241_v63 = vmul.f32 1.442695, %v3222_v39 }
 0x244   : > { %v3007_v31 = vmul.f32 %v7970_v1, %v2911_v53  ;;  %v3178_v62 = vmax.f32 %v3176_v47, %v3177_v30  ;;  %v3166_v28 = vsel %vm1011_vm0, %v8157_v32, -inf  ;;  %v3102_v7 = vadd.f32 %v7988_v61, %v3006_v59 }
 0x245   : > { %v3235_v40 = vmul.f32 1.442695, %v3219_v34  ;;  %v3237_v20 = vmul.f32 1.442695, %v3220_v52  ;;  %6964 = vpow2.f32 %v3239_v23  ;;  %v3167_v1 = vmax.f32 %v3165_v38, %v3166_v28 }
 0x246   : > { %6966 = vpow2.f32 %v3241_v63  ;;  %v3179_v24 = vrot.slane %v3178_v62, 2  ;;  %v3103_v57 = vadd.f32 %v7988_v61, %v3007_v31  ;;  %v3100_v41 = vadd.f32 %v7972_v4, %v3004_v13 }
 0x247   : > { %6968 = vpow2.f32 %v3235_v40  ;;  %v8166_v47 = vsel %vm3373_vm9, -1e+09, %v3114_v15  ;;  %v3118_v0 = vmul.f32 0.35355338, %v3102_v7  ;;  %v3005_v27 = vmul.f32 %v7984_v58, %v2909_v19 }
 0x248   : > { %6970 = vpow2.f32 %v3237_v20  ;;  %v3180_v37 = vmax.f32 %v3178_v62, %v3179_v24  ;;  %v3168_v53 = vrot.slane %v3167_v1, 4  ;;  %v8169_v30 = vmul.f32 0.35355338, %v3103_v57 }
 0x249   : > { %v2852_v26 = vpop.trf.xlu0  ;;  %v2884_v39 = vpop.trf.xlu1  ;;  %v3116_v59 = vmul.f32 0.35355338, %v3100_v41  ;;  %v8174_v13 = vsel %vm3373_vm9, -1e+09, %v3118_v0  ;;  %v8181_v58 = vsel %vm3130_vm8, -1e+09, %v3118_v0  ;;  %v3101_v24 = vadd.f32 %v7972_v4, %v3005_v27 }
 0x24a   : > { %v2912_v34 = vmul.f32 %v2852_v26, %v8020_v50  ;;  %v3181_v61 = vrot.slane %v3180_v37, 1  ;;  %4782 = vrot.lane.b32.xlu0 %v7933_v46, %s7228_s29  ;;  %v3169_v52 = vmax.f32 %v3167_v1, %v3168_v53  ;;  %v8185_v23 = vsel %vm1011_vm0, %v8139_v6, -inf  ;;  %s7233_s29 = smov 16  }
 0x24b   : > { %v8189_v50 = vsel %vm1011_vm0, %v8166_v47, -inf  ;;  %v8194_v63 = vsel %vm3373_vm9, -1e+09, %v8108_v10  ;;  %v8199_v40 = vsel %vm3130_vm8, -1e+09, %v8169_v30  ;;  %v2914_v10 = vmul.f32 %v2884_v39, %v8024_v16 }
 0x24c   : > { %v3182_v19 = vmax.f32 %v3180_v37, %v3181_v61  ;;  %v3170_v62 = vrot.slane %v3169_v52, 2  ;;  %v8203_v20 = vsel %vm3130_vm8, -1e+09, %v3116_v59  ;;  %v3008_v28 = vmul.f32 %v7974_v43, %v2912_v34 }
 0x24d   : > { %v2853_v31 = vpop.trf.xlu0  ;;  %v2885_v38 = vpop.trf.xlu1  ;;  %v3192_v37 = vsel %vm1011_vm0, %v8181_v58, -inf  ;;  %v3193_v0 = vsel %vm1011_vm0, %v8199_v40, -inf  ;;  %v8218_v4 = vsel %vm3373_vm9, -1e+09, %v3116_v59 }
 0x24e   : > { %v3225_v7 = vsub.f32 %v8113_v22, %v3182_v19  ;;  %v3226_v1 = vsub.f32 %v8129_v45, %v3182_v19  ;;  %v3171_v41 = vmax.f32 %v3169_v52, %v3170_v62  ;;  %v2913_v16 = vmul.f32 %v8018_v49, %v2853_v31 }
 0x24f   : > { %v8210_v57 = vpop.eup %6964  ;;  %v2915_v22 = vmul.f32 %v8022_v12, %v2885_v38  ;;  %v3194_v52 = vmax.f32 %v3192_v37, %v3193_v0  ;;  %v3183_v12 = vsel %vm1011_vm0, %v8203_v20, -inf  ;;  %v3117_v0 = vmul.f32 0.35355338, %v3101_v24 }
 0x250   : > { %v8220_v27 = vpop.eup %6966  ;;  %v3247_v45 = vmul.f32 1.442695, %v3225_v7  ;;  %v3249_v26 = vmul.f32 1.442695, %v3226_v1  ;;  %v3172_v34 = vrot.slane %v3171_v41, 1  ;;  %v3276_v61 = vsel %vm1011_vm0, %v8210_v57, 0.0 }
 0x251   : > { %v8224_v39 = vpop.eup %6968  ;;  %v3277_v53 = vsel %vm1011_vm0, %v8220_v27, 0.0  ;;  %v3195_v62 = vrot.slane %v3194_v52, 4  ;;  %v3009_v1 = vmul.f32 %v7974_v43, %v2913_v16  ;;  %v8244_v29 = vsel %vm3130_vm8, -1e+09, %v3117_v0 }
 0x252   : > { %v8230_v59 = vpop.eup %6970  ;;  %v3267_v19 = vsel %vm1011_vm0, %v8224_v39, 0.0  ;;  %6972 = vpow2.f32 %v3247_v45  ;;  %v3278_v49 = vadd.f32 %v3277_v53, %v3276_v61  ;;  %v3173_v38 = vmax.f32 %v3171_v41, %v3172_v34 }
 0x253   : > { %v3268_v31 = vsel %vm1011_vm0, %v8230_v59, 0.0  ;;  %6974 = vpow2.f32 %v3249_v26  ;;  %v3196_v45 = vmax.f32 %v3194_v52, %v3195_v62  ;;  %v3104_v53 = vadd.f32 %v7978_v35, %v3008_v28 }
 0x254   : > { %v3269_v7 = vadd.f32 %v3268_v31, %v3267_v19  ;;  %v3279_v37 = vrot.slane %v3278_v49, 4  ;;  %v3223_v15 = vsub.f32 %v8119_v55, %v3173_v38  ;;  %v3224_v14 = vsub.f32 %v8157_v32, %v3173_v38 }
 0x255   : > { %v8248_v41 = vsel %vm3374_vm10, -1e+09, %v3117_v0  ;;  %v3197_v24 = vrot.slane %v3196_v45, 2  ;;  %v3184_v55 = vsel %vm1011_vm0, %v8244_v29, -inf  ;;  %v3011_v26 = vmul.f32 %v7992_v36, %v2915_v22 }
 0x256   : > { %v3270_v61 = vrot.slane %v3269_v7, 4  ;;  %v3280_v17 = vadd.f32 %v3279_v37, %v3278_v49  ;;  %v3243_v43 = vmul.f32 1.442695, %v3223_v15  ;;  %v3245_v16 = vmul.f32 1.442695, %v3224_v14 }
 0x257   : > { %v3185_v34 = vmax.f32 %v3183_v12, %v3184_v55  ;;  %v3198_v52 = vmax.f32 %v3196_v45, %v3197_v24  ;;  %v3120_v19 = vmul.f32 0.35355338, %v3104_v53  ;;  %v3105_v49 = vadd.f32 %v7978_v35, %v3009_v1 }
 0x258   : > { %v3271_v32 = vadd.f32 %v3270_v61, %v3269_v7  ;;  %v3281_v28 = vrot.slane %v3280_v17, 2  ;;  %6976 = vpow2.f32 %v3243_v43  ;;  %v3010_v14 = vmul.f32 %v7992_v36, %v2914_v10 }
 0x259   : > { %6978 = vpow2.f32 %v3245_v16  ;;  %v3186_v62 = vrot.slane %v3185_v34, 4  ;;  %v3199_v15 = vrot.slane %v3198_v52, 1  ;;  %v8257_v37 = vsel %vm3130_vm8, -1e+09, %v3120_v19 }
 0x25a   : > { %v3272_v31 = vrot.slane %v3271_v32, 2  ;;  %v3282_v38 = vadd.f32 %v3281_v28, %v3280_v17  ;;  %v8261_v22 = vsel %vm3373_vm9, -1e+09, %v3120_v19  ;;  %v3107_v7 = vadd.f32 %v7982_v54, %v3011_v26 }
 0x25b   : > { %v3187_v0 = vmax.f32 %v3185_v34, %v3186_v62  ;;  %v3200_v10 = vmax.f32 %v3198_v52, %v3199_v15  ;;  %v3201_v45 = vsel %vm1011_vm0, %v8257_v37, -inf  ;;  %v3121_v53 = vmul.f32 0.35355338, %v3105_v49 }
 0x25c   : > { %v8263_v12 = vpop.eup %6972  ;;  %v3273_v35 = vadd.f32 %v3272_v31, %v3271_v32  ;;  %v3283_v1 = vrot.slane %v3282_v38, 1 }
 0x25d   : > { %v8266_v17 = vpop.eup %6974  ;;  %v3294_v36 = vsel %vm1011_vm0, %v8263_v12, 0.0  ;;  %v3188_v24 = vrot.slane %v3187_v0, 2  ;;  %v3229_v32 = vsub.f32 %v8181_v58, %v3200_v10  ;;  %v3230_v26 = vsub.f32 %v8199_v40, %v3200_v10 }
 0x25e   : > { %v3295_v61 = vsel %vm1011_vm0, %v8266_v17, 0.0  ;;  %v3274_v43 = vrot.slane %v3273_v35, 1  ;;  %v3284_v16 = vadd.f32 %v3283_v1, %v3282_v38  ;;  %v8278_v28 = vsel %vm3130_vm8, -1e+09, %v3121_v53 }
 0x25f   : > { %v3296_v55 = vadd.f32 %v3295_v61, %v3294_v36  ;;  %v3189_v52 = vmax.f32 %v3187_v0, %v3188_v24  ;;  %v3202_v19 = vsel %vm1011_vm0, %v8278_v28, -inf  ;;  %v3255_v31 = vmul.f32 1.442695, %v3229_v32 }
 0x260   : > { %v3275_v34 = vadd.f32 %v3274_v43, %v3273_v35  ;;  %6980 = vrcp.f32 %v3284_v16  ;;  %v3257_v38 = vmul.f32 1.442695, %v3230_v26  ;;  %v3203_v62 = vmax.f32 %v3201_v45, %v3202_v19 }
 0x261   : > { %v3297_v49 = vrot.slane %v3296_v55, 4  ;;  %v3190_v15 = vrot.slane %v3189_v52, 1  ;;  %v8284_v58 = vsel %vm3374_vm10, -1e+09, %v3121_v53  ;;  %v3123_v40 = vmul.f32 0.35355338, %v3107_v7 }
 0x262   : > { %6982 = vrcp.f32 %v3275_v34  ;;  %v8286_v1 = vpop.eup %6976  ;;  %v3204_v35 = vrot.slane %v3203_v62, 4  ;;  %v3106_v0 = vadd.f32 %v7982_v54, %v3010_v14  ;;  %v3403_v61 = vsel %vm1011_vm0, %v8194_v63, -inf }
 0x263   : > { %v3298_v36 = vadd.f32 %v3297_v49, %v3296_v55  ;;  %6984 = vpow2.f32 %v3255_v31  ;;  %v8292_v10 = vpop.eup %6978  ;;  %v3285_v45 = vsel %vm1011_vm0, %v8286_v1, 0.0  ;;  %v3191_v53 = vmax.f32 %v3189_v52, %v3190_v15 }
 0x264   : > { %3401 = vmax.xlane.f32.xlu1 %v8185_v23  ;;  %6986 = vpow2.f32 %v3257_v38  ;;  %v8299_v7 = vsel %vm3130_vm8, -1e+09, %v3123_v40  ;;  %v3286_v43 = vsel %vm1011_vm0, %v8292_v10, 0.0  ;;  %v3205_v54 = vmax.f32 %v3203_v62, %v3204_v35 }
 0x265   : > { %v8307_v14 = vsel %vm3374_vm10, -1e+09, %v3123_v40  ;;  %v8312_v23 = vsel %vm3374_vm10, -1e+09, %v8121_v56  ;;  %v3287_v16 = vadd.f32 %v3286_v43, %v3285_v45  ;;  %v3227_v24 = vsub.f32 %v8203_v20, %v3191_v53 }
 0x266   : > { %v3228_v55 = vsub.f32 %v8244_v29, %v3191_v53  ;;  %v8320_v32 = vsel %vm3374_vm10, -1e+09, %v8143_v42  ;;  %v3206_v26 = vrot.slane %v3205_v54, 2  ;;  %v3122_v34 = vmul.f32 0.35355338, %v3106_v0 }
 0x267   : > { %v3299_v52 = vrot.slane %v3298_v36, 2  ;;  %v3288_v19 = vrot.slane %v3287_v16, 4  ;;  %v3251_v49 = vmul.f32 1.442695, %v3227_v24  ;;  %v3211_v31 = vsel %vm1011_vm0, %v8299_v7, -inf }
 0x268   : > { %3410 = vmax.xlane.f32.xlu1 %v8189_v50  ;;  %v3253_v56 = vmul.f32 1.442695, %v3228_v55  ;;  %v3207_v38 = vmax.f32 %v3205_v54, %v3206_v26  ;;  %v8327_v29 = vsel %vm3130_vm8, -1e+09, %v3122_v34  ;;  %v8331_v42 = vsel %vm3373_vm9, -1e+09, %v3122_v34 }
 0x269   : > { %v3300_v20 = vadd.f32 %v3299_v52, %v3298_v36  ;;  %3404 = vmax.xlane.f32.xlu0 %v3403_v61  ;;  %v3412_v50 = vsel %vm1011_vm0, %v8312_v23, -inf  ;;  %v3289_v15 = vadd.f32 %v3288_v19, %v3287_v16  ;;  %6988 = vpow2.f32 %v3251_v49 }
 0x26a   : > { %v6981_v62 = vpop.eup %6980  ;;  %v3210_v40 = vsel %vm1011_vm0, %v8327_v29, -inf  ;;  %6990 = vpow2.f32 %v3253_v56  ;;  %v3208_v25 = vrot.slane %v3207_v38, 1  ;;  %v3406_v36 = vsel %vm1011_vm0, %v8320_v32, -inf }
 0x26b   : > { %v3343_v18 = vmul.f32 %v6981_v62, %v8210_v57  ;;  %v3344_v35 = vmul.f32 %v6981_v62, %v8220_v27  ;;  %v3290_v45 = vrot.slane %v3289_v15, 2  ;;  %v3212_v53 = vmax.f32 %v3210_v40, %v3211_v31 }
 0x26c   : > { %v6983_v0 = vpop.eup %6982  ;;  %3413 = vmax.xlane.f32.xlu1 %v3412_v50  ;;  %v3301_v61 = vrot.slane %v3300_v20, 1  ;;  %v3421_v57 = vsel %vm1011_vm0, %v8174_v13, -inf  ;;  %v3209_v27 = vmax.f32 %v3207_v38, %v3208_v25  ;;  %v8367_v34 = vsel %vm3374_vm10, -1e+09, %v8169_v30 }
 0x26d   : > { %v8341_v43 = vpop.eup %6984  ;;  %v3340_v54 = vmul.f32 %v6983_v0, %v8224_v39  ;;  %v3341_v16 = vmul.f32 %v6983_v0, %v8230_v59  ;;  %3825 = vst.msk [vmem:[%s8347_s18 + $0x10] sm:$0xff] %vm1011_vm0, %v3343_v18  ;;  %3826 = vst.msk [vmem:[%s8347_s18 + $0x18] sm:$0xff] %vm1011_vm0, %v3344_v35  ;;  %3407 = vmax.xlane.f32.xlu0 %v3406_v36  ;;  %v3291_v59 = vadd.f32 %v3290_v45, %v3289_v15 }
 0x26e   : > { %v8355_v24 = vpop.eup %6986  ;;  %v3312_v39 = vsel %vm1011_vm0, %v8341_v43, 0.0  ;;  %v3213_v55 = vrot.slane %v3212_v53, 4  ;;  %v3302_v26 = vadd.f32 %v3301_v61, %v3300_v20  ;;  %v3231_v19 = vsub.f32 %v8257_v37, %v3209_v27 }
 0x26f   : > { %3823 = vst.msk [vmem:[%s8347_s18] sm:$0xff] %vm1011_vm0, %v3340_v54  ;;  %6415 = vmatprep.mubr.msk.f32.mxu0 %vm1011_vm0, %v3340_v54  ;;  %3824 = vst.msk [vmem:[%s8347_s18 + $0x8] sm:$0xff] %vm1011_vm0, %v3341_v16  ;;  %v3313_v52 = vsel %vm1011_vm0, %v8355_v24, 0.0  ;;  %v3232_v49 = vsub.f32 %v8278_v28, %v3209_v27  ;;  %v3292_v31 = vrot.slane %v3291_v59, 1  ;;  %v6817_v20 = vunpack.i.l.bf16 %v7986_v51 }
 0x270   : > { %6416 = vmatmul.mubr.msk.f32.vlgmr.msra.gmra.mrb[32].mxu0 %vm1011_vm0, %v3341_v16  ;;  %3422 = vmax.xlane.f32.xlu1 %v3421_v57  ;;  %v3314_v56 = vadd.f32 %v3313_v52, %v3312_v39  ;;  %v3214_v38 = vmax.f32 %v3212_v53, %v3213_v55  ;;  %6992 = vrcp.f32 %v3302_v26  ;;  %v3259_v30 = vmul.f32 1.442695, %v3231_v19 }
 0x271   : > { %6678 = vmatpush3.bf16.msra.mxu0 %v7998_v44  ;;  %6437 = vmatprep.mubr.msk.f32.mxu0 %vm1011_vm0, %v3343_v18  ;;  %v3261_v62 = vmul.f32 1.442695, %v3232_v49  ;;  %v6842_v37 = vunpack.i.l.bf16 %v8030_v5  ;;  %v3293_v50 = vadd.f32 %v3292_v31, %v3291_v59  ;;  %v3424_v40 = vsel %vm1011_vm0, %v8367_v34, -inf }
 0x272   : > { %6435 = vmatprep.subr.mxu0 %v7996_v11  ;;  %v3315_v28 = vrot.slane %v3314_v56, 4  ;;  %v3215_v15 = vrot.slane %v3214_v38, 2  ;;  %6994 = vpow2.f32 %v3259_v30  ;;  %v9165_v36 = vunpack.i.h.bf16 %v7986_v51 }
 0x273   : > { %v8382_v25 = vpop.eup %6988  ;;  %6996 = vrcp.f32 %v3293_v50  ;;  %v9166_v53 = vmov 0.0|0.0   ;;  %v8393_v61 = vpack.c.bf16 %v6843_v2, %v6842_v37  ;;  %v9167_v27 = vmov 0.0  }
 0x274   : > { %3425 = vmax.xlane.f32.xlu1 %v3424_v40  ;;  %v3316_v0 = vadd.f32 %v3315_v28, %v3314_v56  ;;  %v3216_v44 = vmax.f32 %v3214_v38, %v3215_v15  ;;  %v8384_v18 = vpop.eup %6990  ;;  %v6680_v5 = vpack.c.bf16 %v9165_v36, %v6817_v20  ;;  %v3303_v45 = vsel %vm1011_vm0, %v8382_v25, 0.0 }
 0x275   : > { %6436 = vmatpush3.msra.mxu0 %v7996_v11  ;;  %6998 = vpow2.f32 %v3261_v62  ;;  %v3304_v54 = vsel %vm1011_vm0, %v8384_v18, 0.0 }
 0x276   : > { %6438 = vmatmul.mubr.msk.f32.vlgmr.msra.gmra.mrb[34].mxu0 %vm1011_vm0, %v3344_v35  ;;  %6679 = vmatprep.subr.bf16.mxu0 %v9166_v53  ;;  %v3217_v16 = vrot.slane %v3216_v44, 1  ;;  %v3317_v57 = vrot.slane %v3316_v0, 2  ;;  %v3305_v51 = vadd.f32 %v3304_v54, %v3303_v45 }
 0x277   : > { %6681 = vmatpush3.bf16.msra.mxu0 %v6680_v5  ;;  %6444 = vmatprep.mubr.msk.f32.mxu0 %vm7222_vm3, %v9167_v27 }
 0x278   : > { %6690 = vmatprep.subr.bf16.mxu0 %v8393_v61  ;;  %v3218_v11 = vmax.f32 %v3216_v44, %v3217_v16  ;;  %v3318_v35 = vadd.f32 %v3317_v57, %v3316_v0  ;;  %v3306_v39 = vrot.slane %v3305_v51, 4 }
 0x27a   : > { %v6993_v59 = vpop.eup %6992  ;;  %v3233_v55 = vsub.f32 %v8327_v29, %v3218_v11  ;;  %v3234_v26 = vsub.f32 %v8299_v7, %v3218_v11  ;;  %v3319_v52 = vrot.slane %v3318_v35, 1  ;;  %v3307_v19 = vadd.f32 %v3306_v39, %v3305_v51 }
 0x27b   : > { %v8403_v49 = vmul.f32 %v6993_v59, %v8263_v12  ;;  %v8406_v56 = vmul.f32 %v6993_v59, %v8266_v17 }
 0x27c   : > { %v3263_v31 = vmul.f32 1.442695, %v3233_v55  ;;  %v3265_v38 = vmul.f32 1.442695, %v3234_v26  ;;  %v3320_v20 = vadd.f32 %v3319_v52, %v3318_v35  ;;  %v6995_v2 = vpop.eup %6994  ;;  %v3308_v7 = vrot.slane %v3307_v19, 2 }
 0x27d   : > { %3829 = vst.msk [vmem:[%s8347_s18 + $0x30] sm:$0xff] %vm1011_vm0, %v8403_v49  ;;  %3830 = vst.msk [vmem:[%s8347_s18 + $0x38] sm:$0xff] %vm1011_vm0, %v8406_v56  ;;  %v6997_v29 = vpop.eup %6996  ;;  %v3321_v12 = vsel %vm1011_vm0, %v6995_v2, 0.0 }
 0x27e   : > { %7000 = vpow2.f32 %v3263_v31  ;;  %v8416_v17 = vmul.f32 %v6997_v29, %v8286_v1  ;;  %v8419_v62 = vmul.f32 %v6997_v29, %v8292_v10  ;;  %v3309_v37 = vadd.f32 %v3308_v7, %v3307_v19 }
 0x27f   : > { %v6999_v30 = vpop.eup %6998  ;;  %7002 = vpow2.f32 %v3265_v38 }
 0x280   : > { %v3322_v28 = vsel %vm1011_vm0, %v6999_v30, 0.0  ;;  %7004 = vrcp.f32 %v3320_v20  ;;  %3827 = vst.msk [vmem:[%s8347_s18 + $0x20] sm:$0xff] %vm1011_vm0, %v8416_v17  ;;  %3828 = vst.msk [vmem:[%s8347_s18 + $0x28] sm:$0xff] %vm1011_vm0, %v8419_v62  ;;  %v3310_v15 = vrot.slane %v3309_v37, 1 }
 0x281   : > { %v3323_v50 = vadd.f32 %v3322_v28, %v3321_v12 }
 0x282   : > { %v3311_v0 = vadd.f32 %v3310_v15, %v3309_v37 }
 0x283   : > { %v3324_v40 = vrot.slane %v3323_v50, 4  ;;  %6865 = vrot.lane.b32.xlu0 %v7935_v33, %s7230_s21 }
 0x284   : > { %7006 = vrcp.f32 %v3311_v0 }
 0x285   : > { %6870 = vrot.lane.b32.xlu1 %v7935_v33, %s7231_s26  ;;  %v3325_v1 = vadd.f32 %v3324_v40, %v3323_v50 }
 0x287   : > { %v3326_v10 = vrot.slane %v3325_v1, 2 }
 0x288   : > { %v7001_v44 = vpop.eup %7000 }
 0x289   : > { %v7003_v36 = vpop.eup %7002  ;;  %v3330_v5 = vsel %vm1011_vm0, %v7001_v44, 0.0  ;;  %v3327_v45 = vadd.f32 %v3326_v10, %v3325_v1 }
 0x28a   : > { %v7005_v54 = vpop.eup %7004  ;;  %v3331_v16 = vsel %vm1011_vm0, %v7003_v36, 0.0 }
 0x28b   : > { %v8435_v57 = vmul.f32 %v7005_v54, %v8341_v43  ;;  %v8438_v51 = vmul.f32 %v7005_v54, %v8355_v24  ;;  %v3328_v33 = vrot.slane %v3327_v45, 1  ;;  %v3332_v11 = vadd.f32 %v3331_v16, %v3330_v5 }
 0x28d   : > { %3833 = vst.msk [vmem:[%s8347_s18 + $0x50] sm:$0xff] %vm1011_vm0, %v8435_v57  ;;  %3834 = vst.msk [vmem:[%s8347_s18 + $0x58] sm:$0xff] %vm1011_vm0, %v8438_v51  ;;  %v3329_v35 = vadd.f32 %v3328_v33, %v3327_v45  ;;  %v3333_v39 = vrot.slane %v3332_v11, 4 }
 0x28e   : > { %v7007_v59 = vpop.eup %7006 }
 0x28f   : > { %7008 = vrcp.f32 %v3329_v35  ;;  %v3334_v55 = vadd.f32 %v3333_v39, %v3332_v11  ;;  %v8447_v43 = vmul.f32 %v7007_v59, %v8382_v25  ;;  %v8450_v24 = vmul.f32 %v7007_v59, %v8384_v18 }
 0x290   : > { %v3415_v18 = vsel %vm1011_vm0, %v8218_v4, -inf }
 0x291   : > { %v3335_v26 = vrot.slane %v3334_v55, 2  ;;  %3831 = vst.msk [vmem:[%s8347_s18 + $0x40] sm:$0xff] %vm1011_vm0, %v8447_v43  ;;  %3832 = vst.msk [vmem:[%s8347_s18 + $0x48] sm:$0xff] %vm1011_vm0, %v8450_v24 }
 0x293   : > { %v3336_v52 = vadd.f32 %v3335_v26, %v3334_v55 }
 0x295   : > { %v3337_v19 = vrot.slane %v3336_v52, 1 }
 0x297   : > { %v3338_v31 = vadd.f32 %v3337_v19, %v3336_v52 }
 0x299   : > { %v7009_v38 = vpop.eup %7008  ;;  %7010 = vrcp.f32 %v3338_v31 }
 0x29a   : > { %v8458_v20 = vmul.f32 %v7009_v38, %v6995_v2  ;;  %v8460_v25 = vmul.f32 %v7009_v38, %v6999_v30  ;;  %v3418_v2 = vsel %vm1011_vm0, %v8248_v41, -inf }
 0x29c   : > { %3835 = vst.msk [vmem:[%s8347_s18 + $0x60] sm:$0xff] %vm1011_vm0, %v8458_v20  ;;  %3836 = vst.msk [vmem:[%s8347_s18 + $0x68] sm:$0xff] %vm1011_vm0, %v8460_v25 }
 0x2a2   : > { %3416 = vmax.xlane.f32.xlu0 %v3415_v18 }
 0x2a3   : > { %v7011_v7 = vpop.eup %7010 }
 0x2a4   : > { %v8470_v29 = vmul.f32 %v7011_v7, %v7001_v44  ;;  %v8472_v12 = vmul.f32 %v7011_v7, %v7003_v36 }
 0x2a6   : > { %3837 = vst.msk [vmem:[%s8347_s18 + $0x70] sm:$0xff] %vm1011_vm0, %v8470_v29  ;;  %3838 = vst.msk [vmem:[%s8347_s18 + $0x78] sm:$0xff] %vm1011_vm0, %v8472_v12  ;;  %3419 = vmax.xlane.f32.xlu0 %v3418_v2 }
 0x2bc   : > { %v3399_v30 = vpop.xlane.xlu1 %3398 }
 0x2bd   : > { %v3393_v37 = vpop.xlane.xlu0 %3392  ;;  %v3441_v28 = vsub.f32 %v8061_v48, %v3399_v30 }
 0x2be   : > { %v3439_v50 = vsub.f32 %v8068_v60, %v3393_v37 }
 0x2bf   : > { %v3459_v15 = vmul.f32 1.442695, %v3441_v28 }
 0x2c0   : > { %v3455_v40 = vmul.f32 1.442695, %v3439_v50 }
 0x2c1   : > { %7012 = vpow2.f32 %v3459_v15  ;;  %v3396_v0 = vpop.xlane.xlu0 %3395 }
 0x2c2   : > { %7014 = vpow2.f32 %v3455_v40  ;;  %v3440_v1 = vsub.f32 %v8091_v3, %v3396_v0  ;;  %v8497_v3 = vpop.permute.xlu1 %6860 }
 0x2c4   : > { %v3457_v10 = vmul.f32 1.442695, %v3440_v1 }
 0x2c5   : > { %v8500_v33 = vpop.permute.xlu0 %4782 }
 0x2c6   : > { %7016 = vpow2.f32 %v3457_v10 }
 0x2cb   : > { %v8485_v44 = vpop.eup %7012 }
 0x2cc   : > { %v8487_v36 = vpop.eup %7014  ;;  %v3493_v5 = vsel %vm1011_vm0, %v8485_v44, 0.0 }
 0x2cd   : > { %v3487_v48 = vsel %vm1011_vm0, %v8487_v36, 0.0  ;;  %3494 = vadd.xlane.f32.xlu1 %v3493_v5 }
 0x2ce   : > { %3488 = vadd.xlane.f32.xlu0 %v3487_v48 }
 0x2d0   : > { %v8493_v60 = vpop.eup %7016 }
 0x2d1   : > { %v3490_v45 = vsel %vm1011_vm0, %v8493_v60, 0.0 }
 0x2d2   : > { %3491 = vadd.xlane.f32.xlu0 %v3490_v45 }
 0x2f1   : > { %v3402_v54 = vpop.xlane.xlu1 %3401 }
 0x2f2   : > { %v3442_v16 = vsub.f32 %v8139_v6, %v3402_v54 }
 0x2f4   : > { %v3461_v11 = vmul.f32 1.442695, %v3442_v16 }
 0x2f5   : > { %v3411_v35 = vpop.xlane.xlu1 %3410 }
 0x2f6   : > { %7018 = vpow2.f32 %v3461_v11  ;;  %v3445_v39 = vsub.f32 %v8166_v47, %v3411_v35  ;;  %v3405_v59 = vpop.xlane.xlu0 %3404 }
 0x2f7   : > { %v3443_v55 = vsub.f32 %v8194_v63, %v3405_v59 }
 0x2f8   : > { %v3467_v26 = vmul.f32 1.442695, %v3445_v39 }
 0x2f9   : > { %v3414_v52 = vpop.xlane.xlu1 %3413  ;;  %v3463_v19 = vmul.f32 1.442695, %v3443_v55 }
 0x2fa   : > { %7020 = vpow2.f32 %v3467_v26  ;;  %v3446_v31 = vsub.f32 %v8312_v23, %v3414_v52  ;;  %v3408_v38 = vpop.xlane.xlu0 %3407 }
 0x2fb   : > { %7022 = vpow2.f32 %v3463_v19  ;;  %v3444_v6 = vsub.f32 %v8320_v32, %v3408_v38 }
 0x2fc   : > { %v3469_v18 = vmul.f32 1.442695, %v3446_v31 }
 0x2fd   : > { %v3423_v7 = vpop.xlane.xlu1 %3422  ;;  %v3465_v2 = vmul.f32 1.442695, %v3444_v6 }
 0x2fe   : > { %7024 = vpow2.f32 %v3469_v18  ;;  %v3449_v30 = vsub.f32 %v8174_v13, %v3423_v7  ;;  %v8531_v5 = vpop.permute.xlu0 %6865 }
 0x2ff   : > { %7026 = vpow2.f32 %v3465_v2 }
 0x300   : > { %v8507_v47 = vpop.eup %7018  ;;  %v3475_v63 = vmul.f32 1.442695, %v3449_v30 }
 0x301   : > { %v3496_v37 = vsel %vm1011_vm0, %v8507_v47, 0.0  ;;  %v3426_v48 = vpop.xlane.xlu1 %3425 }
 0x302   : > { %7028 = vpow2.f32 %v3475_v63  ;;  %3497 = vadd.xlane.f32.xlu1 %v3496_v37  ;;  %v3450_v16 = vsub.f32 %v8367_v34, %v3426_v48 }
 0x304   : > { %v8511_v23 = vpop.eup %7020  ;;  %v3477_v59 = vmul.f32 1.442695, %v3450_v16 }
 0x305   : > { %v3505_v32 = vsel %vm1011_vm0, %v8511_v23, 0.0  ;;  %v8515_v28 = vpop.eup %7022  ;;  %v8550_v7 = vpop.permute.xlu1 %6870 }
 0x306   : > { %3506 = vadd.xlane.f32.xlu1 %v3505_v32  ;;  %v3499_v13 = vsel %vm1011_vm0, %v8515_v28, 0.0 }
 0x307   : > { %3500 = vadd.xlane.f32.xlu0 %v3499_v13 }
 0x308   : > { %v8519_v50 = vpop.eup %7024 }
 0x309   : > { %v3508_v15 = vsel %vm1011_vm0, %v8519_v50, 0.0  ;;  %v8523_v40 = vpop.eup %7026 }
 0x30a   : > { %3509 = vadd.xlane.f32.xlu1 %v3508_v15  ;;  %v3502_v0 = vsel %vm1011_vm0, %v8523_v40, 0.0 }
 0x30b   : > { %3503 = vadd.xlane.f32.xlu0 %v3502_v0 }
 0x30c   : > { %v8527_v1 = vpop.eup %7028 }
 0x30d   : > { %v3517_v10 = vsel %vm1011_vm0, %v8527_v1, 0.0 }
 0x30e   : > { %3518 = vadd.xlane.f32.xlu1 %v3517_v10 }
 0x32f   : > { %v3417_v45 = vpop.xlane.xlu0 %3416 }
 0x330   : > { %v3447_v54 = vsub.f32 %v8218_v4, %v3417_v45 }
 0x332   : > { %v3471_v11 = vmul.f32 1.442695, %v3447_v54 }
 0x333   : > { %v3420_v35 = vpop.xlane.xlu0 %3419 }
 0x334   : > { %7030 = vpow2.f32 %v3471_v11  ;;  %v3448_v39 = vsub.f32 %v8248_v41, %v3420_v35 }
 0x336   : > { %v3473_v55 = vmul.f32 1.442695, %v3448_v39 }
 0x338   : > { %7032 = vpow2.f32 %v3473_v55 }
 0x339   : > { %7034 = vpow2.f32 %v3477_v59 }
 0x33e   : > { %v7031_v26 = vpop.eup %7030 }
 0x33f   : > { %v3511_v52 = vsel %vm1011_vm0, %v7031_v26, 0.0 }
 0x340   : > { %3512 = vadd.xlane.f32.xlu0 %v3511_v52 }
 0x342   : > { %v7033_v19 = vpop.eup %7032 }
 0x343   : > { %v8537_v31 = vpop.f32.mrb[32].mxu0  ;;  %v3514_v4 = vsel %vm1011_vm0, %v7033_v19, 0.0  ;;  %v8542_v34 = vpop.eup %7034 }
 0x344   : > { %v8539_v38 = vpop.f32.mrb[33].mxu0  ;;  %3515 = vadd.xlane.f32.xlu0 %v3514_v4  ;;  %v3520_v41 = vsel %vm1011_vm0, %v8542_v34, 0.0 }
 0x348   : > { %3521 = vadd.xlane.f32.xlu0 %v3520_v41 }
 0x349   : > { %v8546_v6 = vpop.f32.mrb[34].mxu0 }
 0x34a   : > { %v8548_v18 = vpop.f32.mrb[35].mxu0 }
 0x35a   : > { %v3495_v2 = vpop.xlane.xlu1 %3494 }
 0x35b   : > { %7036 = vrcp.f32 %v3495_v2  ;;  %v3489_v30 = vpop.xlane.xlu0 %3488 }
 0x35c   : > { %7038 = vrcp.f32 %v3489_v30 }
 0x35f   : > { %v3492_v32 = vpop.xlane.xlu0 %3491 }
 0x360   : > { %7040 = vrcp.f32 %v3492_v32 }
 0x365   : > { %v7037_v63 = vpop.eup %7036 }
 0x366   : > { %v3540_v37 = vmul.f32 %v7037_v63, %v8485_v44  ;;  %v7039_v13 = vpop.eup %7038 }
 0x367   : > { %v3536_v15 = vmul.f32 %v7039_v13, %v8487_v36 }
 0x368   : > { %3599 = vxpose.xlu1.b32.start [1/2] (short) (narrow) %v3540_v37, 24 }
 0x36a   : > { %v7041_v0 = vpop.eup %7040 }
 0x36b   : > { %v3538_v10 = vmul.f32 %v7041_v0, %v8493_v60 }
 0x375   : > { %3567 = vxpose.xlu0.b32.start [1/2] (short) (narrow) %v3536_v15, 24  ;;  %v9168_v15 = vld [vmem:[#allocation18_spill] sm:$0xff] }
 0x376   : > { %v6848_v0 = vunpack.i.h.bf16 %v9168_v15 }
 0x379   : > { %3568 = vxpose.xlu0.b32.end [2/2] (short) (narrow) %v3538_v10, 24  ;;  %v6847_v10 = vunpack.i.l.bf16 %v9168_v15 }
 0x38f   : > { %v3498_v48 = vpop.xlane.xlu1 %3497 }
 0x390   : > { %7042 = vrcp.f32 %v3498_v48  ;;  %v8597_v48 = vpack.c.bf16 %v6848_v0, %v6847_v10 }
 0x393   : > { %v3507_v45 = vpop.xlane.xlu1 %3506 }
 0x394   : > { %7044 = vrcp.f32 %v3507_v45  ;;  %v3501_v60 = vpop.xlane.xlu0 %3500 }
 0x397   : > { %v3510_v54 = vpop.xlane.xlu1 %3509 }
 0x398   : > { %7046 = vrcp.f32 %v3510_v54  ;;  %v3504_v59 = vpop.xlane.xlu0 %3503  ;;  %v9169_v54 = vld [vmem:[#allocation17_spill] sm:$0xff] }
 0x399   : > { %7048 = vrcp.f32 %v3501_v60 }
 0x39a   : > { %v7043_v16 = vpop.eup %7042  ;;  %7050 = vrcp.f32 %v3504_v59 }
 0x39b   : > { %v3542_v44 = vmul.f32 %v7043_v16, %v8507_v47  ;;  %v3519_v37 = vpop.xlane.xlu1 %3518 }
 0x39d   : > { %3600 = vxpose.xlu1.b32.end [2/2] (short) (narrow) %v3542_v44, 24  ;;  %v3433_v44 = vsel %vm1011_vm0, %v8331_v42, -inf }
 0x39e   : > { %v7045_v11 = vpop.eup %7044 }
 0x39f   : > { %v3548_v35 = vmul.f32 %v7045_v11, %v8511_v23 }
 0x3a2   : > { %v7047_v39 = vpop.eup %7046  ;;  %3663 = vxpose.xlu1.b32.start [1/2] (short) (narrow) %v3548_v35, 24 }
 0x3a3   : > { %v3550_v36 = vmul.f32 %v7047_v39, %v8519_v50  ;;  %v7049_v55 = vpop.eup %7048 }
 0x3a4   : > { %v3544_v52 = vmul.f32 %v7049_v55, %v8515_v28  ;;  %v7051_v47 = vpop.eup %7050 }
 0x3a5   : > { %v3546_v4 = vmul.f32 %v7051_v47, %v8523_v40 }
 0x3a6   : > { %3664 = vxpose.xlu1.b32.end [2/2] (short) (narrow) %v3550_v36, 24  ;;  %4967 = vrot.lane.b32.xlu0 %v7933_v46, %s7230_s21  ;;  %v9171_v36 = vld [vmem:[#allocation19_spill] sm:$0xff] }
 0x3a7   : > { %v6853_v60 = vunpack.i.h.bf16 %v9171_v36  ;;  %v6852_v59 = vunpack.i.l.bf16 %v9171_v36 }
 0x3a9   : > { %v6703_v47 = vpack.c.bf16 %v6853_v60, %v6852_v59 }
 0x3c4   : > { %3631 = vxpose.xlu0.b32.start [1/2] (short) (narrow) %v3544_v52, 24 }
 0x3c8   : > { %5152 = vrot.lane.b32.xlu1 %v7933_v46, %s7231_s26  ;;  %3632 = vxpose.xlu0.b32.end [2/2] (short) (narrow) %v3546_v4, 24 }
 0x3cd   : > { %v3513_v23 = vpop.xlane.xlu0 %3512 }
 0x3ce   : > { %7052 = vrcp.f32 %v3513_v23  ;;  %v6862_v23 = vunpack.i.l.bf16 %v8497_v3 }
 0x3d1   : > { %v3516_v50 = vpop.xlane.xlu0 %3515 }
 0x3d2   : > { %7054 = vrcp.f32 %v3516_v50  ;;  %v6873_v50 = vunpack.i.h.bf16 %v8550_v7 }
 0x3d3   : > { %7056 = vrcp.f32 %v3519_v37 }
 0x3d5   : > { %v3522_v28 = vpop.xlane.xlu0 %3521 }
 0x3d6   : > { %7058 = vrcp.f32 %v3522_v28 }
 0x3d8   : > { %v7053_v41 = vpop.eup %7052 }
 0x3d9   : > { %v3552_v2 = vmul.f32 %v7053_v41, %v7031_v26  ;;  %v6872_v41 = vunpack.i.l.bf16 %v8550_v7  ;;  %v9173_v7 = vld [vmem:[#allocation21_spill] sm:$0xff] }
 0x3da   : > { %v6857_v37 = vunpack.i.l.bf16 %v9173_v7 }
 0x3db   : > { %3695 = vxpose.xlu0.b32.start [1/2] (short) (narrow) %v3552_v2, 24  ;;  %v6717_v2 = vpack.c.bf16 %v6873_v50, %v6872_v41 }
 0x3dc   : > { %v7055_v30 = vpop.eup %7054 }
 0x3dd   : > { %v3554_v63 = vmul.f32 %v7055_v30, %v7033_v19  ;;  %v7057_v40 = vpop.eup %7056  ;;  %v6823_v19 = vunpack.i.h.bf16 %v7990_v9 }
 0x3de   : > { %v3556_v32 = vmul.f32 %v7057_v40, %v8527_v1  ;;  %v6868_v40 = vunpack.i.h.bf16 %v8531_v5 }
 0x3df   : > { %3696 = vxpose.xlu0.b32.end [2/2] (short) (narrow) %v3554_v63, 24  ;;  %v6858_v63 = vunpack.i.h.bf16 %v9173_v7 }
 0x3e0   : > { %v7059_v46 = vpop.eup %7058 }
 0x3e1   : > { %v3558_v13 = vmul.f32 %v7059_v46, %v8542_v34  ;;  %v6701_v46 = vpack.c.bf16 %v6858_v63, %v6857_v37 }
 0x3f1   : > { %3727 = vxpose.xlu1.b32.start [1/2] (short) (narrow) %v3556_v32, 24  ;;  %v6867_v32 = vunpack.i.l.bf16 %v8531_v5 }
 0x3f5   : > { %3728 = vxpose.xlu1.b32.end [2/2] (short) (narrow) %v3558_v13, 24  ;;  %v3583_v26 = vpop.trf.xlu0  ;;  %v6710_v13 = vpack.c.bf16 %v6868_v40, %v6867_v32 }
 0x3f6   : > { %3839 = vst.msk [vmem:[%s8570_s24] sm:$0xff] %vm922_vm2, %v3583_v26  ;;  %6423 = vmatmul.mubr.msk.f32.vlgmr.msra.gmra.mrb[34].mxu1 %vm922_vm2, %v3583_v26 }
 0x3f7   : > { %6685 = vmatpush3.bf16.msra.mxu1 %v8001_v21  ;;  %6425 = vmatprep.mubr.msk.f32.mxu1 %vm7222_vm3, %v9167_v27  ;;  %v6822_v21 = vunpack.i.l.bf16 %v7990_v9  ;;  %v3427_v9 = vsel %vm1011_vm0, %v8261_v22, -inf }
 0x3f8   : > { %6457 = vmatprep.subr.mxu1 %v8026_v8 }
 0x3f9   : > { %v3584_v1 = vpop.trf.xlu0 }
 0x3fa   : > { %3840 = vst.msk [vmem:[%s8570_s24 + $0x8] sm:$0xff] %vm922_vm2, %v3584_v1  ;;  %6426 = vmatmul.mubr.msk.f32.gmra.mrb[36].mxu1 %vm922_vm2, %v3584_v1 }
 0x3fb   : > { %6458 = vmatpush3.msra.mxu1 %v8026_v8  ;;  %6428 = vmatprep.mubr.msk.f32.mxu1 %vm7222_vm3, %v9167_v27  ;;  %v6687_v8 = vpack.c.bf16 %v6823_v19, %v6822_v21 }
 0x3fc   : > { %6686 = vmatprep.subr.bf16.mxu1 %v9166_v53 }
 0x3fd   : > { %v3585_v34 = vpop.trf.xlu0 }
 0x3fe   : > { %3841 = vst.msk [vmem:[%s8570_s24 + $0x10] sm:$0xff] %vm922_vm2, %v3585_v34  ;;  %6429 = vmatmul.mubr.msk.f32.gmra.mrb[38].mxu1 %vm922_vm2, %v3585_v34 }
 0x3ff   : > { %6459 = vmatprep.mubr.msk.f32.mxu1 %vm1011_vm0, %v8416_v17  ;;  %v3430_v17 = vsel %vm1011_vm0, %v8284_v58, -inf }
 0x402   : > { %6460 = vmatmul.mubr.msk.f32.vlgmr.msra.gmra.mrb[40].mxu1 %vm1011_vm0, %v8419_v62  ;;  %v3436_v62 = vsel %vm1011_vm0, %v8307_v14, -inf }
 0x403   : > { %6688 = vmatpush3.bf16.msra.mxu1 %v6687_v8  ;;  %6466 = vmatprep.mubr.msk.f32.mxu1 %vm7222_vm3, %v9167_v27 }
 0x404   : > { %6697 = vmatprep.subr.bf16.mxu1 %v8597_v48 }
 0x410   : > { %3428 = vmax.xlane.f32.xlu0 %v3427_v9 }
 0x414   : > { %3431 = vmax.xlane.f32.xlu0 %v3430_v17 }
 0x418   : > { %3437 = vmax.xlane.f32.xlu0 %v3436_v62 }
 0x419   : > { %v3615_v45 = vpop.trf.xlu1 }
 0x41a   : > { %3842 = vst.msk [vmem:[%s8570_s24 + $0x18] sm:$0xff] %vm922_vm2, %v3615_v45  ;;  %6445 = vmatmul.mubr.msk.f32.vlgmr.msra.gmra.mrb[36].mxu0 %vm922_vm2, %v3615_v45 }
 0x41b   : > { %6692 = vmatpush3.bf16.msra.mxu0 %v8393_v61  ;;  %6447 = vmatprep.mubr.msk.f32.mxu0 %vm7222_vm3, %v9167_v27  ;;  %v9170_v61 = vld [vmem:[#allocation16_spill] sm:$0xff] }
 0x41c   : > { %6479 = vmatprep.subr.mxu0 %v9169_v54  ;;  %v6828_v11 = vunpack.i.h.bf16 %v9170_v61  ;;  %v6827_v35 = vunpack.i.l.bf16 %v9170_v61 }
 0x41d   : > { %v3616_v16 = vpop.trf.xlu1 }
 0x41e   : > { %3843 = vst.msk [vmem:[%s8570_s24 + $0x20] sm:$0xff] %vm922_vm2, %v3616_v16  ;;  %6448 = vmatmul.mubr.msk.f32.gmra.mrb[38].mxu0 %vm922_vm2, %v3616_v16  ;;  %v6694_v55 = vpack.c.bf16 %v6828_v11, %v6827_v35  ;;  %v9174_v16 = vld [vmem:[#allocation15_spill] sm:$0xff] }
 0x41f   : > { %6480 = vmatpush3.msra.mxu0 %v9169_v54  ;;  %6450 = vmatprep.mubr.msk.f32.mxu0 %vm7222_vm3, %v9167_v27 }
 0x420   : > { %3434 = vmax.xlane.f32.xlu1 %v3433_v44  ;;  %6693 = vmatprep.subr.bf16.mxu0 %v9166_v53 }
 0x421   : > { %v3617_v39 = vpop.trf.xlu1 }
 0x422   : > { %3844 = vst.msk [vmem:[%s8570_s24 + $0x28] sm:$0xff] %vm922_vm2, %v3617_v39  ;;  %6451 = vmatmul.mubr.msk.f32.gmra.mrb[40].mxu0 %vm922_vm2, %v3617_v39 }
 0x423   : > { %6481 = vmatprep.mubr.msk.f32.mxu0 %vm1011_vm0, %v8403_v49 }
 0x425   : > { %v3679_v52 = vpop.trf.xlu1 }
 0x426   : > { %6482 = vmatmul.mubr.msk.f32.vlgmr.msra.gmra.mrb[42].mxu0 %vm1011_vm0, %v8406_v56  ;;  %3848 = vst.msk [vmem:[%s8570_s24 + $0x48] sm:$0xff] %vm922_vm2, %v3679_v52  ;;  %v6863_v56 = vunpack.i.h.bf16 %v8497_v3  ;;  %v4968_v3 = vpop.permute.xlu0 %4967 }
 0x427   : > { %6695 = vmatpush3.bf16.msra.mxu0 %v6694_v55  ;;  %6488 = vmatprep.mubr.msk.f32.mxu0 %vm7222_vm3, %v9167_v27 }
 0x428   : > { %6704 = vmatprep.subr.bf16.mxu0 %v6703_v47 }
 0x429   : > { %v3680_v4 = vpop.trf.xlu1 }
 0x42a   : > { %6489 = vmatmul.mubr.msk.f32.vlgmr.msra.gmra.mrb[44].mxu0 %vm922_vm2, %v3679_v52  ;;  %3849 = vst.msk [vmem:[%s8570_s24 + $0x50] sm:$0xff] %vm922_vm2, %v3680_v4 }
 0x42b   : > { %6706 = vmatpush3.bf16.msra.mxu0 %v6703_v47  ;;  %6491 = vmatprep.mubr.msk.f32.mxu0 %vm7222_vm3, %v9167_v27 }
 0x42c   : > { %6523 = vmatprep.subr.mxu0 %v8500_v33 }
 0x42d   : > { %v3681_v49 = vpop.trf.xlu1 }
 0x42e   : > { %6492 = vmatmul.mubr.msk.f32.gmra.mrb[46].mxu0 %vm922_vm2, %v3680_v4  ;;  %3850 = vst.msk [vmem:[%s8570_s24 + $0x58] sm:$0xff] %vm922_vm2, %v3681_v49 }
 0x42f   : > { %6524 = vmatpush3.msra.mxu0 %v8500_v33  ;;  %6494 = vmatprep.mubr.msk.f32.mxu0 %vm7222_vm3, %v9167_v27  ;;  %v6708_v33 = vpack.c.bf16 %v6863_v56, %v6862_v23 }
 0x430   : > { %6707 = vmatprep.subr.bf16.mxu0 %v9166_v53 }
 0x432   : > { %6495 = vmatmul.mubr.msk.f32.gmra.mrb[48].mxu0 %vm922_vm2, %v3681_v49 }
 0x433   : > { %6525 = vmatprep.mubr.msk.f32.mxu0 %vm1011_vm0, %v8435_v57  ;;  %v9172_v57 = vld [vmem:[#allocation20_spill] sm:$0xff] }
 0x436   : > { %6526 = vmatmul.mubr.msk.f32.vlgmr.msra.gmra.mrb[50].mxu0 %vm1011_vm0, %v8438_v51 }
 0x437   : > { %6709 = vmatpush3.bf16.msra.mxu0 %v6708_v33  ;;  %6532 = vmatprep.mubr.msk.f32.mxu0 %vm7222_vm3, %v9167_v27 }
 0x438   : > { %6718 = vmatprep.subr.bf16.mxu0 %v6717_v2 }
 0x43a   : > { %v5153_v26 = vpop.permute.xlu1 %5152 }
 0x444   : > { %v3647_v30 = vpop.trf.xlu0 }
 0x445   : > { %3845 = vst.msk [vmem:[%s8570_s24 + $0x30] sm:$0xff] %vm922_vm2, %v3647_v30  ;;  %6467 = vmatmul.mubr.msk.f32.vlgmr.msra.gmra.mrb[42].mxu1 %vm922_vm2, %v3647_v30 }
 0x446   : > { %6699 = vmatpush3.bf16.msra.mxu1 %v8597_v48  ;;  %6469 = vmatprep.mubr.msk.f32.mxu1 %vm7222_vm3, %v9167_v27 }
 0x447   : > { %6501 = vmatprep.subr.mxu1 %v9172_v57 }
 0x448   : > { %v3648_v51 = vpop.trf.xlu0 }
 0x449   : > { %3846 = vst.msk [vmem:[%s8570_s24 + $0x38] sm:$0xff] %vm922_vm2, %v3648_v51  ;;  %6470 = vmatmul.mubr.msk.f32.gmra.mrb[44].mxu1 %vm922_vm2, %v3648_v51 }
 0x44a   : > { %6502 = vmatpush3.msra.mxu1 %v9172_v57  ;;  %6472 = vmatprep.mubr.msk.f32.mxu1 %vm7222_vm3, %v9167_v27 }
 0x44b   : > { %6700 = vmatprep.subr.bf16.mxu1 %v9166_v53 }
 0x44c   : > { %v3649_v28 = vpop.trf.xlu0 }
 0x44d   : > { %3847 = vst.msk [vmem:[%s8570_s24 + $0x40] sm:$0xff] %vm922_vm2, %v3649_v28  ;;  %6473 = vmatmul.mubr.msk.f32.gmra.mrb[46].mxu1 %vm922_vm2, %v3649_v28 }
 0x44e   : > { %6503 = vmatprep.mubr.msk.f32.mxu1 %vm1011_vm0, %v8447_v43 }
 0x451   : > { %6504 = vmatmul.mubr.msk.f32.vlgmr.msra.gmra.mrb[48].mxu1 %vm1011_vm0, %v8450_v24 }
 0x452   : > { %6702 = vmatpush3.bf16.msra.mxu1 %v6701_v46  ;;  %6510 = vmatprep.mubr.msk.f32.mxu1 %vm7222_vm3, %v9167_v27 }
 0x453   : > { %6711 = vmatprep.subr.bf16.mxu1 %v6710_v13 }
 0x45b   : > { %v3711_v5 = vpop.trf.xlu0 }
 0x45c   : > { %3851 = vst.msk [vmem:[%s8570_s24 + $0x60] sm:$0xff] %vm922_vm2, %v3711_v5  ;;  %6511 = vmatmul.mubr.msk.f32.vlgmr.msra.gmra.mrb[50].mxu1 %vm922_vm2, %v3711_v5 }
 0x45d   : > { %6713 = vmatpush3.bf16.msra.mxu1 %v6710_v13  ;;  %6513 = vmatprep.mubr.msk.f32.mxu1 %vm7222_vm3, %v9167_v27 }
 0x45e   : > { %6545 = vmatprep.subr.mxu1 %v4968_v3 }
 0x45f   : > { %v3712_v43 = vpop.trf.xlu0 }
 0x460   : > { %3852 = vst.msk [vmem:[%s8570_s24 + $0x68] sm:$0xff] %vm922_vm2, %v3712_v43  ;;  %6514 = vmatmul.mubr.msk.f32.gmra.mrb[52].mxu1 %vm922_vm2, %v3712_v43 }
 0x461   : > { %6546 = vmatpush3.msra.mxu1 %v4968_v3  ;;  %6516 = vmatprep.mubr.msk.f32.mxu1 %vm7222_vm3, %v9167_v27 }
 0x462   : > { %6714 = vmatprep.subr.bf16.mxu1 %v9166_v53 }
 0x463   : > { %v3713_v24 = vpop.trf.xlu0 }
 0x464   : > { %3853 = vst.msk [vmem:[%s8570_s24 + $0x70] sm:$0xff] %vm922_vm2, %v3713_v24  ;;  %6517 = vmatmul.mubr.msk.f32.gmra.mrb[54].mxu1 %vm922_vm2, %v3713_v24 }
 0x465   : > { %6547 = vmatprep.mubr.msk.f32.mxu1 %vm1011_vm0, %v8458_v20 }
 0x468   : > { %6548 = vmatmul.mubr.msk.f32.vlgmr.msra.gmra.mrb[56].mxu1 %vm1011_vm0, %v8460_v25 }
 0x469   : > { %6554 = vmatprep.mubr.msk.f32.mxu1 %vm7222_vm3, %v9167_v27 }
 0x471   : > { %v3743_v1 = vpop.trf.xlu1 }
 0x472   : > { %3854 = vst.msk [vmem:[%s8570_s24 + $0x78] sm:$0xff] %vm922_vm2, %v3743_v1  ;;  %6533 = vmatmul.mubr.msk.f32.vlgmr.msra.gmra.mrb[52].mxu0 %vm922_vm2, %v3743_v1 }
 0x473   : > { %6720 = vmatpush3.bf16.msra.mxu0 %v6717_v2  ;;  %6535 = vmatprep.mubr.msk.f32.mxu0 %vm7222_vm3, %v9167_v27 }
 0x474   : > { %6567 = vmatprep.subr.mxu0 %v5153_v26 }
 0x475   : > { %v3744_v19 = vpop.trf.xlu1 }
 0x476   : > { %3855 = vst.msk [vmem:[%s8570_s24 + $0x80] sm:$0xff] %vm922_vm2, %v3744_v19  ;;  %6536 = vmatmul.mubr.msk.f32.gmra.mrb[54].mxu0 %vm922_vm2, %v3744_v19 }
 0x477   : > { %6568 = vmatpush3.msra.mxu0 %v5153_v26  ;;  %6538 = vmatprep.mubr.msk.f32.mxu0 %vm7222_vm3, %v9167_v27 }
 0x478   : > { %6721 = vmatprep.subr.bf16.mxu0 %v9166_v53 }
 0x479   : > { %v3745_v20 = vpop.trf.xlu1 }
 0x47a   : > { %3856 = vst.msk [vmem:[%s8570_s24 + $0x88] sm:$0xff] %vm922_vm2, %v3745_v20  ;;  %6539 = vmatmul.mubr.msk.f32.gmra.mrb[56].mxu0 %vm922_vm2, %v3745_v20 }
 0x47b   : > { %6569 = vmatprep.mubr.msk.f32.mxu0 %vm1011_vm0, %v8470_v29 }
 0x47e   : > { %6570 = vmatmul.mubr.msk.f32.vlgmr.msra.gmra.mrb[58].mxu0 %vm1011_vm0, %v8472_v12 }
 0x47f   : > { %6576 = vmatprep.mubr.msk.f32.mxu0 %vm7222_vm3, %v9167_v27 }
 0x49d   : > { %v3429_v25 = vpop.xlane.xlu0 %3428 }
 0x49e   : > { %v3451_v21 = vsub.f32 %v8261_v22, %v3429_v25 }
 0x4a0   : > { %v3479_v34 = vmul.f32 1.442695, %v3451_v21 }
 0x4a1   : > { %v3432_v15 = vpop.xlane.xlu0 %3431 }
 0x4a2   : > { %7060 = vpow2.f32 %v3479_v34  ;;  %v3452_v53 = vsub.f32 %v8284_v58, %v3432_v15 }
 0x4a4   : > { %v3481_v0 = vmul.f32 1.442695, %v3452_v53 }
 0x4a5   : > { %v3438_v10 = vpop.xlane.xlu0 %3437 }
 0x4a6   : > { %7062 = vpow2.f32 %v3481_v0  ;;  %v3454_v8 = vsub.f32 %v8307_v14, %v3438_v10 }
 0x4a8   : > { %v3485_v22 = vmul.f32 1.442695, %v3454_v8 }
 0x4ac   : > { %v8733_v29 = vpop.eup %7060 }
 0x4ad   : > { %v3435_v48 = vpop.xlane.xlu1 %3434  ;;  %v3523_v12 = vsel %vm1011_vm0, %v8733_v29, 0.0 }
 0x4ae   : > { %v3453_v9 = vsub.f32 %v8331_v42, %v3435_v48  ;;  %3524 = vadd.xlane.f32.xlu1 %v3523_v12 }
 0x4b0   : > { %v3483_v17 = vmul.f32 1.442695, %v3453_v9  ;;  %v8738_v62 = vpop.eup %7062 }
 0x4b1   : > { %v3526_v58 = vsel %vm1011_vm0, %v8738_v62, 0.0 }
 0x4b2   : > { %7064 = vpow2.f32 %v3483_v17  ;;  %3527 = vadd.xlane.f32.xlu1 %v3526_v58 }
 0x4b3   : > { %7066 = vpow2.f32 %v3485_v22 }
 0x4bc   : > { %v8742_v14 = vpop.eup %7064 }
 0x4bd   : > { %v3529_v45 = vsel %vm1011_vm0, %v8742_v14, 0.0  ;;  %v8746_v54 = vpop.eup %7066 }
 0x4be   : > { %3530 = vadd.xlane.f32.xlu0 %v3529_v45  ;;  %v3532_v42 = vsel %vm1011_vm0, %v8746_v54, 0.0 }
 0x4c2   : > { %3533 = vadd.xlane.f32.xlu0 %v3532_v42 }
 0x4c3   : > { %6875 = vrot.lane.b32.xlu1 %v9174_v16, %s7230_s21 }
 0x4c9   : > { %v8752_v44 = vpop.f32.mrb[34].mxu1 }
 0x4ca   : > { %v6424_v61 = vpop.f32.mrb[35].mxu1 }
 0x4cd   : > { %v8754_v11 = vpop.f32.mrb[36].mxu1 }
 0x4ce   : > { %v6427_v35 = vpop.f32.mrb[37].mxu1 }
 0x4d1   : > { %v8756_v39 = vpop.f32.mrb[38].mxu1 }
 0x4d2   : > { %v6430_v36 = vpop.f32.mrb[39].mxu1 }
 0x4d5   : > { %v8758_v60 = vpop.f32.mrb[40].mxu1 }
 0x4d6   : > { %v8760_v59 = vpop.f32.mrb[41].mxu1 }
 0x4d8   : > { %6880 = vrot.lane.b32.xlu0 %v9174_v16, %s7231_s26  ;;  %s7236_s26 = smov 40  }
 0x4ed   : > { %v8764_v55 = vpop.f32.mrb[36].mxu0 }
 0x4ee   : > { %v6446_v52 = vpop.f32.mrb[37].mxu0 }
 0x4f1   : > { %v8766_v47 = vpop.f32.mrb[38].mxu0 }
 0x4f2   : > { %v6449_v4 = vpop.f32.mrb[39].mxu0 }
 0x4f5   : > { %v8768_v49 = vpop.f32.mrb[40].mxu0 }
 0x4f6   : > { %v6452_v56 = vpop.f32.mrb[41].mxu0 }
 0x4f9   : > { %v8770_v23 = vpop.f32.mrb[42].mxu0 }
 0x4fa   : > { %v8772_v50 = vpop.f32.mrb[43].mxu0 }
 0x4fd   : > { %v8774_v41 = vpop.f32.mrb[44].mxu0 }
 0x4fe   : > { %v6490_v33 = vpop.f32.mrb[45].mxu0 }
 0x501   : > { %v8776_v2 = vpop.f32.mrb[46].mxu0 }
 0x502   : > { %v6493_v3 = vpop.f32.mrb[47].mxu0 }
 0x505   : > { %v8778_v30 = vpop.f32.mrb[48].mxu0 }
 0x506   : > { %v6496_v57 = vpop.f32.mrb[49].mxu0 }
 0x509   : > { %v8780_v51 = vpop.f32.mrb[50].mxu0 }
 0x50a   : > { %v8782_v7 = vpop.f32.mrb[51].mxu0 }
 0x518   : > { %v8784_v63 = vpop.f32.mrb[42].mxu1 }
 0x519   : > { %v6468_v37 = vpop.f32.mrb[43].mxu1 }
 0x51c   : > { %v8786_v28 = vpop.f32.mrb[44].mxu1 }
 0x51d   : > { %v6471_v40 = vpop.f32.mrb[45].mxu1 }
 0x520   : > { %v8788_v32 = vpop.f32.mrb[46].mxu1 }
 0x521   : > { %v6474_v46 = vpop.f32.mrb[47].mxu1 }
 0x524   : > { %v6505_v13 = vpop.f32.mrb[48].mxu1 }
 0x525   : > { %v8790_v5 = vpop.f32.mrb[49].mxu1 }
 0x52f   : > { %v8792_v43 = vpop.f32.mrb[50].mxu1 }
 0x530   : > { %v6512_v24 = vpop.f32.mrb[51].mxu1 }
 0x533   : > { %v8794_v26 = vpop.f32.mrb[52].mxu1 }
 0x534   : > { %v6515_v1 = vpop.f32.mrb[53].mxu1 }
 0x537   : > { %v8796_v19 = vpop.f32.mrb[54].mxu1 }
 0x538   : > { %v6518_v20 = vpop.f32.mrb[55].mxu1 }
 0x53b   : > { %v3525_v25 = vpop.xlane.xlu1 %3524  ;;  %v6549_v21 = vpop.f32.mrb[56].mxu1 }
 0x53c   : > { %7068 = vrcp.f32 %v3525_v25  ;;  %v5044_v34 = vpop.f32.mrb[57].mxu1 }
 0x53f   : > { %v3528_v15 = vpop.xlane.xlu1 %3527 }
 0x540   : > { %7070 = vrcp.f32 %v3528_v15 }
 0x543   : > { %v6876_v53 = vpop.permute.xlu1 %6875 }
 0x544   : > { %v6878_v0 = vunpack.i.h.bf16 %v6876_v53  ;;  %v6877_v10 = vunpack.i.l.bf16 %v6876_v53 }
 0x545   : > { %v8798_v8 = vpop.f32.mrb[52].mxu0 }
 0x546   : > { %v6534_v48 = vpop.f32.mrb[53].mxu0  ;;  %v7069_v12 = vpop.eup %7068  ;;  %v6715_v9 = vpack.c.bf16 %v6878_v0, %v6877_v10 }
 0x547   : > { %v3560_v22 = vmul.f32 %v7069_v12, %v8733_v29 }
 0x548   : > { %6716 = vmatpush3.bf16.msra.mxu1 %v6715_v9 }
 0x549   : > { %v4954_v17 = vpop.f32.mrb[54].mxu0  ;;  %3759 = vxpose.xlu1.b32.start [1/2] (short) (narrow) %v3560_v22, 24 }
 0x54a   : > { %v6537_v58 = vpop.f32.mrb[55].mxu0  ;;  %v7071_v45 = vpop.eup %7070 }
 0x54b   : > { %v3531_v42 = vpop.xlane.xlu0 %3530  ;;  %v3562_v16 = vmul.f32 %v7071_v45, %v8738_v62 }
 0x54c   : > { %7072 = vrcp.f32 %v3531_v42 }
 0x54d   : > { %v4959_v61 = vpop.f32.mrb[56].mxu0  ;;  %3760 = vxpose.xlu1.b32.end [2/2] (short) (narrow) %v3562_v16, 24 }
 0x54e   : > { %v6540_v35 = vpop.f32.mrb[57].mxu0 }
 0x54f   : > { %v3534_v36 = vpop.xlane.xlu0 %3533 }
 0x550   : > { %7074 = vrcp.f32 %v3534_v36 }
 0x551   : > { %v6571_v52 = vpop.f32.mrb[58].mxu0 }
 0x552   : > { %v5229_v4 = vpop.f32.mrb[59].mxu0 }
 0x553   : > { %v6881_v56 = vpop.permute.xlu0 %6880 }
 0x554   : > { %v6883_v33 = vunpack.i.h.bf16 %v6881_v56  ;;  %v6882_v3 = vunpack.i.l.bf16 %v6881_v56 }
 0x556   : > { %v7073_v29 = vpop.eup %7072  ;;  %v6722_v57 = vpack.c.bf16 %v6883_v33, %v6882_v3 }
 0x557   : > { %v3564_v37 = vmul.f32 %v7073_v29, %v8742_v14  ;;  %v5512_v14 = vld [vmem:[%s9108_s12] sm:$0xff] }
 0x558   : > { %6723 = vmatpush3.bf16.msra.mxu0 %v6722_v57 }
 0x559   : > { %3791 = vxpose.xlu0.b32.start [1/2] (short) (narrow) %v3564_v37, 24 }
 0x55a   : > { %v7075_v40 = vpop.eup %7074 }
 0x55b   : > { %v3566_v62 = vmul.f32 %v7075_v40, %v8746_v54 }
 0x55d   : > { %3792 = vxpose.xlu0.b32.end [2/2] (short) (narrow) %v3566_v62, 24 }
 0x56f   : > { %5337 = vrot.lane.b32.xlu1 %v8546_v6, %s9136_s23  ;;  %v5513_v6 = vld [vmem:[%s9108_s12 + $0x8] sm:$0xff] }
 0x570   : > { %v6724_v54 = vpack.c.bf16 %v5513_v6, %v5512_v14 }
 0x572   : > { %6725 = vmatprep.subr.bf16.mxu1 %v6724_v54 }
 0x573   : > { %5345 = vrot.lane.b32.xlu1 %v8758_v60, %s7233_s29  ;;  %v5515_v60 = vld [vmem:[%s9108_s12 + $0x18] sm:$0xff] }
 0x577   : > { %5353 = vrot.lane.b32.xlu1 %v8770_v23, %s7234_s4 }
 0x57b   : > { %5343 = vrot.lane.b32.xlu1 %v8760_v59, %s7233_s29 }
 0x57f   : > { %5361 = vrot.lane.b32.xlu1 %v6505_v13, %s7235_s27 }
 0x583   : > { %5369 = vrot.lane.b32.xlu1 %v8780_v51, %s7236_s26 }
 0x587   : > { %5377 = vrot.lane.b32.xlu1 %v6549_v21, %s7237_s5 }
 0x58a   : > { %5335 = vrot.lane.b32.xlu0 %v8548_v18, %s9136_s23  ;;  %v5514_v18 = vld [vmem:[%s9108_s12 + $0x10] sm:$0xff] }
 0x58b   : > { %5385 = vrot.lane.b32.xlu1 %v6571_v52, %s7238_s16  ;;  %v6728_v59 = vpack.c.bf16 %v5515_v60, %v5514_v18 }
 0x58e   : > { %5351 = vrot.lane.b32.xlu0 %v8772_v50, %s7234_s4 }
 0x58f   : > { %5412 = vrot.lane.b32.xlu1 %v8766_v47, %s9136_s23  ;;  %v5516_v47 = vld [vmem:[%s9108_s12 + $0x20] sm:$0xff] }
 0x592   : > { %5359 = vrot.lane.b32.xlu0 %v8790_v5, %s7235_s27 }
 0x593   : > { %5422 = vrot.lane.b32.xlu1 %v8784_v63, %s7233_s29 }
 0x596   : > { %5367 = vrot.lane.b32.xlu0 %v8782_v7, %s7236_s26 }
 0x597   : > { %5426 = vrot.lane.b32.xlu1 %v8788_v32, %s7233_s29 }
 0x59a   : > { %5375 = vrot.lane.b32.xlu0 %v5044_v34, %s7237_s5 }
 0x59b   : > { %5436 = vrot.lane.b32.xlu1 %v8776_v2, %s7234_s4  ;;  %v5519_v2 = vld [vmem:[%s9108_s12 + $0x38] sm:$0xff] }
 0x59e   : > { %5383 = vrot.lane.b32.xlu0 %v5229_v4, %s7238_s16 }
 0x59f   : > { %5446 = vrot.lane.b32.xlu1 %v8792_v43, %s7235_s27 }
 0x5a2   : > { %5410 = vrot.lane.b32.xlu0 %v8764_v55, %s9136_s23 }
 0x5a3   : > { %5450 = vrot.lane.b32.xlu1 %v8796_v19, %s7235_s27 }
 0x5a6   : > { %5414 = vrot.lane.b32.xlu0 %v8768_v49, %s9136_s23  ;;  %v5517_v49 = vld [vmem:[%s9108_s12 + $0x28] sm:$0xff] }
 0x5a7   : > { %5460 = vrot.lane.b32.xlu1 %v4954_v17, %s7236_s26  ;;  %v6732_v23 = vpack.c.bf16 %v5517_v49, %v5516_v47 }
 0x5aa   : > { %5424 = vrot.lane.b32.xlu0 %v8786_v28, %s7233_s29 }
 0x5ae   : > { %5434 = vrot.lane.b32.xlu0 %v8774_v41, %s7234_s4  ;;  %v5518_v41 = vld [vmem:[%s9108_s12 + $0x30] sm:$0xff] }
 0x5b2   : > { %5438 = vrot.lane.b32.xlu0 %v8778_v30, %s7234_s4  ;;  %v6736_v30 = vpack.c.bf16 %v5519_v2, %v5518_v41 }
 0x5b6   : > { %5448 = vrot.lane.b32.xlu0 %v8794_v26, %s7235_s27 }
 0x5ba   : > { %5458 = vrot.lane.b32.xlu0 %v8798_v8, %s7236_s26 }
 0x5be   : > { %5462 = vrot.lane.b32.xlu0 %v4959_v61, %s7236_s26 }
 0x5c9   : > { %v3775_v55 = vpop.trf.xlu1 }
 0x5ca   : > { %3857 = vst.msk [vmem:[%s8570_s24 + $0x90] sm:$0xff] %vm922_vm2, %v3775_v55  ;;  %6555 = vmatmul.mubr.msk.f32.vlgmr.msra.gmra.mrb[58].mxu1 %vm922_vm2, %v3775_v55 }
 0x5cb   : > { %6557 = vmatprep.mubr.msk.f32.mxu1 %vm7222_vm3, %v9167_v27  ;;  %6727 = vmatpush3.bf16.msra.mxu1 %v6724_v54 }
 0x5cc   : > { %6729 = vmatprep.subr.bf16.mxu1 %v6728_v59 }
 0x5cd   : > { %v3776_v50 = vpop.trf.xlu1 }
 0x5ce   : > { %3858 = vst.msk [vmem:[%s8570_s24 + $0x98] sm:$0xff] %vm922_vm2, %v3776_v50  ;;  %6558 = vmatmul.mubr.msk.f32.gmra.mrb[60].mxu1 %vm922_vm2, %v3776_v50 }
 0x5cf   : > { %6560 = vmatprep.mubr.msk.f32.mxu1 %vm7222_vm3, %v9167_v27  ;;  %6731 = vmatpush3.bf16.msra.mxu1 %v6728_v59 }
 0x5d0   : > { %6733 = vmatprep.subr.bf16.mxu1 %v6732_v23 }
 0x5d1   : > { %v3777_v51 = vpop.trf.xlu1 }
 0x5d2   : > { %3859 = vst.msk [vmem:[%s8570_s24 + $0xa0] sm:$0xff] %vm922_vm2, %v3777_v51  ;;  %6561 = vmatmul.mubr.msk.f32.gmra.mrb[62].mxu1 %vm922_vm2, %v3777_v51 }
 0x5d3   : > { %6735 = vmatpush3.bf16.msra.mxu1 %v6732_v23 }
 0x5d4   : > { %6737 = vmatprep.subr.bf16.mxu1 %v6736_v30 }
 0x5d7   : > { %6739 = vmatpush3.bf16.msra.mxu1 %v6736_v30 }
 0x5d9   : > { %v3807_v7 = vpop.trf.xlu0 }
 0x5da   : > { %3860 = vst.msk [vmem:[%s8570_s24 + $0xa8] sm:$0xff] %vm922_vm2, %v3807_v7  ;;  %6577 = vmatmul.mubr.msk.f32.vlgmr.msra.gmra.mrb[60].mxu0 %vm922_vm2, %v3807_v7 }
 0x5db   : > { %6579 = vmatprep.mubr.msk.f32.mxu0 %vm7222_vm3, %v9167_v27 }
 0x5dd   : > { %v3808_v63 = vpop.trf.xlu0 }
 0x5de   : > { %3861 = vst.msk [vmem:[%s8570_s24 + $0xb0] sm:$0xff] %vm922_vm2, %v3808_v63  ;;  %6580 = vmatmul.mubr.msk.f32.gmra.mrb[62].mxu0 %vm922_vm2, %v3808_v63 }
 0x5df   : > { %6582 = vmatprep.mubr.msk.f32.mxu0 %vm7222_vm3, %v9167_v27 }
 0x5e1   : > { %v3809_v28 = vpop.trf.xlu0  ;;  %v5338_v32 = vpop.permute.xlu1 %5337 }
 0x5e2   : > { %3862 = vst.msk [vmem:[%s8570_s24 + $0xb8] sm:$0xff] %vm922_vm2, %v3809_v28  ;;  %6583 = vmatmul.mubr.msk.f32.gmra.mrb[64].mxu0 %vm922_vm2, %v3809_v28  ;;  %v5391_v0 = vsel %vm5389_vm11, %v8537_v31, %v5338_v32  ;;  %s5915_s24 = sshll.u32 %s8289_s0, 4 }
 0x5e3   : > { %s646_s29 = scalar_lea.vmem [#allocation2], %s5915_s24 }
 0x5e4   : > { %s5647_s4 = sshll.u32 %s646_s29, 4  ;;  %s8960_s4 = int_to_ptr.vmem [resolvable:$true] %s5647_s4 }
 0x5e5   : > { %v5346_v46 = vpop.permute.xlu1 %5345  ;;  %s7097_s23 = scalar_lea.vmem %s8960_s4, 256 }
 0x5e6   : > { %v5393_v48 = vsel %vm922_vm2, %v5391_v0, %v5346_v46  ;;  %p7098_p11 = scmp.ne.s32.totalorder %s8960_s4, %s7097_s23 }
 0x5e8   : > { %p7099_p12 = pnand %p7098_p11, %p7373_p5 }
 0x5e9   : > { %v5354_v13 = vpop.permute.xlu1 %5353 }
 0x5ea   : > { %v5395_v9 = vsel %vm1011_vm0, %v5393_v48, %v5354_v13  ;;  %p7100_p13 = pneg %p7099_p12 }
 0x5ed   : > { %v5344_v5 = vpop.permute.xlu1 %5343 }
 0x5f1   : > { %v5362_v43 = vpop.permute.xlu1 %5361 }
 0x5f2   : > { %v5397_v22 = vsel %vm810_vm1, %v5395_v9, %v5362_v43 }
 0x5f5   : > { %v5370_v24 = vpop.permute.xlu1 %5369 }
 0x5f6   : > { %v5400_v31 = vsel %vm5398_vm12, %v5397_v22, %v5370_v24 }
 0x5f9   : > { %v5378_v26 = vpop.permute.xlu1 %5377 }
 0x5fa   : > { %v5403_v45 = vsel %vm5401_vm13, %v5400_v31, %v5378_v26  ;;  %v6028_v26 = vld [vmem:[%s9109_s13] ss:$0 sm:$0xff] }
 0x5fc   : > { %v5336_v1 = vpop.permute.xlu0 %5335 }
 0x5fd   : > { %v5386_v19 = vpop.permute.xlu1 %5385  ;;  %v5390_v15 = vsel %vm5389_vm11, %v8539_v38, %v5336_v1 }
 0x5fe   : > { %v5392_v10 = vsel %vm922_vm2, %v5390_v15, %v5344_v5  ;;  %v5406_v61 = vsel %vm5404_vm14, %v5403_v45, %v5386_v19 }
 0x600   : > { %v5352_v20 = vpop.permute.xlu0 %5351 }
 0x601   : > { %v5413_v25 = vpop.permute.xlu1 %5412  ;;  %v5394_v12 = vsel %vm1011_vm0, %v5392_v10, %v5352_v20 }
 0x602   : > { %v5492_v27 = vsel %vm5389_vm11, %v8754_v11, %v5413_v25 }
 0x604   : > { %v5360_v21 = vpop.permute.xlu0 %5359 }
 0x605   : > { %v5423_v53 = vpop.permute.xlu1 %5422  ;;  %v5396_v11 = vsel %vm810_vm1, %v5394_v12, %v5360_v21 }
 0x608   : > { %v5368_v34 = vpop.permute.xlu0 %5367 }
 0x609   : > { %v5399_v38 = vsel %vm5398_vm12, %v5396_v11, %v5368_v34  ;;  %v5427_v42 = vpop.permute.xlu1 %5426  ;;  %v7093_v34 = vld [vmem:[%s7427_s22] sm:$0xff] }
 0x60c   : > { %v5376_v8 = vpop.permute.xlu0 %5375 }
 0x60d   : > { %v5402_v17 = vsel %vm5401_vm13, %v5399_v38, %v5376_v8  ;;  %v5437_v52 = vpop.permute.xlu1 %5436 }
 0x610   : > { %v5384_v58 = vpop.permute.xlu0 %5383 }
 0x611   : > { %v5405_v16 = vsel %vm5404_vm14, %v5402_v17, %v5384_v58  ;;  %v5447_v3 = vpop.permute.xlu1 %5446 }
 0x612   : > { %6601 = vmatprep.mubr.msk.f32.mxu1 %vm892_vm6, %v5405_v16 }
 0x613   : > { %6602 = vmatmul.mubr.msk.f32.vlgmr.msra.gmra.mrb[64].mxu1 %vm892_vm6, %v5406_v61 }
 0x614   : > { %v5411_v35 = vpop.permute.xlu0 %5410 }
 0x615   : > { %v5491_v36 = vsel %vm5389_vm11, %v8752_v44, %v5411_v35  ;;  %v5451_v57 = vpop.permute.xlu1 %5450 }
 0x616   : > { %v5494_v62 = vsel %vm922_vm2, %v5491_v36, %v5423_v53 }
 0x618   : > { %v5415_v4 = vpop.permute.xlu0 %5414 }
 0x619   : > { %v5493_v56 = vsel %vm5389_vm11, %v8756_v39, %v5415_v4  ;;  %v5461_v54 = vpop.permute.xlu1 %5460 }
 0x61a   : > { %v5496_v39 = vsel %vm922_vm2, %v5493_v56, %v5427_v42 }
 0x61c   : > { %v5425_v33 = vpop.permute.xlu0 %5424 }
 0x61d   : > { %v5495_v40 = vsel %vm922_vm2, %v5492_v27, %v5425_v33  ;;  %v7092_v27 = vld [vmem:[%s7427_s22 + $0x8] sm:$0xff]  ;;  %s7239_s22 = smov [#allocation2]  }
 0x61e   : > { %v5498_v14 = vsel %vm1011_vm0, %v5495_v40, %v5437_v52  ;;  %s7101_s20 = sshll.u32 %s7239_s22, 4  ;;  %s7102_s20 = int_to_ptr.vmem [resolvable:$false] %s7101_s20 }
 0x61f   : > { %s7103_s24 = scalar_lea.vmem %s7102_s20, 512  ;;  %p7104_p0 = scmp.lt.s32.totalorder %s8960_s4, %s7102_s20 }
 0x620   : > { %v5435_v29 = vpop.permute.xlu0 %5434  ;;  %p7105_p1 = scmp.lt.s32.totalorder %s7103_s24, %s7097_s23 }
 0x621   : > { %v5497_v44 = vsel %vm1011_vm0, %v5494_v62, %v5435_v29 }
 0x622   : > { %v5500_v59 = vsel %vm810_vm1, %v5497_v44, %v5447_v3  ;;  %p7106_p2 = por %p7105_p1, %p7104_p0 }
 0x624   : > { %v5439_v37 = vpop.permute.xlu0 %5438  ;;  %p7107_p3 = pnand %p7106_p2, %p7100_p13 }
 0x625   : > { %v5499_v47 = vsel %vm1011_vm0, %v5496_v39, %v5439_v37 }
 0x626   : > { %v5502_v23 = vsel %vm810_vm1, %v5499_v47, %v5451_v57 }
 0x628   : > { %v5449_v6 = vpop.permute.xlu0 %5448 }
 0x629   : > { %v5501_v18 = vsel %vm810_vm1, %v5498_v14, %v5449_v6 }
 0x62a   : > { %v8930_v60 = vsel %vm5398_vm12, %v5501_v18, %v5461_v54 }
 0x62c   : > { %v5459_v55 = vpop.permute.xlu0 %5458 }
 0x62d   : > { %v8936_v49 = vsel %vm5398_vm12, %v5500_v59, %v5459_v55 }
 0x630   : > { %v5463_v50 = vpop.permute.xlu0 %5462 }
 0x631   : > { %v8940_v41 = vsel %vm5398_vm12, %v5502_v23, %v5463_v50 }
 0x69d   : > { %v5134_v2 = vpop.f32.mrb[58].mxu1 }
 0x69e   : > { %5470 = vrot.lane.b32.xlu1 %v5134_v2, %s7237_s5  ;;  %v6556_v30 = vpop.f32.mrb[59].mxu1 }
 0x6a1   : > { %v5139_v51 = vpop.f32.mrb[60].mxu1 }
 0x6a2   : > { %v6559_v7 = vpop.f32.mrb[61].mxu1 }
 0x6a5   : > { %v5144_v63 = vpop.f32.mrb[62].mxu1 }
 0x6a6   : > { %5474 = vrot.lane.b32.xlu1 %v5144_v63, %s7237_s5  ;;  %v6562_v28 = vpop.f32.mrb[63].mxu1 }
 0x6ad   : > { %v5319_v32 = vpop.f32.mrb[60].mxu0 }
 0x6ae   : > { %5482 = vrot.lane.b32.xlu0 %v5319_v32, %s7238_s16  ;;  %v6578_v46 = vpop.f32.mrb[61].mxu0 }
 0x6b1   : > { %v5324_v13 = vpop.f32.mrb[62].mxu0 }
 0x6b2   : > { %5472 = vrot.lane.b32.xlu0 %v5139_v51, %s7237_s5  ;;  %v6581_v5 = vpop.f32.mrb[63].mxu0  ;;  %5484 = vrot.lane.b32.xlu1 %v5324_v13, %s7238_s16  ;;  %s6044_s5 = sshll.u32 %s7354_s28, 8 }
 0x6b3   : > { %s8958_s26 = scalar_lea.hbm %s9110_s14, %s6044_s5 }
 0x6b5   : > { %v5329_v43 = vpop.f32.mrb[64].mxu0 }
 0x6b6   : > { %5486 = vrot.lane.b32.xlu0 %v5329_v43, %s7238_s16  ;;  %v6584_v24 = vpop.f32.mrb[65].mxu0 }
 0x6e6   : > { %v6603_v1 = vpop.f32.mrb[64].mxu1 }
 0x6e7   : > { %v5605_v19 = vadd.f32 %v6603_v1, %v6028_v26  ;;  %v5599_v20 = vpop.f32.mrb[65].mxu1 }
 0x6e8   : > { %v5600_v25 = vadd.f32 %v6028_v26, %v5599_v20 }
 0x6e9   : > { %v5609_v21 = vmul.f32 %v7092_v27, %v5605_v19 }
 0x6ea   : > { %v5608_v15 = vmul.f32 %v7093_v34, %v5600_v25 }
 0x6eb   : > { %5611 = vst.msk [vmem:[%s646_s29 + $0x8] sm:$0xff] %vm810_vm1, %v5609_v21 }
 0x6ec   : > { %5610 = vst.msk [vmem:[%s646_s29] sm:$0xff] %vm810_vm1, %v5608_v15 }
 0x6ed   : > { %7110 = shalt.err (!%p7107_p3)
}
 0x6ee   : > { %s7111_s30 = scalar_lea.hbm %s8958_s26, 256  ;;  %s7115_s5 = scalar_lea.hbm %s9110_s14, 512 }
 0x6ef   : > { %p7112_p4 = scmp.ne.s32.totalorder %s8958_s26, %s7111_s30  ;;  %p7116_p9 = scmp.lt.u32.totalorder %s8958_s26, %s9110_s14 }
 0x6f0   : > { %p7117_p10 = scmp.lt.u32.totalorder %s7115_s5, %s7111_s30  ;;  %p7119_p12 = scmp.lt.u32.totalorder %s7111_s30, %s8958_s26 }
 0x6f1   : > { %p7113_p7 = pnand %p7112_p4, %p7373_p5 }
 0x6f2   : > { %p7118_p11 = por %p7117_p10, %p7116_p9 }
 0x6f3   : > { %p7114_p8 = pneg %p7113_p7 }
 0x6f4   : > { %p7120_p13 = por %p7119_p12, %p7118_p11 }
 0x6f6   : > { %p7121_p0 = pnand %p7120_p13, %p7114_p8 }
 0x6f8   : > { %7124 = shalt.err (!%p7121_p0)
}
 0x6f9   : > { %s7240_s23 = smov 128   ;;  %s9175_s22 = smov 8   ;;  %v7094_v12 = vld [vmem:[%s7780_s19] sm:$0xff]  ;;  %v7095_v17 = vld [vmem:[%s7780_s19 + $0x8] sm:$0xff]  ;;  %v7096_v61 = vld [vmem:[%s7780_s19 + $0x10] sm:$0xff] }
 0x6fa   : > { %6744 = dma.vmem_to_hbm [thread:$0]  (%p7373_p5), %s8960_s4, 256, %s8958_s26, %s5619_s8, %s7240_s23, %s7240_s23, %s9175_s22  }
 0x6fb   : > { %s6740_s20 = smul.u32 24, %s8289_s0  ;;  %s5623_s0 = sand.u32 1, %s7354_s28  }
 0x6fc   : > { %s6743_s4 = smul.u32 384, %s7354_s28  ;;  %s6045_s8 = sshll.u32 %s7354_s28, 11 }
 0x6fd   : > { %s653_s24 = scalar_lea.vmem [#allocation4], %s6740_s20  ;;  %s5679_s30 = sshll.u32 %s8347_s18, 4  ;;  %s9022_s30 = int_to_ptr.vmem [resolvable:$true] %s5679_s30 }
 0x6fe   : > { %s5663_s26 = sshll.u32 %s653_s24, 4  ;;  %s9013_s5 = scalar_lea.hbm %s9111_s15, %s6743_s4  ;;  %s9015_s26 = int_to_ptr.vmem [resolvable:$true] %s5663_s26 }
 0x6ff   : > { %s9176_s20 = sld [smem:[#allocation27_spill]]  ;;  %s9025_s19 = scalar_lea.sflag [#allocation5], %s5623_s0 }
 0x700   : > { %s7125_s18 = scalar_lea.vmem %s9015_s26, 384  ;;  %s7241_s4 = smov [#allocation4]  }
 0x701   : > { %p7126_p1 = scmp.ne.s32.totalorder %s9015_s26, %s7125_s18  ;;  %s7129_s21 = sshll.u32 %s7241_s4, 4  ;;  %s7130_s21 = int_to_ptr.vmem [resolvable:$false] %s7129_s21 }
 0x702   : > { %s7131_s29 = scalar_lea.vmem %s7130_s21, 768  ;;  %p7132_p4 = scmp.lt.s32.totalorder %s9015_s26, %s7130_s21 }
 0x703   : > { %p7127_p2 = pnand %p7126_p1, %p7373_p5  ;;  %p7133_p7 = scmp.lt.s32.totalorder %s7131_s29, %s7125_s18 }
 0x705   : > { %s9020_s28 = scalar_lea.hbm %s9176_s20, %s6045_s8  ;;  %p7128_p3 = pneg %p7127_p2 }
 0x706   : > { %p7134_p8 = por %p7133_p7, %p7132_p4 }
 0x708   : > { %p7135_p9 = pnand %p7134_p8, %p7128_p3 }
 0x710   : > { %v5471_v53 = vpop.permute.xlu1 %5470 }
 0x711   : > { %v5506_v0 = vsel %vm5401_vm13, %v8936_v49, %v5471_v53 }
 0x718   : > { %v5475_v10 = vpop.permute.xlu1 %5474 }
 0x719   : > { %v5508_v45 = vsel %vm5401_vm13, %v8940_v41, %v5475_v10 }
 0x720   : > { %v5483_v8 = vpop.permute.xlu0 %5482 }
 0x721   : > { %v5509_v48 = vsel %vm5404_vm14, %v5506_v0, %v5483_v8 }
 0x722   : > { %v5612_v9 = vmul.f32 %v7094_v12, %v5509_v48 }
 0x724   : > { %5615 = vst.msk [vmem:[%s653_s24] sm:$0xff] %vm892_vm6, %v5612_v9  ;;  %v5473_v11 = vpop.permute.xlu0 %5472  ;;  %v5485_v22 = vpop.permute.xlu1 %5484 }
 0x725   : > { %v5507_v38 = vsel %vm5401_vm13, %v8930_v60, %v5473_v11 }
 0x726   : > { %v5510_v31 = vsel %vm5404_vm14, %v5507_v38, %v5485_v22 }
 0x727   : > { %v5613_v58 = vmul.f32 %v7095_v17, %v5510_v31 }
 0x728   : > { %v5487_v42 = vpop.permute.xlu0 %5486 }
 0x729   : > { %5616 = vst.msk [vmem:[%s653_s24 + $0x8] sm:$0xff] %vm892_vm6, %v5613_v58  ;;  %v5511_v16 = vsel %vm5404_vm14, %v5508_v45, %v5487_v42 }
 0x72a   : > { %v5614_v35 = vmul.f32 %v7096_v61, %v5511_v16 }
 0x72c   : > { %5617 = vst.msk [vmem:[%s653_s24 + $0x10] sm:$0xff] %vm892_vm6, %v5614_v35 }
 0x72d   : > { %7138 = shalt.err (!%p7135_p9)
}
 0x72e   : > { %s7139_s24 = scalar_lea.hbm %s9013_s5, 384  ;;  %s7143_s16 = scalar_lea.hbm %s9111_s15, 768 }
 0x72f   : > { %p7140_p10 = scmp.ne.s32.totalorder %s9013_s5, %s7139_s24  ;;  %p7144_p13 = scmp.lt.u32.totalorder %s9013_s5, %s9111_s15 }
 0x730   : > { %p7145_p0 = scmp.lt.u32.totalorder %s7143_s16, %s7139_s24  ;;  %p7147_p2 = scmp.lt.u32.totalorder %s7139_s24, %s9013_s5 }
 0x731   : > { %p7141_p11 = pnand %p7140_p10, %p7373_p5 }
 0x732   : > { %p7146_p1 = por %p7145_p0, %p7144_p13 }
 0x733   : > { %p7142_p12 = pneg %p7141_p11 }
 0x734   : > { %p7148_p3 = por %p7147_p2, %p7146_p1 }
 0x736   : > { %p7149_p4 = pnand %p7148_p3, %p7142_p12 }
 0x738   : > { %7152 = shalt.err (!%p7149_p4)
}
 0x739   : > { %6745 = dma.vmem_to_hbm [thread:$0]  (%p7373_p5), %s9015_s26, 384, %s9013_s5, %s9025_s19, %s7240_s23, %s7240_s23, %s9175_s22  }
 0x73a   : > { %s7153_s18 = scalar_lea.vmem %s9022_s30, 2048  ;;  %s7242_s21 = smov [#allocation6]  }
 0x73b   : > { %p7154_p7 = scmp.ne.s32.totalorder %s9022_s30, %s7153_s18  ;;  %s7157_s29 = sshll.u32 %s7242_s21, 4  ;;  %s7158_s29 = int_to_ptr.vmem [resolvable:$false] %s7157_s29 }
 0x73c   : > { %s7159_s24 = scalar_lea.vmem %s7158_s29, 4096  ;;  %p7160_p10 = scmp.lt.s32.totalorder %s9022_s30, %s7158_s29 }
 0x73d   : > { %p7155_p8 = pnand %p7154_p7, %p7373_p5  ;;  %p7161_p11 = scmp.lt.s32.totalorder %s7159_s24, %s7153_s18 }
 0x73f   : > { %p7156_p9 = pneg %p7155_p8  ;;  %p7162_p12 = por %p7161_p11, %p7160_p10 }
 0x741   : > { %p7163_p13 = pnand %p7162_p12, %p7156_p9 }
 0x743   : > { %7166 = shalt.err (!%p7163_p13)
}
 0x744   : > { %s7167_s26 = scalar_lea.hbm %s9020_s28, 2048  ;;  %s7171_s8 = scalar_lea.hbm %s9176_s20, 4096 }
 0x745   : > { %p7168_p0 = scmp.ne.s32.totalorder %s9020_s28, %s7167_s26  ;;  %p7172_p3 = scmp.lt.u32.totalorder %s9020_s28, %s9176_s20 }
 0x746   : > { %p7173_p4 = scmp.lt.u32.totalorder %s7171_s8, %s7167_s26  ;;  %p7175_p8 = scmp.lt.u32.totalorder %s7167_s26, %s9020_s28 }
 0x747   : > { %p7169_p1 = pnand %p7168_p0, %p7373_p5 }
 0x748   : > { %p7174_p7 = por %p7173_p4, %p7172_p3 }
 0x749   : > { %p7170_p2 = pneg %p7169_p1 }
 0x74a   : > { %p7176_p9 = por %p7175_p8, %p7174_p7 }
 0x74c   : > { %p7177_p10 = pnand %p7176_p9, %p7170_p2 }
 0x74e   : > { %7180 = shalt.err (!%p7177_p10)
}
 0x74f   : > { %6746 = dma.vmem_to_hbm [thread:$0]  (%p7373_p5), %s9022_s30, 2048, %s9020_s28, %s9025_s19, %s7240_s23, %s7240_s23, %s9175_s22  }
 0x750 PF: > { %s9177_s4 = sld [smem:[#allocation11_spill]]  ;;  %s9178_s18 = sld [smem:[#allocation9_spill]] }
 0x756   : > { %p6760_p11 = scmp.ge.s32.totalorder %s9177_s4, 2  ;;  %s5697_s29 = sand.u32 1, %s9178_s18  }
 0x757   : > { %s5698_s24 = scalar_lea.sflag [#allocation3], %s5697_s29 }
 0x758   : > { %p6751_p12 = pnand %p6760_p11, %p7377_p6 }
 0x75a   : > { %7198 = dma.done.wait (!%p6751_p12), %s5698_s24, 256  }
 0x75b   : > { %7200 = vsyncadd (!%p6751_p12), %s5698_s24, 4294967040  ;;  %s9180_s1 = sadd.s32 4294967294, %s9177_s4  }
 0x75c   : > { %s5706_s26 = sand.u32 1, %s9180_s1  }
 0x75d   : > { %s5707_s5 = scalar_lea.sflag [#allocation5], %s5706_s26 }
 0x75e   : > { %7202 = dma.done.wait (!%p6751_p12), %s5707_s5, 2432  }
 0x75f   : > { %7204 = vsyncadd (!%p6751_p12), %s5707_s5, 4294964864  ;;  %s9181_s27 = sld [smem:[#allocation12_spill]]  ;;  %s9182_s23 = sld [smem:[#allocation10_spill]] }
 0x760   : > { %s9183_s26 = sld [smem:[#allocation13_spill]]  ;;  %s9184_s24 = smov %s7211_s25 }
 0x765   : > { %p31_p5 = scmp.ge.s32.totalorder %s9181_s27, 4   ;;  %s9185_s25 = smov %s9182_s23 }
 0x767   :  { %33 = sbr.rel (!%p31_p5) target bundleno = 12 (0xc), region = 176 }
 0x76e   :  { %5729 = vsyncpa [#allocation3], 1 }
 0x76f   :  { %5731 = vsyncpa [#allocation3 + $0x1], 1 }
 0x770   :  { %5732 = vsyncpa [#allocation5], 1 }
 0x771   :  { %5734 = vsyncpa [#allocation5 + $0x1], 1 }

</bundles_post_ra>
